<compile_context>
chip_gen: v7x
topology: tpu7x:2x2x1
jax: 0.10.0
libtpu: 0.0.40
codegen_flags: <defaults>
</compile_context>

<pallas_src>
import functools

import jax
import jax.numpy as jnp
from jax.experimental import pallas as pl
from jax.experimental.pallas import tpu as pltpu

BN_EPS = 1e-5
VMEM_LIMIT = 48 * 1024 * 1024  # < 64 MiB (v7x physical), way above our live footprint


def _round_up(x, m):
    return (x + m - 1) // m * m


def _pad2d(x, mp, np_):
    m, n = x.shape
    if (m, n) == (mp, np_):
        return x
    return jnp.pad(x, ((0, mp - m), (0, np_ - n)))


# ---------------------------------------------------------------------------
# Pallas kernels
# ---------------------------------------------------------------------------
def _gemm_kernel(a_ref, b_ref, s_ref, c_ref, o_ref, acc_ref, *, fuse_affine):
    """o = (relu(a*scale+bias) if fuse_affine else a) @ b with f32 VMEM accum."""
    @pl.when(pl.program_id(2) == 0)
    def _():
        acc_ref[...] = jnp.zeros_like(acc_ref)

    a = a_ref[...]
    if fuse_affine:
        # Producer BatchNorm (folded to per-Cin scale/bias) + ReLU fused into
        # the A-load; rides in VALU slots that have slack in an MXU-bound GEMM.
        a = jnp.maximum(a.astype(jnp.float32) * s_ref[...] + c_ref[...], 0.0)
        a = a.astype(jnp.bfloat16)
    acc_ref[...] += jnp.dot(a, b_ref[...], preferred_element_type=jnp.float32)

    @pl.when(pl.program_id(2) == pl.num_programs(2) - 1)
    def _():
        o_ref[...] = acc_ref[...].astype(o_ref.dtype)


def _col_stats_kernel(x_ref, st_ref, acc_ref):
    """Column sum (row 0) and sum-of-squares (row 1), reduced over M tiles."""
    @pl.when(pl.program_id(0) == 0)
    def _():
        acc_ref[...] = jnp.zeros_like(acc_ref)   # rows 2..7 stay zero

    x = x_ref[...].astype(jnp.float32)
    acc_ref[0:1, :] += jnp.sum(x, axis=0, keepdims=True)
    acc_ref[1:2, :] += jnp.sum(x * x, axis=0, keepdims=True)

    @pl.when(pl.program_id(0) == pl.num_programs(0) - 1)
    def _():
        st_ref[...] = acc_ref[...]


def _tanh_kernel(x_ref, o_ref):
    o_ref[...] = jnp.tanh(x_ref[...])


# ---------------------------------------------------------------------------
# Pallas wrappers
# ---------------------------------------------------------------------------
def _pick_tiles(M, K, Ncols):
    """Lane-dense N tiles, large M tiles, but keep >=2 (M x N) parallel tiles
    whenever M allows so v7x's two TensorCores can split the grid."""
    tn = min(512, _round_up(Ncols, 128))
    tk = min(512, _round_up(K, 128))
    tm = min(512, _round_up(M, 16))
    if _round_up(Ncols, tn) // tn == 1 and M >= 32:
        tm = min(tm, _round_up((M + 1) // 2, 16))
    return tm, tn, tk


def convt_gemm(x_rows, w_mat, scale=None, bias=None, out_dtype=jnp.bfloat16):
    """(M,K) @ (K,Ncols) GEMM.  If scale/bias given, applies relu(a*s+c) to the
    A operand (per input channel = per K column) before the dot."""
    M, K = x_rows.shape
    Ncols = w_mat.shape[1]
    fuse = scale is not None

    tm, tn, tk = _pick_tiles(M, K, Ncols)
    Mp, Kp, Np = _round_up(M, tm), _round_up(K, tk), _round_up(Ncols, tn)
    nmt, nnt, nkt = Mp // tm, Np // tn, Kp // tk

    a_p = _pad2d(x_rows.astype(jnp.bfloat16), Mp, Kp)
    b_p = _pad2d(w_mat.astype(jnp.bfloat16), Kp, Np)
    if not fuse:   # dummies (unused by the kernel when fuse_affine=False)
        scale = jnp.ones((K,), jnp.float32)
        bias = jnp.zeros((K,), jnp.float32)
    s_p = _pad2d(scale.astype(jnp.float32).reshape(1, K), 1, Kp)
    c_p = _pad2d(bias.astype(jnp.float32).reshape(1, K), 1, Kp)

    out_bytes = 2 if out_dtype == jnp.bfloat16 else 4
    cost = pl.CostEstimate(
        flops=2 * Mp * Np * Kp, transcendentals=0,
        bytes_accessed=2 * (Mp * Kp + Kp * Np) + Mp * Np * out_bytes)

    return pl.pallas_call(
        functools.partial(_gemm_kernel, fuse_affine=fuse),
        grid=(nmt, nnt, nkt),
        out_shape=jax.ShapeDtypeStruct((Mp, Np), out_dtype),
        in_specs=[pl.BlockSpec((tm, tk), lambda i, j, k: (i, k)),
                  pl.BlockSpec((tk, tn), lambda i, j, k: (k, j)),
                  pl.BlockSpec((1, tk), lambda i, j, k: (0, k)),
                  pl.BlockSpec((1, tk), lambda i, j, k: (0, k))],
        out_specs=pl.BlockSpec((tm, tn), lambda i, j, k: (i, j)),
        scratch_shapes=[pltpu.VMEM((tm, tn), jnp.float32)],
        compiler_params=pltpu.CompilerParams(
            dimension_semantics=("parallel", "parallel", "arbitrary"),
            vmem_limit_bytes=VMEM_LIMIT),
        cost_estimate=cost,
    )(a_p, b_p, s_p, c_p)


def col_stats(x_rows):
    """Per-column sum and sum of squares (f32) of a (M, C) activation matrix."""
    M, C = x_rows.shape
    Np = _round_up(C, 128)
    tm = min(512, _round_up(M, 16))
    Mp = _round_up(M, tm)
    x_p = _pad2d(x_rows, Mp, Np)
    st = pl.pallas_call(
        _col_stats_kernel,
        grid=(Mp // tm,),
        out_shape=jax.ShapeDtypeStruct((8, Np), jnp.float32),
        in_specs=[pl.BlockSpec((tm, Np), lambda i: (i, 0))],
        out_specs=pl.BlockSpec((8, Np), lambda i: (0, 0)),
        scratch_shapes=[pltpu.VMEM((8, Np), jnp.float32)],
        compiler_params=pltpu.CompilerParams(
            dimension_semantics=("arbitrary",),
            vmem_limit_bytes=VMEM_LIMIT),
    )(x_p)
    return st[0, :C], st[1, :C]


def tanh_pallas(x2d):
    """Elementwise tanh on a small 2-D slab (single whole-array block)."""
    return pl.pallas_call(
        _tanh_kernel,
        out_shape=jax.ShapeDtypeStruct(x2d.shape, x2d.dtype),
    )(x2d)


# ---------------------------------------------------------------------------
# ConvTranspose2d glue (plain-JAX data movement; compute is in Pallas above)
# ---------------------------------------------------------------------------
def col2im_add(y, N, H, W, cout, k=4, stride=2, pad=1):
    """Overlap-add of per-input-pixel ConvTranspose contributions.
    y: (N*H*W, k*k*cout) rows, columns ordered (kh, kw, cout).  Returns NHWC."""
    # TODO(synk): the scatter-add stays plain-JAX glue (pure data movement).
    Ho = (H - 1) * stride - 2 * pad + k
    Wo = (W - 1) * stride - 2 * pad + k
    y6 = y.reshape(N, H, W, k, k, cout).astype(jnp.float32)
    buf = jnp.zeros((N, Ho + 2 * pad, Wo + 2 * pad, cout), jnp.float32)
    for kh in range(k):
        for kw in range(k):
            buf = buf.at[:, kh:kh + stride * H:stride,
                         kw:kw + stride * W:stride, :].add(y6[:, :, :, kh, kw, :])
    return buf[:, pad:pad + Ho, pad:pad + Wo, :], Ho, Wo


def bn_fold(col_sum, col_sq, count, gamma, beta):
    """Training-mode BatchNorm (batch stats, biased variance) -> scale/bias."""
    mean = col_sum / count
    var = col_sq / count - mean * mean
    scale = gamma / jnp.sqrt(var + BN_EPS)
    bias = beta - mean * scale
    return scale, bias


def prepare_params(p):
    """One-time weight prep: ConvTranspose2d weight (Cin,Cout,k,k) -> GEMM
    matrix (Cin, k*k*Cout) in bf16, columns ordered (kh, kw, cout)."""
    def wm(w):
        cin, cout, k, _ = w.shape
        return w.transpose(0, 2, 3, 1).reshape(cin, k * k * cout).astype(jnp.bfloat16)
    out = {"w5": wm(p["w5"])}
    for i in (1, 2, 3, 4):
        out[f"w{i}"] = wm(p[f"w{i}"])
        out[f"g{i}"] = p[f"g{i}"]
        out[f"b{i}"] = p[f"b{i}"]
    return out


# ---------------------------------------------------------------------------
# Generator forward (matches nn.Sequential in the PyTorch module)
# ---------------------------------------------------------------------------
def generator_forward(z, pp):
    """z: (N, nz, 1, 1) -> (N, nc, 64, 64); BatchNorm uses batch statistics
    (training mode), like the PyTorch Generator."""
    N = z.shape[0]
    x_rows = z.reshape(N, -1)            # (N, nz) rows; layer 1 input
    H = W = 1
    scale = bias = None                  # no BN/ReLU before the first conv

    layer_cfg = [("w1", "g1", "b1", 1, 0),
                 ("w2", "g2", "b2", 2, 1),
                 ("w3", "g3", "b3", 2, 1),
                 ("w4", "g4", "b4", 2, 1)]
    for wk, gk, bk, stride, pad in layer_cfg:
        w_mat = pp[wk]
        cout = w_mat.shape[1] // 16
        y = convt_gemm(x_rows, w_mat, scale, bias, out_dtype=jnp.bfloat16)
        y = y[:N * H * W, :16 * cout]                   # drop tile padding
        x_nhwc, H, W = col2im_add(y, N, H, W, cout, stride=stride, pad=pad)
        x_rows = x_nhwc.reshape(N * H * W, cout).astype(jnp.bfloat16)  # pre-BN act
        cs, cq = col_stats(x_rows)
        # scale/bias folded here; applied fused inside the *next* layer's GEMM.
        scale, bias = bn_fold(cs, cq, N * H * W, pp[gk], pp[bk])

    # ConvTranspose(ngf, nc, 4, 2, 1) + Tanh
    w_mat = pp["w5"]
    nc_ = w_mat.shape[1] // 16
    y = convt_gemm(x_rows, w_mat, scale, bias, out_dtype=jnp.float32)
    y = y[:N * H * W, :16 * nc_]
    out_nhwc, Ho, Wo = col2im_add(y, N, H, W, nc_, stride=2, pad=1)
    out = tanh_pallas(out_nhwc.reshape(N * Ho, Wo * nc_))
    return out.reshape(N, Ho, Wo, nc_).transpose(0, 3, 1, 2)   # NCHW, like PyTorch


# ---------------------------------------------------------------------------
# Parameter init + pure-JAX reference (for a loose numeric sanity check)
# ---------------------------------------------------------------------------
def init_params(key, nz, ngf, nc):
    ks = jax.random.split(key, 5)

    def conv_w(k, cin, cout):
        # DCGAN-style init: N(0, 0.02); ConvTranspose2d weight layout (Cin,Cout,4,4)
        return 0.02 * jax.random.normal(k, (cin, cout, 4, 4), jnp.float32)

    return {
        "w1": conv_w(ks[0], nz, ngf * 8),
        "g1": jnp.ones((ngf * 8,), jnp.float32), "b1": jnp.zeros((ngf * 8,), jnp.float32),
        "w2": conv_w(ks[1], ngf * 8, ngf * 4),
        "g2": jnp.ones((ngf * 4,), jnp.float32), "b2": jnp.zeros((ngf * 4,), jnp.float32),
        "w3": conv_w(ks[2], ngf * 4, ngf * 2),
        "g3": jnp.ones((ngf * 2,), jnp.float32), "b3": jnp.zeros((ngf * 2,), jnp.float32),
        "w4": conv_w(ks[3], ngf * 2, ngf),
        "g4": jnp.ones((ngf,), jnp.float32), "b4": jnp.zeros((ngf,), jnp.float32),
        "w5": conv_w(ks[4], ngf, nc),
    }


def generator_reference(z, p):
    """Plain-JAX f32 reference of the PyTorch Generator (training-mode BN)."""
    def convT(x, w, stride, pad):
        k = w.shape[-1]
        return jax.lax.conv_general_dilated(
            x, w[:, :, ::-1, ::-1], window_strides=(1, 1),
            padding=[(k - 1 - pad, k - 1 - pad)] * 2,
            lhs_dilation=(stride, stride),
            dimension_numbers=("NCHW", "IOHW", "NCHW"))

    def bn(x, g, b):
        mean = x.mean(axis=(0, 2, 3), keepdims=True)
        var = ((x - mean) ** 2).mean(axis=(0, 2, 3), keepdims=True)
        return (x - mean) * (g.reshape(1, -1, 1, 1) / jnp.sqrt(var + BN_EPS)) \
            + b.reshape(1, -1, 1, 1)

    x = jax.nn.relu(bn(convT(z, p["w1"], 1, 0), p["g1"], p["b1"]))
    x = jax.nn.relu(bn(convT(x, p["w2"], 2, 1), p["g2"], p["b2"]))
    x = jax.nn.relu(bn(convT(x, p["w3"], 2, 1), p["g3"], p["b3"]))
    x = jax.nn.relu(bn(convT(x, p["w4"], 2, 1), p["g4"], p["b4"]))
    return jnp.tanh(convT(x, p["w5"], 2, 1))


if __name__ == "__main__":
    # Generator maps a (N, nz, 1, 1) latent to a (N, nc, 64, 64) image.
    batch, nz, ngf, nc = 2, 16, 8, 3
    key = jax.random.PRNGKey(0)
    kz, kp = jax.random.split(key)

    z = jax.random.normal(kz, (batch, nz, 1, 1), jnp.float32)
    params = init_params(kp, nz, ngf, nc)
    prepped = prepare_params(params)      # one-time weight reshape + bf16 cast

    fwd = jax.jit(generator_forward)
    out = jax.block_until_ready(fwd(z, prepped))

    assert out.shape == (batch, nc, 64, 64), out.shape
    assert out.dtype == jnp.float32
    assert bool(jnp.all(jnp.isfinite(out)))
    assert bool(jnp.all(jnp.abs(out) <= 1.0))   # tanh output

    # Loose check vs the f32 reference (bf16 activations/GEMMs -> small drift).
    ref = generator_reference(z, params)
    err = float(jnp.max(jnp.abs(out - ref)))
    assert err < 5e-2, f"max |diff| vs reference too large: {err}"
    print("KERNEL_OK")
</pallas_src>

<mosaic_0001>
module attributes {stable_mosaic.version = 11 : i64} {
  func.func @_gemm_kernel(%arg0: i32, %arg1: i32, %arg2: i32, %arg3: memref<16x128xbf16, #tpu.memory_space<vmem>>, %arg4: memref<128x512xbf16, #tpu.memory_space<vmem>>, %arg5: memref<1x128xf32, #tpu.memory_space<vmem>>, %arg6: memref<1x128xf32, #tpu.memory_space<vmem>>, %arg7: memref<16x512xbf16, #tpu.memory_space<vmem>>, %arg8: memref<16x512xf32, #tpu.memory_space<vmem>>) attributes {dimension_semantics = [#tpu.dimension_semantics<parallel>, #tpu.dimension_semantics<parallel>, #tpu.dimension_semantics<arbitrary>], iteration_bounds = array<i64: 1, 2, 1>, scalar_prefetch = 0 : i64, scratch_operands = 1 : i64, tpu.core_type = #tpu.core_type<tc>, window_params = [{transform_indices = @transform_0, window_bounds = array<i64: 16, 128>}, {transform_indices = @transform_1, window_bounds = array<i64: 128, 512>}, {transform_indices = @transform_2, window_bounds = array<i64: 1, 128>}, {transform_indices = @transform_3, window_bounds = array<i64: 1, 128>}, {transform_indices = @transform_4, window_bounds = array<i64: 16, 512>}]} {
    %c0_i32 = arith.constant 0 : i32
    %0 = arith.cmpi eq, %arg2, %c0_i32 : i32
    %1 = arith.extui %0 : i1 to i32
    %c0_i32_0 = arith.constant 0 : i32
    %2 = arith.cmpi ne, %1, %c0_i32_0 : i32
    scf.if %2 {
      %cst_10 = arith.constant 0.000000e+00 : f32
      %12 = vector.broadcast %cst_10 : f32 to vector<16x512xf32>
      %c0_11 = arith.constant 0 : index
      %c0_12 = arith.constant 0 : index
      %13 = vector.load %arg8[%c0_11, %c0_12] : memref<16x512xf32, #tpu.memory_space<vmem>>, vector<16x512xf32>
      tpu.vector_store %arg8[%c0_11, %c0_12], %12 {strides = array<i32>} : memref<16x512xf32, #tpu.memory_space<vmem>>, vector<16x512xf32>,
    } else {
    }
    %c0 = arith.constant 0 : index
    %c0_1 = arith.constant 0 : index
    %3 = vector.load %arg3[%c0, %c0_1] : memref<16x128xbf16, #tpu.memory_space<vmem>>, vector<16x128xbf16>
    %c0_2 = arith.constant 0 : index
    %c0_3 = arith.constant 0 : index
    %4 = vector.load %arg8[%c0_2, %c0_3] : memref<16x512xf32, #tpu.memory_space<vmem>>, vector<16x512xf32>
    %c0_4 = arith.constant 0 : index
    %c0_5 = arith.constant 0 : index
    %5 = vector.load %arg4[%c0_4, %c0_5] : memref<128x512xbf16, #tpu.memory_space<vmem>>, vector<128x512xbf16>
    %cst = arith.constant dense<0.000000e+00> : vector<16x512xf32>
    %6 = tpu.matmul %3, %5, %cst {dimension_numbers = #tpu.dot_dimension_numbers<[1], [0], [0], [1], [0, 0, 1, 1], [], []>} : vector<16x128xbf16>, vector<128x512xbf16>, vector<16x512xf32> -> vector<16x512xf32>
    %7 = arith.addf %4, %6 : vector<16x512xf32>
    %c0_6 = arith.constant 0 : index
    %c0_7 = arith.constant 0 : index
    %8 = vector.load %arg8[%c0_6, %c0_7] : memref<16x512xf32, #tpu.memory_space<vmem>>, vector<16x512xf32>
    tpu.vector_store %arg8[%c0_6, %c0_7], %7 {strides = array<i32>} : memref<16x512xf32, #tpu.memory_space<vmem>>, vector<16x512xf32>,
    %c0_i32_8 = arith.constant 0 : i32
    %9 = arith.cmpi eq, %arg2, %c0_i32_8 : i32
    %10 = arith.extui %9 : i1 to i32
    %c0_i32_9 = arith.constant 0 : i32
    %11 = arith.cmpi ne, %10, %c0_i32_9 : i32
    scf.if %11 {
      %c0_10 = arith.constant 0 : index
      %c0_11 = arith.constant 0 : index
      %12 = vector.load %arg8[%c0_10, %c0_11] : memref<16x512xf32, #tpu.memory_space<vmem>>, vector<16x512xf32>
      %13 = arith.truncf %12 : vector<16x512xf32> to vector<16x512xbf16>
      %c0_12 = arith.constant 0 : index
      %c0_13 = arith.constant 0 : index
      %14 = vector.load %arg7[%c0_12, %c0_13] : memref<16x512xbf16, #tpu.memory_space<vmem>>, vector<16x512xbf16>
      tpu.vector_store %arg7[%c0_12, %c0_13], %13 {strides = array<i32>} : memref<16x512xbf16, #tpu.memory_space<vmem>>, vector<16x512xbf16>,
    } else {
    }
    return
  }
  func.func @transform_0(%arg0: i32, %arg1: i32, %arg2: i32) -> (i32, i32) {
    %c0_i32 = arith.constant 0 : i32
    return %arg0, %arg2 : i32, i32
  }
  func.func @transform_1(%arg0: i32, %arg1: i32, %arg2: i32) -> (i32, i32) {
    %c0_i32 = arith.constant 0 : i32
    return %arg2, %arg1 : i32, i32
  }
  func.func @transform_2(%arg0: i32, %arg1: i32, %arg2: i32) -> (i32, i32) {
    %c0_i32 = arith.constant 0 : i32
    %c0_i32_0 = arith.constant 0 : i32
    return %c0_i32, %arg2 : i32, i32
  }
  func.func @transform_3(%arg0: i32, %arg1: i32, %arg2: i32) -> (i32, i32) {
    %c0_i32 = arith.constant 0 : i32
    %c0_i32_0 = arith.constant 0 : i32
    return %c0_i32, %arg2 : i32, i32
  }
  func.func @transform_4(%arg0: i32, %arg1: i32, %arg2: i32) -> (i32, i32) {
    %c0_i32 = arith.constant 0 : i32
    return %arg0, %arg1 : i32, i32
  }
}

module attributes {stable_mosaic.version = 11 : i64} {
  func.func @_col_stats_kernel(%arg0: i32, %arg1: memref<32x128xbf16, #tpu.memory_space<vmem>>, %arg2: memref<8x128xf32, #tpu.memory_space<vmem>>, %arg3: memref<8x128xf32, #tpu.memory_space<vmem>>) attributes {dimension_semantics = [#tpu.dimension_semantics<arbitrary>], iteration_bounds = array<i64: 1>, scalar_prefetch = 0 : i64, scratch_operands = 1 : i64, tpu.core_type = #tpu.core_type<tc>, window_params = [{transform_indices = @transform_0, window_bounds = array<i64: 32, 128>}, {pipeline_mode = #tpu.pipeline_mode<synchronous>, transform_indices = @transform_1, window_bounds = array<i64: 8, 128>}]} {
    %c0_i32 = arith.constant 0 : i32
    %0 = arith.cmpi eq, %arg0, %c0_i32 : i32
    %1 = arith.extui %0 : i1 to i32
    %c0_i32_0 = arith.constant 0 : i32
    %2 = arith.cmpi ne, %1, %c0_i32_0 : i32
    scf.if %2 {
      %cst_12 = arith.constant 0.000000e+00 : f32
      %19 = vector.broadcast %cst_12 : f32 to vector<8x128xf32>
      %c0_13 = arith.constant 0 : index
      %c0_14 = arith.constant 0 : index
      %20 = vector.load %arg3[%c0_13, %c0_14] : memref<8x128xf32, #tpu.memory_space<vmem>>, vector<8x128xf32>
      tpu.vector_store %arg3[%c0_13, %c0_14], %19 {strides = array<i32>} : memref<8x128xf32, #tpu.memory_space<vmem>>, vector<8x128xf32>,
    } else {
    }
    %c0 = arith.constant 0 : index
    %c0_1 = arith.constant 0 : index
    %3 = vector.load %arg1[%c0, %c0_1] : memref<32x128xbf16, #tpu.memory_space<vmem>>, vector<32x128xbf16>
    %4 = arith.extf %3 : vector<32x128xbf16> to vector<32x128xf32>
    %c0_2 = arith.constant 0 : index
    %c0_3 = arith.constant 0 : index
    %5 = vector.load %arg3[%c0_2, %c0_3] : memref<8x128xf32, #tpu.memory_space<vmem>>, vector<1x128xf32>
    %cst = arith.constant dense<0.000000e+00> : vector<128xf32>
    %6 = vector.multi_reduction <add>, %4, %cst [0] : vector<32x128xf32> to vector<128xf32>
    %7 = vector.shape_cast %6 : vector<128xf32> to vector<1x128xf32>
    %8 = arith.addf %5, %7 : vector<1x128xf32>
    %c0_4 = arith.constant 0 : index
    %c0_5 = arith.constant 0 : index
    %9 = vector.load %arg3[%c0_4, %c0_5] : memref<8x128xf32, #tpu.memory_space<vmem>>, vector<1x128xf32>
    tpu.vector_store %arg3[%c0_4, %c0_5], %8 {strides = array<i32>} : memref<8x128xf32, #tpu.memory_space<vmem>>, vector<1x128xf32>,
    %c1 = arith.constant 1 : index
    %c0_6 = arith.constant 0 : index
    %10 = vector.load %arg3[%c1, %c0_6] : memref<8x128xf32, #tpu.memory_space<vmem>>, vector<1x128xf32>
    %11 = arith.mulf %4, %4 : vector<32x128xf32>
    %cst_7 = arith.constant dense<0.000000e+00> : vector<128xf32>
    %12 = vector.multi_reduction <add>, %11, %cst_7 [0] : vector<32x128xf32> to vector<128xf32>
    %13 = vector.shape_cast %12 : vector<128xf32> to vector<1x128xf32>
    %14 = arith.addf %10, %13 : vector<1x128xf32>
    %c1_8 = arith.constant 1 : index
    %c0_9 = arith.constant 0 : index
    %15 = vector.load %arg3[%c1_8, %c0_9] : memref<8x128xf32, #tpu.memory_space<vmem>>, vector<1x128xf32>
    tpu.vector_store %arg3[%c1_8, %c0_9], %14 {strides = array<i32>} : memref<8x128xf32, #tpu.memory_space<vmem>>, vector<1x128xf32>,
    %c0_i32_10 = arith.constant 0 : i32
    %16 = arith.cmpi eq, %arg0, %c0_i32_10 : i32
    %17 = arith.extui %16 : i1 to i32
    %c0_i32_11 = arith.constant 0 : i32
    %18 = arith.cmpi ne, %17, %c0_i32_11 : i32
    scf.if %18 {
      %c0_12 = arith.constant 0 : index
      %c0_13 = arith.constant 0 : index
      %19 = vector.load %arg3[%c0_12, %c0_13] : memref<8x128xf32, #tpu.memory_space<vmem>>, vector<8x128xf32>
      %c0_14 = arith.constant 0 : index
      %c0_15 = arith.constant 0 : index
      %20 = vector.load %arg2[%c0_14, %c0_15] : memref<8x128xf32, #tpu.memory_space<vmem>>, vector<8x128xf32>
      tpu.vector_store %arg2[%c0_14, %c0_15], %19 {strides = array<i32>} : memref<8x128xf32, #tpu.memory_space<vmem>>, vector<8x128xf32>,
    } else {
    }
    return
  }
  func.func @transform_0(%arg0: i32) -> (i32, i32) {
    %c0_i32 = arith.constant 0 : i32
    %c0_i32_0 = arith.constant 0 : i32
    return %arg0, %c0_i32 : i32, i32
  }
  func.func @transform_1(%arg0: i32) -> (i32, i32) {
    %c0_i32 = arith.constant 0 : i32
    %c0_i32_0 = arith.constant 0 : i32
    %c0_i32_1 = arith.constant 0 : i32
    return %c0_i32, %c0_i32_0 : i32, i32
  }
}

module attributes {stable_mosaic.version = 11 : i64} {
  func.func @_gemm_kernel(%arg0: i32, %arg1: i32, %arg2: i32, %arg3: memref<16x128xbf16, #tpu.memory_space<vmem>>, %arg4: memref<128x512xbf16, #tpu.memory_space<vmem>>, %arg5: memref<1x128xf32, #tpu.memory_space<vmem>>, %arg6: memref<1x128xf32, #tpu.memory_space<vmem>>, %arg7: memref<16x512xbf16, #tpu.memory_space<vmem>>, %arg8: memref<16x512xf32, #tpu.memory_space<vmem>>) attributes {dimension_semantics = [#tpu.dimension_semantics<parallel>, #tpu.dimension_semantics<parallel>, #tpu.dimension_semantics<arbitrary>], iteration_bounds = array<i64: 2, 1, 1>, scalar_prefetch = 0 : i64, scratch_operands = 1 : i64, tpu.core_type = #tpu.core_type<tc>, window_params = [{transform_indices = @transform_0, window_bounds = array<i64: 16, 128>}, {transform_indices = @transform_1, window_bounds = array<i64: 128, 512>}, {transform_indices = @transform_2, window_bounds = array<i64: 1, 128>}, {transform_indices = @transform_3, window_bounds = array<i64: 1, 128>}, {transform_indices = @transform_4, window_bounds = array<i64: 16, 512>}]} {
    %c0_i32 = arith.constant 0 : i32
    %0 = arith.cmpi eq, %arg2, %c0_i32 : i32
    %1 = arith.extui %0 : i1 to i32
    %c0_i32_0 = arith.constant 0 : i32
    %2 = arith.cmpi ne, %1, %c0_i32_0 : i32
    scf.if %2 {
      %cst_15 = arith.constant 0.000000e+00 : f32
      %22 = vector.broadcast %cst_15 : f32 to vector<16x512xf32>
      %c0_16 = arith.constant 0 : index
      %c0_17 = arith.constant 0 : index
      %23 = vector.load %arg8[%c0_16, %c0_17] : memref<16x512xf32, #tpu.memory_space<vmem>>, vector<16x512xf32>
      tpu.vector_store %arg8[%c0_16, %c0_17], %22 {strides = array<i32>} : memref<16x512xf32, #tpu.memory_space<vmem>>, vector<16x512xf32>,
    } else {
    }
    %c0 = arith.constant 0 : index
    %c0_1 = arith.constant 0 : index
    %3 = vector.load %arg3[%c0, %c0_1] : memref<16x128xbf16, #tpu.memory_space<vmem>>, vector<16x128xbf16>
    %4 = arith.extf %3 : vector<16x128xbf16> to vector<16x128xf32>
    %c0_2 = arith.constant 0 : index
    %c0_3 = arith.constant 0 : index
    %5 = vector.load %arg5[%c0_2, %c0_3] : memref<1x128xf32, #tpu.memory_space<vmem>>, vector<1x128xf32>
    %6 = vector.broadcast %5 : vector<1x128xf32> to vector<16x128xf32>
    %7 = arith.mulf %4, %6 : vector<16x128xf32>
    %c0_4 = arith.constant 0 : index
    %c0_5 = arith.constant 0 : index
    %8 = vector.load %arg6[%c0_4, %c0_5] : memref<1x128xf32, #tpu.memory_space<vmem>>, vector<1x128xf32>
    %9 = vector.broadcast %8 : vector<1x128xf32> to vector<16x128xf32>
    %10 = arith.addf %7, %9 : vector<16x128xf32>
    %cst = arith.constant 0.000000e+00 : f32
    %11 = vector.broadcast %cst : f32 to vector<16x128xf32>
    %12 = arith.maximumf %10, %11 : vector<16x128xf32>
    %13 = arith.truncf %12 : vector<16x128xf32> to vector<16x128xbf16>
    %c0_6 = arith.constant 0 : index
    %c0_7 = arith.constant 0 : index
    %14 = vector.load %arg8[%c0_6, %c0_7] : memref<16x512xf32, #tpu.memory_space<vmem>>, vector<16x512xf32>
    %c0_8 = arith.constant 0 : index
    %c0_9 = arith.constant 0 : index
    %15 = vector.load %arg4[%c0_8, %c0_9] : memref<128x512xbf16, #tpu.memory_space<vmem>>, vector<128x512xbf16>
    %cst_10 = arith.constant dense<0.000000e+00> : vector<16x512xf32>
    %16 = tpu.matmul %13, %15, %cst_10 {dimension_numbers = #tpu.dot_dimension_numbers<[1], [0], [0], [1], [0, 0, 1, 1], [], []>} : vector<16x128xbf16>, vector<128x512xbf16>, vector<16x512xf32> -> vector<16x512xf32>
    %17 = arith.addf %14, %16 : vector<16x512xf32>
    %c0_11 = arith.constant 0 : index
    %c0_12 = arith.constant 0 : index
    %18 = vector.load %arg8[%c0_11, %c0_12] : memref<16x512xf32, #tpu.memory_space<vmem>>, vector<16x512xf32>
    tpu.vector_store %arg8[%c0_11, %c0_12], %17 {strides = array<i32>} : memref<16x512xf32, #tpu.memory_space<vmem>>, vector<16x512xf32>,
    %c0_i32_13 = arith.constant 0 : i32
    %19 = arith.cmpi eq, %arg2, %c0_i32_13 : i32
    %20 = arith.extui %19 : i1 to i32
    %c0_i32_14 = arith.constant 0 : i32
    %21 = arith.cmpi ne, %20, %c0_i32_14 : i32
    scf.if %21 {
      %c0_15 = arith.constant 0 : index
      %c0_16 = arith.constant 0 : index
      %22 = vector.load %arg8[%c0_15, %c0_16] : memref<16x512xf32, #tpu.memory_space<vmem>>, vector<16x512xf32>
      %23 = arith.truncf %22 : vector<16x512xf32> to vector<16x512xbf16>
      %c0_17 = arith.constant 0 : index
      %c0_18 = arith.constant 0 : index
      %24 = vector.load %arg7[%c0_17, %c0_18] : memref<16x512xbf16, #tpu.memory_space<vmem>>, vector<16x512xbf16>
      tpu.vector_store %arg7[%c0_17, %c0_18], %23 {strides = array<i32>} : memref<16x512xbf16, #tpu.memory_space<vmem>>, vector<16x512xbf16>,
    } else {
    }
    return
  }
  func.func @transform_0(%arg0: i32, %arg1: i32, %arg2: i32) -> (i32, i32) {
    %c0_i32 = arith.constant 0 : i32
    return %arg0, %arg2 : i32, i32
  }
  func.func @transform_1(%arg0: i32, %arg1: i32, %arg2: i32) -> (i32, i32) {
    %c0_i32 = arith.constant 0 : i32
    return %arg2, %arg1 : i32, i32
  }
  func.func @transform_2(%arg0: i32, %arg1: i32, %arg2: i32) -> (i32, i32) {
    %c0_i32 = arith.constant 0 : i32
    %c0_i32_0 = arith.constant 0 : i32
    return %c0_i32, %arg2 : i32, i32
  }
  func.func @transform_3(%arg0: i32, %arg1: i32, %arg2: i32) -> (i32, i32) {
    %c0_i32 = arith.constant 0 : i32
    %c0_i32_0 = arith.constant 0 : i32
    return %c0_i32, %arg2 : i32, i32
  }
  func.func @transform_4(%arg0: i32, %arg1: i32, %arg2: i32) -> (i32, i32) {
    %c0_i32 = arith.constant 0 : i32
    return %arg0, %arg1 : i32, i32
  }
}

module attributes {stable_mosaic.version = 11 : i64} {
  func.func @_col_stats_kernel(%arg0: i32, %arg1: memref<128x128xbf16, #tpu.memory_space<vmem>>, %arg2: memref<8x128xf32, #tpu.memory_space<vmem>>, %arg3: memref<8x128xf32, #tpu.memory_space<vmem>>) attributes {dimension_semantics = [#tpu.dimension_semantics<arbitrary>], iteration_bounds = array<i64: 1>, scalar_prefetch = 0 : i64, scratch_operands = 1 : i64, tpu.core_type = #tpu.core_type<tc>, window_params = [{transform_indices = @transform_0, window_bounds = array<i64: 128, 128>}, {pipeline_mode = #tpu.pipeline_mode<synchronous>, transform_indices = @transform_1, window_bounds = array<i64: 8, 128>}]} {
    %c0_i32 = arith.constant 0 : i32
    %0 = arith.cmpi eq, %arg0, %c0_i32 : i32
    %1 = arith.extui %0 : i1 to i32
    %c0_i32_0 = arith.constant 0 : i32
    %2 = arith.cmpi ne, %1, %c0_i32_0 : i32
    scf.if %2 {
      %cst_12 = arith.constant 0.000000e+00 : f32
      %19 = vector.broadcast %cst_12 : f32 to vector<8x128xf32>
      %c0_13 = arith.constant 0 : index
      %c0_14 = arith.constant 0 : index
      %20 = vector.load %arg3[%c0_13, %c0_14] : memref<8x128xf32, #tpu.memory_space<vmem>>, vector<8x128xf32>
      tpu.vector_store %arg3[%c0_13, %c0_14], %19 {strides = array<i32>} : memref<8x128xf32, #tpu.memory_space<vmem>>, vector<8x128xf32>,
    } else {
    }
    %c0 = arith.constant 0 : index
    %c0_1 = arith.constant 0 : index
    %3 = vector.load %arg1[%c0, %c0_1] : memref<128x128xbf16, #tpu.memory_space<vmem>>, vector<128x128xbf16>
    %4 = arith.extf %3 : vector<128x128xbf16> to vector<128x128xf32>
    %c0_2 = arith.constant 0 : index
    %c0_3 = arith.constant 0 : index
    %5 = vector.load %arg3[%c0_2, %c0_3] : memref<8x128xf32, #tpu.memory_space<vmem>>, vector<1x128xf32>
    %cst = arith.constant dense<0.000000e+00> : vector<128xf32>
    %6 = vector.multi_reduction <add>, %4, %cst [0] : vector<128x128xf32> to vector<128xf32>
    %7 = vector.shape_cast %6 : vector<128xf32> to vector<1x128xf32>
    %8 = arith.addf %5, %7 : vector<1x128xf32>
    %c0_4 = arith.constant 0 : index
    %c0_5 = arith.constant 0 : index
    %9 = vector.load %arg3[%c0_4, %c0_5] : memref<8x128xf32, #tpu.memory_space<vmem>>, vector<1x128xf32>
    tpu.vector_store %arg3[%c0_4, %c0_5], %8 {strides = array<i32>} : memref<8x128xf32, #tpu.memory_space<vmem>>, vector<1x128xf32>,
    %c1 = arith.constant 1 : index
    %c0_6 = arith.constant 0 : index
    %10 = vector.load %arg3[%c1, %c0_6] : memref<8x128xf32, #tpu.memory_space<vmem>>, vector<1x128xf32>
    %11 = arith.mulf %4, %4 : vector<128x128xf32>
    %cst_7 = arith.constant dense<0.000000e+00> : vector<128xf32>
    %12 = vector.multi_reduction <add>, %11, %cst_7 [0] : vector<128x128xf32> to vector<128xf32>
    %13 = vector.shape_cast %12 : vector<128xf32> to vector<1x128xf32>
    %14 = arith.addf %10, %13 : vector<1x128xf32>
    %c1_8 = arith.constant 1 : index
    %c0_9 = arith.constant 0 : index
    %15 = vector.load %arg3[%c1_8, %c0_9] : memref<8x128xf32, #tpu.memory_space<vmem>>, vector<1x128xf32>
    tpu.vector_store %arg3[%c1_8, %c0_9], %14 {strides = array<i32>} : memref<8x128xf32, #tpu.memory_space<vmem>>, vector<1x128xf32>,
    %c0_i32_10 = arith.constant 0 : i32
    %16 = arith.cmpi eq, %arg0, %c0_i32_10 : i32
    %17 = arith.extui %16 : i1 to i32
    %c0_i32_11 = arith.constant 0 : i32
    %18 = arith.cmpi ne, %17, %c0_i32_11 : i32
    scf.if %18 {
      %c0_12 = arith.constant 0 : index
      %c0_13 = arith.constant 0 : index
      %19 = vector.load %arg3[%c0_12, %c0_13] : memref<8x128xf32, #tpu.memory_space<vmem>>, vector<8x128xf32>
      %c0_14 = arith.constant 0 : index
      %c0_15 = arith.constant 0 : index
      %20 = vector.load %arg2[%c0_14, %c0_15] : memref<8x128xf32, #tpu.memory_space<vmem>>, vector<8x128xf32>
      tpu.vector_store %arg2[%c0_14, %c0_15], %19 {strides = array<i32>} : memref<8x128xf32, #tpu.memory_space<vmem>>, vector<8x128xf32>,
    } else {
    }
    return
  }
  func.func @transform_0(%arg0: i32) -> (i32, i32) {
    %c0_i32 = arith.constant 0 : i32
    %c0_i32_0 = arith.constant 0 : i32
    return %arg0, %c0_i32 : i32, i32
  }
  func.func @transform_1(%arg0: i32) -> (i32, i32) {
    %c0_i32 = arith.constant 0 : i32
    %c0_i32_0 = arith.constant 0 : i32
    %c0_i32_1 = arith.constant 0 : i32
    return %c0_i32, %c0_i32_0 : i32, i32
  }
}

module attributes {stable_mosaic.version = 11 : i64} {
  func.func @_gemm_kernel(%arg0: i32, %arg1: i32, %arg2: i32, %arg3: memref<64x128xbf16, #tpu.memory_space<vmem>>, %arg4: memref<128x256xbf16, #tpu.memory_space<vmem>>, %arg5: memref<1x128xf32, #tpu.memory_space<vmem>>, %arg6: memref<1x128xf32, #tpu.memory_space<vmem>>, %arg7: memref<64x256xbf16, #tpu.memory_space<vmem>>, %arg8: memref<64x256xf32, #tpu.memory_space<vmem>>) attributes {dimension_semantics = [#tpu.dimension_semantics<parallel>, #tpu.dimension_semantics<parallel>, #tpu.dimension_semantics<arbitrary>], iteration_bounds = array<i64: 2, 1, 1>, scalar_prefetch = 0 : i64, scratch_operands = 1 : i64, tpu.core_type = #tpu.core_type<tc>, window_params = [{transform_indices = @transform_0, window_bounds = array<i64: 64, 128>}, {transform_indices = @transform_1, window_bounds = array<i64: 128, 256>}, {transform_indices = @transform_2, window_bounds = array<i64: 1, 128>}, {transform_indices = @transform_3, window_bounds = array<i64: 1, 128>}, {transform_indices = @transform_4, window_bounds = array<i64: 64, 256>}]} {
    %c0_i32 = arith.constant 0 : i32
    %0 = arith.cmpi eq, %arg2, %c0_i32 : i32
    %1 = arith.extui %0 : i1 to i32
    %c0_i32_0 = arith.constant 0 : i32
    %2 = arith.cmpi ne, %1, %c0_i32_0 : i32
    scf.if %2 {
      %cst_15 = arith.constant 0.000000e+00 : f32
      %22 = vector.broadcast %cst_15 : f32 to vector<64x256xf32>
      %c0_16 = arith.constant 0 : index
      %c0_17 = arith.constant 0 : index
      %23 = vector.load %arg8[%c0_16, %c0_17] : memref<64x256xf32, #tpu.memory_space<vmem>>, vector<64x256xf32>
      tpu.vector_store %arg8[%c0_16, %c0_17], %22 {strides = array<i32>} : memref<64x256xf32, #tpu.memory_space<vmem>>, vector<64x256xf32>,
    } else {
    }
    %c0 = arith.constant 0 : index
    %c0_1 = arith.constant 0 : index
    %3 = vector.load %arg3[%c0, %c0_1] : memref<64x128xbf16, #tpu.memory_space<vmem>>, vector<64x128xbf16>
    %4 = arith.extf %3 : vector<64x128xbf16> to vector<64x128xf32>
    %c0_2 = arith.constant 0 : index
    %c0_3 = arith.constant 0 : index
    %5 = vector.load %arg5[%c0_2, %c0_3] : memref<1x128xf32, #tpu.memory_space<vmem>>, vector<1x128xf32>
    %6 = vector.broadcast %5 : vector<1x128xf32> to vector<64x128xf32>
    %7 = arith.mulf %4, %6 : vector<64x128xf32>
    %c0_4 = arith.constant 0 : index
    %c0_5 = arith.constant 0 : index
    %8 = vector.load %arg6[%c0_4, %c0_5] : memref<1x128xf32, #tpu.memory_space<vmem>>, vector<1x128xf32>
    %9 = vector.broadcast %8 : vector<1x128xf32> to vector<64x128xf32>
    %10 = arith.addf %7, %9 : vector<64x128xf32>
    %cst = arith.constant 0.000000e+00 : f32
    %11 = vector.broadcast %cst : f32 to vector<64x128xf32>
    %12 = arith.maximumf %10, %11 : vector<64x128xf32>
    %13 = arith.truncf %12 : vector<64x128xf32> to vector<64x128xbf16>
    %c0_6 = arith.constant 0 : index
    %c0_7 = arith.constant 0 : index
    %14 = vector.load %arg8[%c0_6, %c0_7] : memref<64x256xf32, #tpu.memory_space<vmem>>, vector<64x256xf32>
    %c0_8 = arith.constant 0 : index
    %c0_9 = arith.constant 0 : index
    %15 = vector.load %arg4[%c0_8, %c0_9] : memref<128x256xbf16, #tpu.memory_space<vmem>>, vector<128x256xbf16>
    %cst_10 = arith.constant dense<0.000000e+00> : vector<64x256xf32>
    %16 = tpu.matmul %13, %15, %cst_10 {dimension_numbers = #tpu.dot_dimension_numbers<[1], [0], [0], [1], [0, 0, 1, 1], [], []>} : vector<64x128xbf16>, vector<128x256xbf16>, vector<64x256xf32> -> vector<64x256xf32>
    %17 = arith.addf %14, %16 : vector<64x256xf32>
    %c0_11 = arith.constant 0 : index
    %c0_12 = arith.constant 0 : index
    %18 = vector.load %arg8[%c0_11, %c0_12] : memref<64x256xf32, #tpu.memory_space<vmem>>, vector<64x256xf32>
    tpu.vector_store %arg8[%c0_11, %c0_12], %17 {strides = array<i32>} : memref<64x256xf32, #tpu.memory_space<vmem>>, vector<64x256xf32>,
    %c0_i32_13 = arith.constant 0 : i32
    %19 = arith.cmpi eq, %arg2, %c0_i32_13 : i32
    %20 = arith.extui %19 : i1 to i32
    %c0_i32_14 = arith.constant 0 : i32
    %21 = arith.cmpi ne, %20, %c0_i32_14 : i32
    scf.if %21 {
      %c0_15 = arith.constant 0 : index
      %c0_16 = arith.constant 0 : index
      %22 = vector.load %arg8[%c0_15, %c0_16] : memref<64x256xf32, #tpu.memory_space<vmem>>, vector<64x256xf32>
      %23 = arith.truncf %22 : vector<64x256xf32> to vector<64x256xbf16>
      %c0_17 = arith.constant 0 : index
      %c0_18 = arith.constant 0 : index
      %24 = vector.load %arg7[%c0_17, %c0_18] : memref<64x256xbf16, #tpu.memory_space<vmem>>, vector<64x256xbf16>
      tpu.vector_store %arg7[%c0_17, %c0_18], %23 {strides = array<i32>} : memref<64x256xbf16, #tpu.memory_space<vmem>>, vector<64x256xbf16>,
    } else {
    }
    return
  }
  func.func @transform_0(%arg0: i32, %arg1: i32, %arg2: i32) -> (i32, i32) {
    %c0_i32 = arith.constant 0 : i32
    return %arg0, %arg2 : i32, i32
  }
  func.func @transform_1(%arg0: i32, %arg1: i32, %arg2: i32) -> (i32, i32) {
    %c0_i32 = arith.constant 0 : i32
    return %arg2, %arg1 : i32, i32
  }
  func.func @transform_2(%arg0: i32, %arg1: i32, %arg2: i32) -> (i32, i32) {
    %c0_i32 = arith.constant 0 : i32
    %c0_i32_0 = arith.constant 0 : i32
    return %c0_i32, %arg2 : i32, i32
  }
  func.func @transform_3(%arg0: i32, %arg1: i32, %arg2: i32) -> (i32, i32) {
    %c0_i32 = arith.constant 0 : i32
    %c0_i32_0 = arith.constant 0 : i32
    return %c0_i32, %arg2 : i32, i32
  }
  func.func @transform_4(%arg0: i32, %arg1: i32, %arg2: i32) -> (i32, i32) {
    %c0_i32 = arith.constant 0 : i32
    return %arg0, %arg1 : i32, i32
  }
}

module attributes {stable_mosaic.version = 11 : i64} {
  func.func @_col_stats_kernel(%arg0: i32, %arg1: memref<512x128xbf16, #tpu.memory_space<vmem>>, %arg2: memref<8x128xf32, #tpu.memory_space<vmem>>, %arg3: memref<8x128xf32, #tpu.memory_space<vmem>>) attributes {dimension_semantics = [#tpu.dimension_semantics<arbitrary>], iteration_bounds = array<i64: 1>, scalar_prefetch = 0 : i64, scratch_operands = 1 : i64, tpu.core_type = #tpu.core_type<tc>, window_params = [{transform_indices = @transform_0, window_bounds = array<i64: 512, 128>}, {pipeline_mode = #tpu.pipeline_mode<synchronous>, transform_indices = @transform_1, window_bounds = array<i64: 8, 128>}]} {
    %c0_i32 = arith.constant 0 : i32
    %0 = arith.cmpi eq, %arg0, %c0_i32 : i32
    %1 = arith.extui %0 : i1 to i32
    %c0_i32_0 = arith.constant 0 : i32
    %2 = arith.cmpi ne, %1, %c0_i32_0 : i32
    scf.if %2 {
      %cst_12 = arith.constant 0.000000e+00 : f32
      %19 = vector.broadcast %cst_12 : f32 to vector<8x128xf32>
      %c0_13 = arith.constant 0 : index
      %c0_14 = arith.constant 0 : index
      %20 = vector.load %arg3[%c0_13, %c0_14] : memref<8x128xf32, #tpu.memory_space<vmem>>, vector<8x128xf32>
      tpu.vector_store %arg3[%c0_13, %c0_14], %19 {strides = array<i32>} : memref<8x128xf32, #tpu.memory_space<vmem>>, vector<8x128xf32>,
    } else {
    }
    %c0 = arith.constant 0 : index
    %c0_1 = arith.constant 0 : index
    %3 = vector.load %arg1[%c0, %c0_1] : memref<512x128xbf16, #tpu.memory_space<vmem>>, vector<512x128xbf16>
    %4 = arith.extf %3 : vector<512x128xbf16> to vector<512x128xf32>
    %c0_2 = arith.constant 0 : index
    %c0_3 = arith.constant 0 : index
    %5 = vector.load %arg3[%c0_2, %c0_3] : memref<8x128xf32, #tpu.memory_space<vmem>>, vector<1x128xf32>
    %cst = arith.constant dense<0.000000e+00> : vector<128xf32>
    %6 = vector.multi_reduction <add>, %4, %cst [0] : vector<512x128xf32> to vector<128xf32>
    %7 = vector.shape_cast %6 : vector<128xf32> to vector<1x128xf32>
    %8 = arith.addf %5, %7 : vector<1x128xf32>
    %c0_4 = arith.constant 0 : index
    %c0_5 = arith.constant 0 : index
    %9 = vector.load %arg3[%c0_4, %c0_5] : memref<8x128xf32, #tpu.memory_space<vmem>>, vector<1x128xf32>
    tpu.vector_store %arg3[%c0_4, %c0_5], %8 {strides = array<i32>} : memref<8x128xf32, #tpu.memory_space<vmem>>, vector<1x128xf32>,
    %c1 = arith.constant 1 : index
    %c0_6 = arith.constant 0 : index
    %10 = vector.load %arg3[%c1, %c0_6] : memref<8x128xf32, #tpu.memory_space<vmem>>, vector<1x128xf32>
    %11 = arith.mulf %4, %4 : vector<512x128xf32>
    %cst_7 = arith.constant dense<0.000000e+00> : vector<128xf32>
    %12 = vector.multi_reduction <add>, %11, %cst_7 [0] : vector<512x128xf32> to vector<128xf32>
    %13 = vector.shape_cast %12 : vector<128xf32> to vector<1x128xf32>
    %14 = arith.addf %10, %13 : vector<1x128xf32>
    %c1_8 = arith.constant 1 : index
    %c0_9 = arith.constant 0 : index
    %15 = vector.load %arg3[%c1_8, %c0_9] : memref<8x128xf32, #tpu.memory_space<vmem>>, vector<1x128xf32>
    tpu.vector_store %arg3[%c1_8, %c0_9], %14 {strides = array<i32>} : memref<8x128xf32, #tpu.memory_space<vmem>>, vector<1x128xf32>,
    %c0_i32_10 = arith.constant 0 : i32
    %16 = arith.cmpi eq, %arg0, %c0_i32_10 : i32
    %17 = arith.extui %16 : i1 to i32
    %c0_i32_11 = arith.constant 0 : i32
    %18 = arith.cmpi ne, %17, %c0_i32_11 : i32
    scf.if %18 {
      %c0_12 = arith.constant 0 : index
      %c0_13 = arith.constant 0 : index
      %19 = vector.load %arg3[%c0_12, %c0_13] : memref<8x128xf32, #tpu.memory_space<vmem>>, vector<8x128xf32>
      %c0_14 = arith.constant 0 : index
      %c0_15 = arith.constant 0 : index
      %20 = vector.load %arg2[%c0_14, %c0_15] : memref<8x128xf32, #tpu.memory_space<vmem>>, vector<8x128xf32>
      tpu.vector_store %arg2[%c0_14, %c0_15], %19 {strides = array<i32>} : memref<8x128xf32, #tpu.memory_space<vmem>>, vector<8x128xf32>,
    } else {
    }
    return
  }
  func.func @transform_0(%arg0: i32) -> (i32, i32) {
    %c0_i32 = arith.constant 0 : i32
    %c0_i32_0 = arith.constant 0 : i32
    return %arg0, %c0_i32 : i32, i32
  }
  func.func @transform_1(%arg0: i32) -> (i32, i32) {
    %c0_i32 = arith.constant 0 : i32
    %c0_i32_0 = arith.constant 0 : i32
    %c0_i32_1 = arith.constant 0 : i32
    return %c0_i32, %c0_i32_0 : i32, i32
  }
}

module attributes {stable_mosaic.version = 11 : i64} {
  func.func @_gemm_kernel(%arg0: i32, %arg1: i32, %arg2: i32, %arg3: memref<256x128xbf16, #tpu.memory_space<vmem>>, %arg4: memref<128x128xbf16, #tpu.memory_space<vmem>>, %arg5: memref<1x128xf32, #tpu.memory_space<vmem>>, %arg6: memref<1x128xf32, #tpu.memory_space<vmem>>, %arg7: memref<256x128xbf16, #tpu.memory_space<vmem>>, %arg8: memref<256x128xf32, #tpu.memory_space<vmem>>) attributes {dimension_semantics = [#tpu.dimension_semantics<parallel>, #tpu.dimension_semantics<parallel>, #tpu.dimension_semantics<arbitrary>], iteration_bounds = array<i64: 2, 1, 1>, scalar_prefetch = 0 : i64, scratch_operands = 1 : i64, tpu.core_type = #tpu.core_type<tc>, window_params = [{transform_indices = @transform_0, window_bounds = array<i64: 256, 128>}, {transform_indices = @transform_1, window_bounds = array<i64: 128, 128>}, {transform_indices = @transform_2, window_bounds = array<i64: 1, 128>}, {transform_indices = @transform_3, window_bounds = array<i64: 1, 128>}, {transform_indices = @transform_4, window_bounds = array<i64: 256, 128>}]} {
    %c0_i32 = arith.constant 0 : i32
    %0 = arith.cmpi eq, %arg2, %c0_i32 : i32
    %1 = arith.extui %0 : i1 to i32
    %c0_i32_0 = arith.constant 0 : i32
    %2 = arith.cmpi ne, %1, %c0_i32_0 : i32
    scf.if %2 {
      %cst_15 = arith.constant 0.000000e+00 : f32
      %22 = vector.broadcast %cst_15 : f32 to vector<256x128xf32>
      %c0_16 = arith.constant 0 : index
      %c0_17 = arith.constant 0 : index
      %23 = vector.load %arg8[%c0_16, %c0_17] : memref<256x128xf32, #tpu.memory_space<vmem>>, vector<256x128xf32>
      tpu.vector_store %arg8[%c0_16, %c0_17], %22 {strides = array<i32>} : memref<256x128xf32, #tpu.memory_space<vmem>>, vector<256x128xf32>,
    } else {
    }
    %c0 = arith.constant 0 : index
    %c0_1 = arith.constant 0 : index
    %3 = vector.load %arg3[%c0, %c0_1] : memref<256x128xbf16, #tpu.memory_space<vmem>>, vector<256x128xbf16>
    %4 = arith.extf %3 : vector<256x128xbf16> to vector<256x128xf32>
    %c0_2 = arith.constant 0 : index
    %c0_3 = arith.constant 0 : index
    %5 = vector.load %arg5[%c0_2, %c0_3] : memref<1x128xf32, #tpu.memory_space<vmem>>, vector<1x128xf32>
    %6 = vector.broadcast %5 : vector<1x128xf32> to vector<256x128xf32>
    %7 = arith.mulf %4, %6 : vector<256x128xf32>
    %c0_4 = arith.constant 0 : index
    %c0_5 = arith.constant 0 : index
    %8 = vector.load %arg6[%c0_4, %c0_5] : memref<1x128xf32, #tpu.memory_space<vmem>>, vector<1x128xf32>
    %9 = vector.broadcast %8 : vector<1x128xf32> to vector<256x128xf32>
    %10 = arith.addf %7, %9 : vector<256x128xf32>
    %cst = arith.constant 0.000000e+00 : f32
    %11 = vector.broadcast %cst : f32 to vector<256x128xf32>
    %12 = arith.maximumf %10, %11 : vector<256x128xf32>
    %13 = arith.truncf %12 : vector<256x128xf32> to vector<256x128xbf16>
    %c0_6 = arith.constant 0 : index
    %c0_7 = arith.constant 0 : index
    %14 = vector.load %arg8[%c0_6, %c0_7] : memref<256x128xf32, #tpu.memory_space<vmem>>, vector<256x128xf32>
    %c0_8 = arith.constant 0 : index
    %c0_9 = arith.constant 0 : index
    %15 = vector.load %arg4[%c0_8, %c0_9] : memref<128x128xbf16, #tpu.memory_space<vmem>>, vector<128x128xbf16>
    %cst_10 = arith.constant dense<0.000000e+00> : vector<256x128xf32>
    %16 = tpu.matmul %13, %15, %cst_10 {dimension_numbers = #tpu.dot_dimension_numbers<[1], [0], [0], [1], [0, 0, 1, 1], [], []>} : vector<256x128xbf16>, vector<128x128xbf16>, vector<256x128xf32> -> vector<256x128xf32>
    %17 = arith.addf %14, %16 : vector<256x128xf32>
    %c0_11 = arith.constant 0 : index
    %c0_12 = arith.constant 0 : index
    %18 = vector.load %arg8[%c0_11, %c0_12] : memref<256x128xf32, #tpu.memory_space<vmem>>, vector<256x128xf32>
    tpu.vector_store %arg8[%c0_11, %c0_12], %17 {strides = array<i32>} : memref<256x128xf32, #tpu.memory_space<vmem>>, vector<256x128xf32>,
    %c0_i32_13 = arith.constant 0 : i32
    %19 = arith.cmpi eq, %arg2, %c0_i32_13 : i32
    %20 = arith.extui %19 : i1 to i32
    %c0_i32_14 = arith.constant 0 : i32
    %21 = arith.cmpi ne, %20, %c0_i32_14 : i32
    scf.if %21 {
      %c0_15 = arith.constant 0 : index
      %c0_16 = arith.constant 0 : index
      %22 = vector.load %arg8[%c0_15, %c0_16] : memref<256x128xf32, #tpu.memory_space<vmem>>, vector<256x128xf32>
      %23 = arith.truncf %22 : vector<256x128xf32> to vector<256x128xbf16>
      %c0_17 = arith.constant 0 : index
      %c0_18 = arith.constant 0 : index
      %24 = vector.load %arg7[%c0_17, %c0_18] : memref<256x128xbf16, #tpu.memory_space<vmem>>, vector<256x128xbf16>
      tpu.vector_store %arg7[%c0_17, %c0_18], %23 {strides = array<i32>} : memref<256x128xbf16, #tpu.memory_space<vmem>>, vector<256x128xbf16>,
    } else {
    }
    return
  }
  func.func @transform_0(%arg0: i32, %arg1: i32, %arg2: i32) -> (i32, i32) {
    %c0_i32 = arith.constant 0 : i32
    return %arg0, %arg2 : i32, i32
  }
  func.func @transform_1(%arg0: i32, %arg1: i32, %arg2: i32) -> (i32, i32) {
    %c0_i32 = arith.constant 0 : i32
    return %arg2, %arg1 : i32, i32
  }
  func.func @transform_2(%arg0: i32, %arg1: i32, %arg2: i32) -> (i32, i32) {
    %c0_i32 = arith.constant 0 : i32
    %c0_i32_0 = arith.constant 0 : i32
    return %c0_i32, %arg2 : i32, i32
  }
  func.func @transform_3(%arg0: i32, %arg1: i32, %arg2: i32) -> (i32, i32) {
    %c0_i32 = arith.constant 0 : i32
    %c0_i32_0 = arith.constant 0 : i32
    return %c0_i32, %arg2 : i32, i32
  }
  func.func @transform_4(%arg0: i32, %arg1: i32, %arg2: i32) -> (i32, i32) {
    %c0_i32 = arith.constant 0 : i32
    return %arg0, %arg1 : i32, i32
  }
}

module attributes {stable_mosaic.version = 11 : i64} {
  func.func @_col_stats_kernel(%arg0: i32, %arg1: memref<512x128xbf16, #tpu.memory_space<vmem>>, %arg2: memref<8x128xf32, #tpu.memory_space<vmem>>, %arg3: memref<8x128xf32, #tpu.memory_space<vmem>>) attributes {dimension_semantics = [#tpu.dimension_semantics<arbitrary>], iteration_bounds = array<i64: 4>, scalar_prefetch = 0 : i64, scratch_operands = 1 : i64, tpu.core_type = #tpu.core_type<tc>, window_params = [{transform_indices = @transform_0, window_bounds = array<i64: 512, 128>}, {pipeline_mode = #tpu.pipeline_mode<synchronous>, transform_indices = @transform_1, window_bounds = array<i64: 8, 128>}]} {
    %c0_i32 = arith.constant 0 : i32
    %0 = arith.cmpi eq, %arg0, %c0_i32 : i32
    %1 = arith.extui %0 : i1 to i32
    %c0_i32_0 = arith.constant 0 : i32
    %2 = arith.cmpi ne, %1, %c0_i32_0 : i32
    scf.if %2 {
      %cst_11 = arith.constant 0.000000e+00 : f32
      %19 = vector.broadcast %cst_11 : f32 to vector<8x128xf32>
      %c0_12 = arith.constant 0 : index
      %c0_13 = arith.constant 0 : index
      %20 = vector.load %arg3[%c0_12, %c0_13] : memref<8x128xf32, #tpu.memory_space<vmem>>, vector<8x128xf32>
      tpu.vector_store %arg3[%c0_12, %c0_13], %19 {strides = array<i32>} : memref<8x128xf32, #tpu.memory_space<vmem>>, vector<8x128xf32>,
    } else {
    }
    %c0 = arith.constant 0 : index
    %c0_1 = arith.constant 0 : index
    %3 = vector.load %arg1[%c0, %c0_1] : memref<512x128xbf16, #tpu.memory_space<vmem>>, vector<512x128xbf16>
    %4 = arith.extf %3 : vector<512x128xbf16> to vector<512x128xf32>
    %c0_2 = arith.constant 0 : index
    %c0_3 = arith.constant 0 : index
    %5 = vector.load %arg3[%c0_2, %c0_3] : memref<8x128xf32, #tpu.memory_space<vmem>>, vector<1x128xf32>
    %cst = arith.constant dense<0.000000e+00> : vector<128xf32>
    %6 = vector.multi_reduction <add>, %4, %cst [0] : vector<512x128xf32> to vector<128xf32>
    %7 = vector.shape_cast %6 : vector<128xf32> to vector<1x128xf32>
    %8 = arith.addf %5, %7 : vector<1x128xf32>
    %c0_4 = arith.constant 0 : index
    %c0_5 = arith.constant 0 : index
    %9 = vector.load %arg3[%c0_4, %c0_5] : memref<8x128xf32, #tpu.memory_space<vmem>>, vector<1x128xf32>
    tpu.vector_store %arg3[%c0_4, %c0_5], %8 {strides = array<i32>} : memref<8x128xf32, #tpu.memory_space<vmem>>, vector<1x128xf32>,
    %c1 = arith.constant 1 : index
    %c0_6 = arith.constant 0 : index
    %10 = vector.load %arg3[%c1, %c0_6] : memref<8x128xf32, #tpu.memory_space<vmem>>, vector<1x128xf32>
    %11 = arith.mulf %4, %4 : vector<512x128xf32>
    %cst_7 = arith.constant dense<0.000000e+00> : vector<128xf32>
    %12 = vector.multi_reduction <add>, %11, %cst_7 [0] : vector<512x128xf32> to vector<128xf32>
    %13 = vector.shape_cast %12 : vector<128xf32> to vector<1x128xf32>
    %14 = arith.addf %10, %13 : vector<1x128xf32>
    %c1_8 = arith.constant 1 : index
    %c0_9 = arith.constant 0 : index
    %15 = vector.load %arg3[%c1_8, %c0_9] : memref<8x128xf32, #tpu.memory_space<vmem>>, vector<1x128xf32>
    tpu.vector_store %arg3[%c1_8, %c0_9], %14 {strides = array<i32>} : memref<8x128xf32, #tpu.memory_space<vmem>>, vector<1x128xf32>,
    %c3_i32 = arith.constant 3 : i32
    %16 = arith.cmpi eq, %arg0, %c3_i32 : i32
    %17 = arith.extui %16 : i1 to i32
    %c0_i32_10 = arith.constant 0 : i32
    %18 = arith.cmpi ne, %17, %c0_i32_10 : i32
    scf.if %18 {
      %c0_11 = arith.constant 0 : index
      %c0_12 = arith.constant 0 : index
      %19 = vector.load %arg3[%c0_11, %c0_12] : memref<8x128xf32, #tpu.memory_space<vmem>>, vector<8x128xf32>
      %c0_13 = arith.constant 0 : index
      %c0_14 = arith.constant 0 : index
      %20 = vector.load %arg2[%c0_13, %c0_14] : memref<8x128xf32, #tpu.memory_space<vmem>>, vector<8x128xf32>
      tpu.vector_store %arg2[%c0_13, %c0_14], %19 {strides = array<i32>} : memref<8x128xf32, #tpu.memory_space<vmem>>, vector<8x128xf32>,
    } else {
    }
    return
  }
  func.func @transform_0(%arg0: i32) -> (i32, i32) {
    %c0_i32 = arith.constant 0 : i32
    %c0_i32_0 = arith.constant 0 : i32
    return %arg0, %c0_i32 : i32, i32
  }
  func.func @transform_1(%arg0: i32) -> (i32, i32) {
    %c0_i32 = arith.constant 0 : i32
    %c0_i32_0 = arith.constant 0 : i32
    %c0_i32_1 = arith.constant 0 : i32
    return %c0_i32, %c0_i32_0 : i32, i32
  }
}

module attributes {stable_mosaic.version = 11 : i64} {
  func.func @_gemm_kernel(%arg0: i32, %arg1: i32, %arg2: i32, %arg3: memref<512x128xbf16, #tpu.memory_space<vmem>>, %arg4: memref<128x128xbf16, #tpu.memory_space<vmem>>, %arg5: memref<1x128xf32, #tpu.memory_space<vmem>>, %arg6: memref<1x128xf32, #tpu.memory_space<vmem>>, %arg7: memref<512x128xf32, #tpu.memory_space<vmem>>, %arg8: memref<512x128xf32, #tpu.memory_space<vmem>>) attributes {dimension_semantics = [#tpu.dimension_semantics<parallel>, #tpu.dimension_semantics<parallel>, #tpu.dimension_semantics<arbitrary>], iteration_bounds = array<i64: 4, 1, 1>, scalar_prefetch = 0 : i64, scratch_operands = 1 : i64, tpu.core_type = #tpu.core_type<tc>, window_params = [{transform_indices = @transform_0, window_bounds = array<i64: 512, 128>}, {transform_indices = @transform_1, window_bounds = array<i64: 128, 128>}, {transform_indices = @transform_2, window_bounds = array<i64: 1, 128>}, {transform_indices = @transform_3, window_bounds = array<i64: 1, 128>}, {transform_indices = @transform_4, window_bounds = array<i64: 512, 128>}]} {
    %c0_i32 = arith.constant 0 : i32
    %0 = arith.cmpi eq, %arg2, %c0_i32 : i32
    %1 = arith.extui %0 : i1 to i32
    %c0_i32_0 = arith.constant 0 : i32
    %2 = arith.cmpi ne, %1, %c0_i32_0 : i32
    scf.if %2 {
      %cst_15 = arith.constant 0.000000e+00 : f32
      %22 = vector.broadcast %cst_15 : f32 to vector<512x128xf32>
      %c0_16 = arith.constant 0 : index
      %c0_17 = arith.constant 0 : index
      %23 = vector.load %arg8[%c0_16, %c0_17] : memref<512x128xf32, #tpu.memory_space<vmem>>, vector<512x128xf32>
      tpu.vector_store %arg8[%c0_16, %c0_17], %22 {strides = array<i32>} : memref<512x128xf32, #tpu.memory_space<vmem>>, vector<512x128xf32>,
    } else {
    }
    %c0 = arith.constant 0 : index
    %c0_1 = arith.constant 0 : index
    %3 = vector.load %arg3[%c0, %c0_1] : memref<512x128xbf16, #tpu.memory_space<vmem>>, vector<512x128xbf16>
    %4 = arith.extf %3 : vector<512x128xbf16> to vector<512x128xf32>
    %c0_2 = arith.constant 0 : index
    %c0_3 = arith.constant 0 : index
    %5 = vector.load %arg5[%c0_2, %c0_3] : memref<1x128xf32, #tpu.memory_space<vmem>>, vector<1x128xf32>
    %6 = vector.broadcast %5 : vector<1x128xf32> to vector<512x128xf32>
    %7 = arith.mulf %4, %6 : vector<512x128xf32>
    %c0_4 = arith.constant 0 : index
    %c0_5 = arith.constant 0 : index
    %8 = vector.load %arg6[%c0_4, %c0_5] : memref<1x128xf32, #tpu.memory_space<vmem>>, vector<1x128xf32>
    %9 = vector.broadcast %8 : vector<1x128xf32> to vector<512x128xf32>
    %10 = arith.addf %7, %9 : vector<512x128xf32>
    %cst = arith.constant 0.000000e+00 : f32
    %11 = vector.broadcast %cst : f32 to vector<512x128xf32>
    %12 = arith.maximumf %10, %11 : vector<512x128xf32>
    %13 = arith.truncf %12 : vector<512x128xf32> to vector<512x128xbf16>
    %c0_6 = arith.constant 0 : index
    %c0_7 = arith.constant 0 : index
    %14 = vector.load %arg8[%c0_6, %c0_7] : memref<512x128xf32, #tpu.memory_space<vmem>>, vector<512x128xf32>
    %c0_8 = arith.constant 0 : index
    %c0_9 = arith.constant 0 : index
    %15 = vector.load %arg4[%c0_8, %c0_9] : memref<128x128xbf16, #tpu.memory_space<vmem>>, vector<128x128xbf16>
    %cst_10 = arith.constant dense<0.000000e+00> : vector<512x128xf32>
    %16 = tpu.matmul %13, %15, %cst_10 {dimension_numbers = #tpu.dot_dimension_numbers<[1], [0], [0], [1], [0, 0, 1, 1], [], []>} : vector<512x128xbf16>, vector<128x128xbf16>, vector<512x128xf32> -> vector<512x128xf32>
    %17 = arith.addf %14, %16 : vector<512x128xf32>
    %c0_11 = arith.constant 0 : index
    %c0_12 = arith.constant 0 : index
    %18 = vector.load %arg8[%c0_11, %c0_12] : memref<512x128xf32, #tpu.memory_space<vmem>>, vector<512x128xf32>
    tpu.vector_store %arg8[%c0_11, %c0_12], %17 {strides = array<i32>} : memref<512x128xf32, #tpu.memory_space<vmem>>, vector<512x128xf32>,
    %c0_i32_13 = arith.constant 0 : i32
    %19 = arith.cmpi eq, %arg2, %c0_i32_13 : i32
    %20 = arith.extui %19 : i1 to i32
    %c0_i32_14 = arith.constant 0 : i32
    %21 = arith.cmpi ne, %20, %c0_i32_14 : i32
    scf.if %21 {
      %c0_15 = arith.constant 0 : index
      %c0_16 = arith.constant 0 : index
      %22 = vector.load %arg8[%c0_15, %c0_16] : memref<512x128xf32, #tpu.memory_space<vmem>>, vector<512x128xf32>
      %c0_17 = arith.constant 0 : index
      %c0_18 = arith.constant 0 : index
      %23 = vector.load %arg7[%c0_17, %c0_18] : memref<512x128xf32, #tpu.memory_space<vmem>>, vector<512x128xf32>
      tpu.vector_store %arg7[%c0_17, %c0_18], %22 {strides = array<i32>} : memref<512x128xf32, #tpu.memory_space<vmem>>, vector<512x128xf32>,
    } else {
    }
    return
  }
  func.func @transform_0(%arg0: i32, %arg1: i32, %arg2: i32) -> (i32, i32) {
    %c0_i32 = arith.constant 0 : i32
    return %arg0, %arg2 : i32, i32
  }
  func.func @transform_1(%arg0: i32, %arg1: i32, %arg2: i32) -> (i32, i32) {
    %c0_i32 = arith.constant 0 : i32
    return %arg2, %arg1 : i32, i32
  }
  func.func @transform_2(%arg0: i32, %arg1: i32, %arg2: i32) -> (i32, i32) {
    %c0_i32 = arith.constant 0 : i32
    %c0_i32_0 = arith.constant 0 : i32
    return %c0_i32, %arg2 : i32, i32
  }
  func.func @transform_3(%arg0: i32, %arg1: i32, %arg2: i32) -> (i32, i32) {
    %c0_i32 = arith.constant 0 : i32
    %c0_i32_0 = arith.constant 0 : i32
    return %c0_i32, %arg2 : i32, i32
  }
  func.func @transform_4(%arg0: i32, %arg1: i32, %arg2: i32) -> (i32, i32) {
    %c0_i32 = arith.constant 0 : i32
    return %arg0, %arg1 : i32, i32
  }
}

module attributes {stable_mosaic.version = 11 : i64} {
  func.func @_tanh_kernel(%arg0: memref<128x192xf32, #tpu.memory_space<vmem>>, %arg1: memref<128x192xf32, #tpu.memory_space<vmem>>) attributes {dimension_semantics = [], scalar_prefetch = 0 : i64, scratch_operands = 0 : i64, tpu.core_type = #tpu.core_type<tc>} {
    %c0 = arith.constant 0 : index
    %c0_0 = arith.constant 0 : index
    %0 = vector.load %arg0[%c0, %c0_0] : memref<128x192xf32, #tpu.memory_space<vmem>>, vector<128x192xf32>
    %1 = math.tanh %0 : vector<128x192xf32>
    %c0_1 = arith.constant 0 : index
    %c0_2 = arith.constant 0 : index
    %2 = vector.load %arg1[%c0_1, %c0_2] : memref<128x192xf32, #tpu.memory_space<vmem>>, vector<128x192xf32>
    tpu.vector_store %arg1[%c0_1, %c0_2], %1 {strides = array<i32>} : memref<128x192xf32, #tpu.memory_space<vmem>>, vector<128x192xf32>,
    return
  }
}

</mosaic_0001>

<bundles_post_ra>
// kernel: generator_forward.11
= control target key start
LH: loop header
LB: loop body
LE: loop exit
PB: predicated region body
PF: predicated region fallthrough
CT: control target
= control target key end

     0   :  { %v68_v0 = vmov 0.0   ;;  %s88_s0 = inlined_call_operand.vmem [shape: bf16[32,128], index: 0, kind: input, shape index: {}]   ;;  %s89_s1 = inlined_call_operand.vmem [shape: f32[8,128], index: 1, kind: output, shape index: {}]  }
   0x1   :  { %12 = vst [vmem:[#allocation2] sm:$0xff] %v68_v0  ;;  %v59_v1 = vld [vmem:[%s88_s0] sm:$0xff]   ;;  %v66_v2 = vld [vmem:[%s88_s0 + $0x8] sm:$0xff]  }
   0x2   :  { %v60_v3 = vunpack.c.l.bf16 %v59_v1  ;;  %v61_v4 = vunpack.c.h.bf16 %v59_v1  ;;  %v64_v5 = vunpack.c.l.bf16 %v66_v2  ;;  %v65_v6 = vunpack.c.h.bf16 %v66_v2 }
   0x4   :  { %v22_v7 = vadd.f32 %v61_v4, %v60_v3  ;;  %v34_v8 = vmul.f32 %v60_v3, %v60_v3  ;;  %v35_v9 = vmul.f32 %v61_v4, %v61_v4  ;;  %v36_v10 = vmul.f32 %v64_v5, %v64_v5 }
   0x5   :  { %v37_v12 = vmul.f32 %v65_v6, %v65_v6 }
   0x6   :  { %v23_v11 = vadd.f32 %v64_v5, %v22_v7  ;;  %v38_v13 = vadd.f32 %v35_v9, %v34_v8 }
   0x8   :  { %v24_v14 = vadd.f32 %v65_v6, %v23_v11  ;;  %v39_v15 = vadd.f32 %v38_v13, %v36_v10  ;;  %v21_v26 = vld [vmem:[#allocation2] sm:$0x1]  ;;  %v33_v29 = vld [vmem:[#allocation2 + $0x1] sm:$0x1] }
   0xa   :  { %v25_v16 = vrot.slane %v24_v14, 4  ;;  %v40_v17 = vadd.f32 %v39_v15, %v37_v12 }
   0xc   :  { %v26_v18 = vadd.f32 %v25_v16, %v24_v14  ;;  %v41_v19 = vrot.slane %v40_v17, 4 }
   0xe   :  { %v27_v20 = vrot.slane %v26_v18, 2  ;;  %v42_v21 = vadd.f32 %v41_v19, %v40_v17 }
  0x10   :  { %v28_v22 = vadd.f32 %v27_v20, %v26_v18  ;;  %v43_v23 = vrot.slane %v42_v21, 2 }
  0x12   :  { %v29_v24 = vrot.slane %v28_v22, 1  ;;  %v44_v25 = vadd.f32 %v43_v23, %v42_v21 }
  0x14   :  { %v30_v27 = vadd.f32 %v29_v24, %v28_v22  ;;  %v45_v28 = vrot.slane %v44_v25, 1 }
  0x16   :  { %v31_v30 = vadd.f32 %v30_v27, %v21_v26  ;;  %v46_v31 = vadd.f32 %v45_v28, %v44_v25 }
  0x18   :  { %32 = vst [vmem:[#allocation2] sm:$0x1] %v31_v30  ;;  %v47_v32 = vadd.f32 %v46_v31, %v33_v29 }
  0x1a   :  { %48 = vst [vmem:[#allocation2 + $0x1] sm:$0x1] %v47_v32 }
  0x21   :  { %v52_v33 = vld [vmem:[#allocation2] sm:$0xff] }
  0x22   :  { %53 = vst [vmem:[%s89_s1] sm:$0xff] %v52_v33 }

// kernel: generator_forward.10
= control target key start
LH: loop header
LB: loop body
LE: loop exit
PB: predicated region body
PF: predicated region fallthrough
CT: control target
= control target key end

     0   :  { %s1096_s15 = smov 0   ;;  %s1098_s16 = smov 0   ;;  %s1277_s0 = inlined_call_operand.vmem [shape: bf16[16,128], index: 0, kind: input, shape index: {}]   ;;  %s1278_s1 = inlined_call_operand.vmem [shape: bf16[128,1024], index: 1, kind: input, shape index: {}]   ;;  %s1279_s2 = inlined_call_operand.vmem [shape: f32[1,128], index: 2, kind: input, shape index: {}]   ;;  %s1280_s3 = inlined_call_operand.vmem [shape: f32[1,128], index: 3, kind: input, shape index: {}]   ;;  %s1281_s4 = inlined_call_operand.vmem [shape: bf16[16,1024], index: 4, kind: output, shape index: {}]  }
   0x1   :  { %s1100_s17 = smov 0   ;;  %s1102_s18 = smov 0  }
   0x2   :  { %s1104_s19 = smov 0  }
   0x3 LB: > { %s29_s2 = sadd.s32 1, %s1064_s18  ;;  %s879_s3 = sadd.s32 4294967295, %s1068_s19   ;;  %s1068_s19 = sphi %s1104_s19, %s14_s19   ;;  %s1064_s18 = sphi %s1102_s18, %s1286_s18   ;;  %s1060_s17 = sphi %s1100_s17, %s1285_s17   ;;  %s1056_s16 = sphi %s1098_s16, %s1284_s16   ;;  %s1052_s15 = sphi %s1096_s15, %s1283_s15  }
   0x4   : > { %p31_p0 = scmp.ge.s32.totalorder %s29_s2, 2  ;;  %p77_p1 = scmp.ne.s32.totalorder %s1056_s16, %s1052_s15 }
   0x5   : > { %p78_p2 = scmp.eq.s32.totalorder %s1068_s19, 0  ;;  %p161_p4 = scmp.eq.s32.totalorder %s879_s3, 1 }
   0x6   : > { %s1288_s2 = smov (%p31_p0, %s29_s2), 0  ;;  %s70_s21 = sadd.s32 1, %s1056_s16 }
   0x7   : > { %p79_p3 = por %p78_p2, %p77_p1  ;;  %s66_s20 = ssub.s32 %s1064_s18, %s1288_s2 }
   0x8   : > { %p68_p5 = scmp.eq.s32.totalorder %s66_s20, 0  ;;  %p1131_p6 = por %p161_p4, %p77_p1 }
   0x9   : > { %p885_p7 = scmp.ge.s32.totalorder %s1068_s19, 2 }
   0xa   : > { %s1136_s23 = scalar_select %p68_p5, %s1056_s16, %s70_s21  }
   0xb   : > { %207 = sbr.rel (%p885_p7) target bundleno = 38 (0x26), region = 28 }
  0x12   : > { %210 = sbr.rel (!%p79_p3) target bundleno = 38 (0x26), region = 32  ;;  %s212_s24 = sand.u32 (%p79_p3), 1, %s1056_s16  }
  0x13   : > { %s934_s25 = sshll.u32 (%p79_p3), %s1064_s18, 4  ;;  %s886_s26 = sshll.u32 (%p79_p3), %s212_s24, 8 }
  0x14   : > { %s1144_s29 = scalar_lea.vmem (%p79_p3), %s1278_s1, %s934_s25  ;;  %s1149_s30 = scalar_lea.vmem (%p79_p3), [#allocation3], %s886_s26 }
  0x15   : > { %v233_v0 = vld [vmem:[%s1144_s29] sm:$0xff] (%p79_p3)  ;;  %v235_v1 = vld [vmem:[%s1144_s29 + $0x8] sm:$0xff] (%p79_p3) }
  0x16   : > { %v237_v2 = vld [vmem:[%s1144_s29 + $0x20] sm:$0xff] (%p79_p3)  ;;  %234 = vst [vmem:[%s1149_s30] sm:$0xff] (%p79_p3), %v233_v0  ;;  %236 = vst [vmem:[%s1149_s30 + $0x8] sm:$0xff] (%p79_p3), %v235_v1  ;;  %v239_v3 = vld [vmem:[%s1144_s29 + $0x28] sm:$0xff] (%p79_p3) }
  0x17   : > { %238 = vst [vmem:[%s1149_s30 + $0x10] sm:$0xff] (%p79_p3), %v237_v2  ;;  %v241_v4 = vld [vmem:[%s1144_s29 + $0x40] sm:$0xff] (%p79_p3)  ;;  %v243_v5 = vld [vmem:[%s1144_s29 + $0x48] sm:$0xff] (%p79_p3)  ;;  %240 = vst [vmem:[%s1149_s30 + $0x18] sm:$0xff] (%p79_p3), %v239_v3 }
  0x18   : > { %242 = vst [vmem:[%s1149_s30 + $0x20] sm:$0xff] (%p79_p3), %v241_v4  ;;  %244 = vst [vmem:[%s1149_s30 + $0x28] sm:$0xff] (%p79_p3), %v243_v5  ;;  %v245_v6 = vld [vmem:[%s1144_s29 + $0x60] sm:$0xff] (%p79_p3)  ;;  %v247_v7 = vld [vmem:[%s1144_s29 + $0x68] sm:$0xff] (%p79_p3) }
  0x19   : > { %v249_v8 = vld [vmem:[%s1144_s29 + $0x80] sm:$0xff]  ;;  %246 = vst [vmem:[%s1149_s30 + $0x30] sm:$0xff] %v245_v6  ;;  %248 = vst [vmem:[%s1149_s30 + $0x38] sm:$0xff] %v247_v7  ;;  %v251_v9 = vld [vmem:[%s1144_s29 + $0x88] sm:$0xff] }
  0x1a   : > { %250 = vst [vmem:[%s1149_s30 + $0x40] sm:$0xff] %v249_v8  ;;  %v253_v10 = vld [vmem:[%s1144_s29 + $0xa0] sm:$0xff]  ;;  %v255_v11 = vld [vmem:[%s1144_s29 + $0xa8] sm:$0xff]  ;;  %252 = vst [vmem:[%s1149_s30 + $0x48] sm:$0xff] %v251_v9 }
  0x1b   : > { %254 = vst [vmem:[%s1149_s30 + $0x50] sm:$0xff] %v253_v10  ;;  %256 = vst [vmem:[%s1149_s30 + $0x58] sm:$0xff] %v255_v11  ;;  %v257_v12 = vld [vmem:[%s1144_s29 + $0xc0] sm:$0xff]  ;;  %v259_v13 = vld [vmem:[%s1144_s29 + $0xc8] sm:$0xff] }
  0x1c   : > { %v261_v14 = vld [vmem:[%s1144_s29 + $0xe0] sm:$0xff]  ;;  %258 = vst [vmem:[%s1149_s30 + $0x60] sm:$0xff] %v257_v12  ;;  %260 = vst [vmem:[%s1149_s30 + $0x68] sm:$0xff] %v259_v13  ;;  %v263_v15 = vld [vmem:[%s1144_s29 + $0xe8] sm:$0xff] }
  0x1d   : > { %262 = vst [vmem:[%s1149_s30 + $0x70] sm:$0xff] %v261_v14  ;;  %v265_v16 = vld [vmem:[%s1144_s29 + $0x100] sm:$0xff]  ;;  %v267_v17 = vld [vmem:[%s1144_s29 + $0x108] sm:$0xff]  ;;  %264 = vst [vmem:[%s1149_s30 + $0x78] sm:$0xff] %v263_v15 }
  0x1e   : > { %266 = vst [vmem:[%s1149_s30 + $0x80] sm:$0xff] %v265_v16  ;;  %268 = vst [vmem:[%s1149_s30 + $0x88] sm:$0xff] %v267_v17  ;;  %v269_v18 = vld [vmem:[%s1144_s29 + $0x120] sm:$0xff]  ;;  %v271_v19 = vld [vmem:[%s1144_s29 + $0x128] sm:$0xff] }
  0x1f   : > { %v273_v20 = vld [vmem:[%s1144_s29 + $0x140] sm:$0xff]  ;;  %270 = vst [vmem:[%s1149_s30 + $0x90] sm:$0xff] %v269_v18  ;;  %272 = vst [vmem:[%s1149_s30 + $0x98] sm:$0xff] %v271_v19  ;;  %v275_v21 = vld [vmem:[%s1144_s29 + $0x148] sm:$0xff] }
  0x20   : > { %274 = vst [vmem:[%s1149_s30 + $0xa0] sm:$0xff] %v273_v20  ;;  %v277_v22 = vld [vmem:[%s1144_s29 + $0x160] sm:$0xff]  ;;  %v279_v23 = vld [vmem:[%s1144_s29 + $0x168] sm:$0xff]  ;;  %276 = vst [vmem:[%s1149_s30 + $0xa8] sm:$0xff] %v275_v21 }
  0x21   : > { %278 = vst [vmem:[%s1149_s30 + $0xb0] sm:$0xff] %v277_v22  ;;  %280 = vst [vmem:[%s1149_s30 + $0xb8] sm:$0xff] %v279_v23  ;;  %v281_v24 = vld [vmem:[%s1144_s29 + $0x180] sm:$0xff]  ;;  %v283_v25 = vld [vmem:[%s1144_s29 + $0x188] sm:$0xff] }
  0x22   : > { %v285_v26 = vld [vmem:[%s1144_s29 + $0x1a0] sm:$0xff]  ;;  %282 = vst [vmem:[%s1149_s30 + $0xc0] sm:$0xff] %v281_v24  ;;  %284 = vst [vmem:[%s1149_s30 + $0xc8] sm:$0xff] %v283_v25  ;;  %v287_v27 = vld [vmem:[%s1144_s29 + $0x1a8] sm:$0xff] }
  0x23   : > { %286 = vst [vmem:[%s1149_s30 + $0xd0] sm:$0xff] %v285_v26  ;;  %v289_v28 = vld [vmem:[%s1144_s29 + $0x1c0] sm:$0xff]  ;;  %v291_v29 = vld [vmem:[%s1144_s29 + $0x1c8] sm:$0xff]  ;;  %288 = vst [vmem:[%s1149_s30 + $0xd8] sm:$0xff] %v287_v27 }
  0x24   : > { %290 = vst [vmem:[%s1149_s30 + $0xe0] sm:$0xff] %v289_v28  ;;  %292 = vst [vmem:[%s1149_s30 + $0xe8] sm:$0xff] %v291_v29  ;;  %v293_v30 = vld [vmem:[%s1144_s29 + $0x1e0] sm:$0xff]  ;;  %v295_v31 = vld [vmem:[%s1144_s29 + $0x1e8] sm:$0xff] }
  0x25   : > { %294 = vst [vmem:[%s1149_s30 + $0xf0] sm:$0xff] %v293_v30  ;;  %296 = vst [vmem:[%s1149_s30 + $0xf8] sm:$0xff] %v295_v31 }
  0x26 PF: > { %p889_p8 = scmp.ge.s32.totalorder %s1068_s19, 1  ;;  %p301_p9 = scmp.lt.s32.totalorder %s1068_s19, 3 }
  0x28   : > { %p302_p10 = pnand %p889_p8, %p301_p9 }
  0x29   : > { %s308_s5 = sand.u32 (!%p302_p10), 1, %s1052_s15   ;;  %v1070_v32 = vmov (!%p302_p10), 0   ;;  %v1029_v1 = vld [vmem:[%s1277_s0] sm:$0xff] (!%p302_p10)  }
  0x2a   : > { %305 = sbr.rel (%p302_p10) target bundleno = 303 (0x12f), region = 55  ;;  %s890_s6 = sshll.u32 (!%p302_p10), %s308_s5, 8  ;;  %618 = vmatprep.mubr.bf16.mxu0 (!%p302_p10), %v1070_v32  ;;  %661 = vmatprep.mubr.bf16.mxu1 (!%p302_p10), %v1070_v32 }
  0x2b   : > { %s1217_s7 = scalar_lea.vmem (!%p302_p10), [#allocation3], %s890_s6  ;;  %s891_s10 = sshll.u32 (!%p302_p10), %s308_s5, 5 }
  0x2c   : > { %v981_v33 = vld [vmem:[%s1217_s7 + $0x4] ss:$16 sps:$4 sm:$0xff] (!%p302_p10)   ;;  %v983_v34 = vld [vmem:[%s1217_s7 + $0xc] ss:$16 sps:$4 sm:$0xff] (!%p302_p10)   ;;  %v985_v35 = vld [vmem:[%s1217_s7] ss:$16 sps:$4 sm:$0xff] (!%p302_p10)  }
  0x2d   : > { %586 = vmatprep.subr.bf16.mxu0 (!%p302_p10), %v981_v33  ;;  %v986_v36 = vld [vmem:[%s1217_s7 + $0x8] ss:$16 sps:$4 sm:$0xff] (!%p302_p10)   ;;  %629 = vmatprep.subr.bf16.mxu1 (!%p302_p10), %v983_v34  ;;  %v987_v37 = vld [vmem:[%s1217_s7 + $0x24] ss:$16 sps:$4 sm:$0xff] (!%p302_p10)   ;;  %v989_v38 = vld [vmem:[%s1217_s7 + $0x2c] ss:$16 sps:$4 sm:$0xff] (!%p302_p10)  }
  0x2e   : > { %587 = vmatpush1.bf16.msra.mxu0 (!%p302_p10), %v985_v35  ;;  %630 = vmatpush1.bf16.msra.mxu1 (!%p302_p10), %v986_v36  ;;  %v991_v39 = vld [vmem:[%s1217_s7 + $0x20] ss:$16 sps:$4 sm:$0xff] (!%p302_p10)   ;;  %v992_v40 = vld [vmem:[%s1217_s7 + $0x28] ss:$16 sps:$4 sm:$0xff] (!%p302_p10)   ;;  %v993_v41 = vld [vmem:[%s1217_s7 + $0x44] ss:$16 sps:$4 sm:$0xff] (!%p302_p10)  }
  0x2f   : > { %588 = vmatprep.subr.bf16.mxu0 (!%p302_p10), %v987_v37  ;;  %631 = vmatprep.subr.bf16.mxu1 (!%p302_p10), %v989_v38  ;;  %v995_v42 = vld [vmem:[%s1217_s7 + $0x4c] ss:$16 sps:$4 sm:$0xff] (!%p302_p10)   ;;  %v997_v43 = vld [vmem:[%s1217_s7 + $0x40] ss:$16 sps:$4 sm:$0xff] (!%p302_p10)   ;;  %v998_v44 = vld [vmem:[%s1217_s7 + $0x48] ss:$16 sps:$4 sm:$0xff] (!%p302_p10)  }
  0x30   : > { %v999_v45 = vld [vmem:[%s1217_s7 + $0x64] ss:$16 sps:$4 sm:$0xff] (!%p302_p10)   ;;  %v1001_v46 = vld [vmem:[%s1217_s7 + $0x6c] ss:$16 sps:$4 sm:$0xff] (!%p302_p10)   ;;  %v1003_v47 = vld [vmem:[%s1217_s7 + $0x60] ss:$16 sps:$4 sm:$0xff] (!%p302_p10)  }
  0x31   : > { %v1004_v48 = vld [vmem:[%s1217_s7 + $0x68] ss:$16 sps:$4 sm:$0xff]   ;;  %v1005_v49 = vld [vmem:[%s1217_s7 + $0x84] ss:$16 sps:$4 sm:$0xff]   ;;  %v1007_v50 = vld [vmem:[%s1217_s7 + $0x8c] ss:$16 sps:$4 sm:$0xff]  }
  0x32   : > { %589 = vmatpush1.bf16.msra.mxu0 %v991_v39  ;;  %632 = vmatpush1.bf16.msra.mxu1 %v992_v40  ;;  %v1009_v51 = vld [vmem:[%s1217_s7 + $0x80] ss:$16 sps:$4 sm:$0xff]   ;;  %v1010_v52 = vld [vmem:[%s1217_s7 + $0x88] ss:$16 sps:$4 sm:$0xff]   ;;  %v1011_v53 = vld [vmem:[%s1217_s7 + $0xa4] ss:$16 sps:$4 sm:$0xff]  }
  0x33   : > { %590 = vmatprep.subr.bf16.mxu0 %v993_v41  ;;  %633 = vmatprep.subr.bf16.mxu1 %v995_v42  ;;  %v1013_v54 = vld [vmem:[%s1217_s7 + $0xac] ss:$16 sps:$4 sm:$0xff]   ;;  %v1015_v55 = vld [vmem:[%s1217_s7 + $0xa0] ss:$16 sps:$4 sm:$0xff]   ;;  %v1016_v56 = vld [vmem:[%s1217_s7 + $0xa8] ss:$16 sps:$4 sm:$0xff]  }
  0x34   : > { %v1017_v57 = vld [vmem:[%s1217_s7 + $0xc4] ss:$16 sps:$4 sm:$0xff]   ;;  %v1019_v58 = vld [vmem:[%s1217_s7 + $0xcc] ss:$16 sps:$4 sm:$0xff]   ;;  %v1021_v59 = vld [vmem:[%s1217_s7 + $0xc0] ss:$16 sps:$4 sm:$0xff]  }
  0x35   : > { %v1022_v60 = vld [vmem:[%s1217_s7 + $0xc8] ss:$16 sps:$4 sm:$0xff]   ;;  %v1023_v61 = vld [vmem:[%s1217_s7 + $0xe4] ss:$16 sps:$4 sm:$0xff]   ;;  %v1025_v62 = vld [vmem:[%s1217_s7 + $0xec] ss:$16 sps:$4 sm:$0xff]  }
  0x36   : > { %591 = vmatpush1.bf16.msra.mxu0 %v997_v43  ;;  %634 = vmatpush1.bf16.msra.mxu1 %v998_v44  ;;  %v1027_v63 = vld [vmem:[%s1217_s7 + $0xe0] ss:$16 sps:$4 sm:$0xff]   ;;  %v1028_v0 = vld [vmem:[%s1217_s7 + $0xe8] ss:$16 sps:$4 sm:$0xff]   ;;  %s345_s11 = scalar_lea.vmem [#allocation4], %s891_s10  ;;  %s939_s12 = sshll.u32 (%p1131_p6), %s1060_s17, 4 }
  0x37   : > { %592 = vmatprep.subr.bf16.mxu0 %v999_v45  ;;  %635 = vmatprep.subr.bf16.mxu1 %v1001_v46  ;;  %s739_s15 = scalar_lea.vmem (%p1131_p6), %s1281_s4, %s939_s12 }
  0x3a   : > { %593 = vmatpush1.bf16.msra.mxu0 %v1003_v47  ;;  %636 = vmatpush1.bf16.msra.mxu1 %v1004_v48 }
  0x3b   : > { %594 = vmatprep.subr.bf16.mxu0 %v1005_v49  ;;  %637 = vmatprep.subr.bf16.mxu1 %v1007_v50 }
  0x3e   : > { %595 = vmatpush1.bf16.msra.mxu0 %v1009_v51  ;;  %638 = vmatpush1.bf16.msra.mxu1 %v1010_v52 }
  0x3f   : > { %596 = vmatprep.subr.bf16.mxu0 %v1011_v53  ;;  %639 = vmatprep.subr.bf16.mxu1 %v1013_v54 }
  0x42   : > { %597 = vmatpush1.bf16.msra.mxu0 %v1015_v55  ;;  %640 = vmatpush1.bf16.msra.mxu1 %v1016_v56 }
  0x43   : > { %598 = vmatprep.subr.bf16.mxu0 %v1017_v57  ;;  %641 = vmatprep.subr.bf16.mxu1 %v1019_v58 }
  0x46   : > { %599 = vmatpush1.bf16.msra.mxu0 %v1021_v59  ;;  %642 = vmatpush1.bf16.msra.mxu1 %v1022_v60 }
  0x47   : > { %600 = vmatprep.subr.bf16.mxu0 %v1023_v61  ;;  %643 = vmatprep.subr.bf16.mxu1 %v1025_v62 }
  0x4a   : > { %601 = vmatpush1.bf16.msra.mxu0 %v1027_v63  ;;  %644 = vmatpush1.bf16.msra.mxu1 %v1028_v0 }
  0x4d   : > { %619 = vmatmul.mubr.bf16.vlgmr.msra.gmra.mrb[0].mxu0 %v1029_v1  ;;  %662 = vmatmul.mubr.bf16.vlgmr.msra.gmra.mrb[0].mxu1 %v1029_v1 }
 0x120   : > { %v620_v2 = vpop.f32.mrb[0].mxu0  ;;  %v663_v3 = vpop.f32.mrb[0].mxu1  ;;  %733 = sbr.rel (!%p1131_p6) target bundleno = 303 (0x12f), region = 71 }
 0x121   : > { %v622_v4 = vpop.f32.mrb[1].mxu0  ;;  %v665_v5 = vpop.f32.mrb[1].mxu1 }
 0x122   : > { %v935_v6 = vpack.c.bf16 %v622_v4, %v620_v2  ;;  %v936_v7 = vpack.c.bf16 %v665_v5, %v663_v3  ;;  %v624_v8 = vpop.f32.mrb[2].mxu0  ;;  %v667_v9 = vpop.f32.mrb[2].mxu1 }
 0x123   : > { %v626_v10 = vpop.f32.mrb[3].mxu0  ;;  %v669_v11 = vpop.f32.mrb[3].mxu1 }
 0x124   : > { %723 = vst [vmem:[%s345_s11] sm:$0xff] %v935_v6  ;;  %724 = vst [vmem:[%s345_s11 + $0x8] sm:$0xff] %v936_v7  ;;  %v937_v12 = vpack.c.bf16 %v626_v10, %v624_v8  ;;  %v938_v13 = vpack.c.bf16 %v669_v11, %v667_v9 }
 0x126   : > { %725 = vst [vmem:[%s345_s11 + $0x10] sm:$0xff] %v937_v12  ;;  %726 = vst [vmem:[%s345_s11 + $0x18] sm:$0xff] %v938_v13 }
 0x12b   : > { %v752_v14 = vld [vmem:[%s345_s11] sm:$0xff]  ;;  %v754_v15 = vld [vmem:[%s345_s11 + $0x8] sm:$0xff] }
 0x12c   : > { %753 = vst [vmem:[%s739_s15] sm:$0xff] %v752_v14  ;;  %755 = vst [vmem:[%s739_s15 + $0x8] sm:$0xff] %v754_v15 }
 0x12d   : > { %v756_v16 = vld [vmem:[%s345_s11 + $0x10] sm:$0xff]  ;;  %v758_v17 = vld [vmem:[%s345_s11 + $0x18] sm:$0xff] }
 0x12e   : > { %757 = vst [vmem:[%s739_s15 + $0x20] sm:$0xff] %v756_v16  ;;  %759 = vst [vmem:[%s739_s15 + $0x28] sm:$0xff] %v758_v17 }
 0x12f PF: > { %s14_s19 = sadd.s32 1, %s1068_s19   ;;  %s1283_s15 = smov %s1056_s16 }
 0x130   : > { %p11_p11 = scmp.ge.s32.totalorder %s14_s19, 4   ;;  %s1284_s16 = smov %s1136_s23 }
 0x131   : > { %s1285_s17 = smov %s1064_s18  ;;  %s1286_s18 = smov %s1288_s2 }
 0x132   :  { %13 = sbr.rel (!%p11_p11) target bundleno = 3 (0x3), region = 134 }

// kernel: generator_forward.12
= control target key start
LH: loop header
LB: loop body
LE: loop exit
PB: predicated region body
PF: predicated region fallthrough
CT: control target
= control target key end

     0   :  { %s1012_s15 = smov 0   ;;  %s1014_s16 = smov 0   ;;  %s1154_s0 = inlined_call_operand.vmem [shape: bf16[32,128], index: 0, kind: input, shape index: {}]   ;;  %s1155_s1 = inlined_call_operand.vmem [shape: bf16[128,512], index: 1, kind: input, shape index: {}]   ;;  %s1156_s2 = inlined_call_operand.vmem [shape: f32[1,128], index: 2, kind: input, shape index: {}]   ;;  %s1157_s3 = inlined_call_operand.vmem [shape: f32[1,128], index: 3, kind: input, shape index: {}]   ;;  %s1158_s4 = inlined_call_operand.vmem [shape: bf16[32,512], index: 4, kind: output, shape index: {}]  }
   0x1   :  { %s1016_s17 = smov 0  }
   0x2 LB: > { %s33_s18 = sadd.s32 1, %s980_s16  ;;  %p834_p0 = scmp.ge.s32.totalorder %s984_s17, 1  ;;  %s984_s17 = sphi %s1016_s17, %s14_s17   ;;  %s980_s16 = sphi %s1014_s16, %s1160_s16   ;;  %s976_s15 = sphi %s1012_s15, %s1159_s15  }
   0x3   : > { %p35_p1 = scmp.ge.s32.totalorder %s33_s18, 2  ;;  %p224_p2 = scmp.lt.s32.totalorder %s984_s17, 3 }
   0x5   : > { %s1162_s18 = smov (%p35_p1, %s33_s18), 0  ;;  %p225_p3 = pnand %p834_p0, %p224_p2 }
   0x6   : > { %v914_v0 = vld [vmem:[%s1155_s1 + $0x4] ss:$16 sps:$4 sm:$0xff] (!%p225_p3)   ;;  %v916_v1 = vld [vmem:[%s1155_s1 + $0xc] ss:$16 sps:$4 sm:$0xff] (!%p225_p3)   ;;  %v986_v2 = vmov (!%p225_p3), 0   ;;  %s835_s29 = sshll.u32 (!%p225_p3), %s976_s15, 1 }
   0x7   : > { %228 = sbr.rel (%p225_p3) target bundleno = 258 (0x102), region = 36  ;;  %583 = vmatprep.mubr.bf16.mxu0 (!%p225_p3), %v986_v2  ;;  %626 = vmatprep.mubr.bf16.mxu1 (!%p225_p3), %v986_v2  ;;  %v918_v3 = vld [vmem:[%s1155_s1] ss:$16 sps:$4 sm:$0xff] (!%p225_p3)   ;;  %v919_v4 = vld [vmem:[%s1155_s1 + $0x8] ss:$16 sps:$4 sm:$0xff] (!%p225_p3)   ;;  %p275_p4 = scmp.lt.s32.totalorder (!%p225_p3), %s835_s29, 3 }
   0x8   : > { %551 = vmatprep.subr.bf16.mxu0 (!%p225_p3), %v914_v0  ;;  %594 = vmatprep.subr.bf16.mxu1 (!%p225_p3), %v916_v1  ;;  %v920_v5 = vld [vmem:[%s1155_s1 + $0x24] ss:$16 sps:$4 sm:$0xff] (!%p225_p3)   ;;  %v922_v6 = vld [vmem:[%s1155_s1 + $0x2c] ss:$16 sps:$4 sm:$0xff] (!%p225_p3)   ;;  %v924_v7 = vld [vmem:[%s1155_s1 + $0x20] ss:$16 sps:$4 sm:$0xff] (!%p225_p3)  }
   0x9   : > { %552 = vmatpush1.bf16.msra.mxu0 (!%p225_p3), %v918_v3  ;;  %595 = vmatpush1.bf16.msra.mxu1 (!%p225_p3), %v919_v4  ;;  %v925_v8 = vld [vmem:[%s1155_s1 + $0x28] ss:$16 sps:$4 sm:$0xff] (!%p225_p3)   ;;  %v926_v9 = vld [vmem:[%s1155_s1 + $0x44] ss:$16 sps:$4 sm:$0xff] (!%p225_p3)   ;;  %v928_v10 = vld [vmem:[%s1155_s1 + $0x4c] ss:$16 sps:$4 sm:$0xff] (!%p225_p3)  }
   0xa   : > { %553 = vmatprep.subr.bf16.mxu0 (!%p225_p3), %v920_v5  ;;  %596 = vmatprep.subr.bf16.mxu1 (!%p225_p3), %v922_v6  ;;  %v930_v11 = vld [vmem:[%s1155_s1 + $0x40] ss:$16 sps:$4 sm:$0xff] (!%p225_p3)   ;;  %v931_v12 = vld [vmem:[%s1155_s1 + $0x48] ss:$16 sps:$4 sm:$0xff] (!%p225_p3)   ;;  %v932_v13 = vld [vmem:[%s1155_s1 + $0x64] ss:$16 sps:$4 sm:$0xff] (!%p225_p3)  }
   0xb   : > { %v934_v14 = vld [vmem:[%s1155_s1 + $0x6c] ss:$16 sps:$4 sm:$0xff] (!%p225_p3)   ;;  %v936_v15 = vld [vmem:[%s1155_s1 + $0x60] ss:$16 sps:$4 sm:$0xff] (!%p225_p3)   ;;  %v937_v16 = vld [vmem:[%s1155_s1 + $0x68] ss:$16 sps:$4 sm:$0xff] (!%p225_p3)  }
   0xc   : > { %v938_v17 = vld [vmem:[%s1155_s1 + $0x84] ss:$16 sps:$4 sm:$0xff] (!%p225_p3)   ;;  %v940_v18 = vld [vmem:[%s1155_s1 + $0x8c] ss:$16 sps:$4 sm:$0xff] (!%p225_p3)   ;;  %v942_v19 = vld [vmem:[%s1155_s1 + $0x80] ss:$16 sps:$4 sm:$0xff] (!%p225_p3)  }
   0xd   : > { %554 = vmatpush1.bf16.msra.mxu0 (!%p225_p3), %v924_v7  ;;  %597 = vmatpush1.bf16.msra.mxu1 (!%p225_p3), %v925_v8  ;;  %v943_v20 = vld [vmem:[%s1155_s1 + $0x88] ss:$16 sps:$4 sm:$0xff] (!%p225_p3)   ;;  %v944_v21 = vld [vmem:[%s1155_s1 + $0xa4] ss:$16 sps:$4 sm:$0xff] (!%p225_p3)   ;;  %v946_v22 = vld [vmem:[%s1155_s1 + $0xac] ss:$16 sps:$4 sm:$0xff] (!%p225_p3)  }
   0xe   : > { %555 = vmatprep.subr.bf16.mxu0 %v926_v9  ;;  %598 = vmatprep.subr.bf16.mxu1 %v928_v10  ;;  %s1164_s29 = smov (!%p275_p4, %s835_s29), 3  ;;  %v948_v23 = vld [vmem:[%s1155_s1 + $0xa0] ss:$16 sps:$4 sm:$0xff]   ;;  %v949_v24 = vld [vmem:[%s1155_s1 + $0xa8] ss:$16 sps:$4 sm:$0xff]  }
   0xf   : > { %s836_s12 = sshll.u32 %s1164_s29, 2  ;;  %v950_v25 = vld [vmem:[%s1155_s1 + $0xc4] ss:$16 sps:$4 sm:$0xff]   ;;  %v952_v26 = vld [vmem:[%s1155_s1 + $0xcc] ss:$16 sps:$4 sm:$0xff]   ;;  %s880_s25 = sshll.u32 %s1164_s29, 4 }
  0x10   : > { %s281_s22 = scalar_lea.vmem %s1154_s0, %s836_s12  ;;  %v840_v28 = vld [vmem:[%s1156_s2] ss:$0 sm:$0xff]  ;;  %v955_v33 = vld [vmem:[%s1155_s1 + $0xc8] ss:$16 sps:$4 sm:$0xff]   ;;  %v956_v36 = vld [vmem:[%s1155_s1 + $0xe4] ss:$16 sps:$4 sm:$0xff]   ;;  %s310_s28 = scalar_lea.vmem %s1158_s4, %s880_s25 }
  0x11   : > { %556 = vmatpush1.bf16.msra.mxu0 %v930_v11  ;;  %599 = vmatpush1.bf16.msra.mxu1 %v931_v12  ;;  %v886_v27 = vld [vmem:[%s281_s22] sm:$0xff]   ;;  %v958_v37 = vld [vmem:[%s1155_s1 + $0xec] ss:$16 sps:$4 sm:$0xff]   ;;  %v961_v41 = vld [vmem:[%s1155_s1 + $0xe8] ss:$16 sps:$4 sm:$0xff]  }
  0x12   : > { %557 = vmatprep.subr.bf16.mxu0 %v932_v13  ;;  %600 = vmatprep.subr.bf16.mxu1 %v934_v14  ;;  %v887_v29 = vunpack.c.l.bf16 %v886_v27  ;;  %v888_v30 = vunpack.c.h.bf16 %v886_v27  ;;  %v841_v31 = vld [vmem:[%s1157_s3] ss:$0 sm:$0xff] }
  0x13   : > { %v954_v32 = vld [vmem:[%s1155_s1 + $0xc0] ss:$16 sps:$4 sm:$0xff]  }
  0x14   : > { %v337_v34 = vmul.f32 %v887_v29, %v840_v28  ;;  %v338_v35 = vmul.f32 %v888_v30, %v840_v28  ;;  %v960_v40 = vld [vmem:[%s1155_s1 + $0xe0] ss:$16 sps:$4 sm:$0xff]  }
  0x15   : > { %558 = vmatpush1.bf16.msra.mxu0 %v936_v15  ;;  %601 = vmatpush1.bf16.msra.mxu1 %v937_v16 }
  0x16   : > { %559 = vmatprep.subr.bf16.mxu0 %v938_v17  ;;  %602 = vmatprep.subr.bf16.mxu1 %v940_v18  ;;  %v346_v38 = vadd.f32 %v841_v31, %v337_v34  ;;  %v347_v39 = vadd.f32 %v841_v31, %v338_v35 }
  0x18   : > { %v348_v42 = vmax.f32 %v346_v38, 0.0  ;;  %v349_v43 = vmax.f32 %v347_v39, 0.0 }
  0x19   : > { %560 = vmatpush1.bf16.msra.mxu0 %v942_v19  ;;  %603 = vmatpush1.bf16.msra.mxu1 %v943_v20 }
  0x1a   : > { %561 = vmatprep.subr.bf16.mxu0 %v944_v21  ;;  %604 = vmatprep.subr.bf16.mxu1 %v946_v22  ;;  %v350_v44 = vpack.c.bf16 %v349_v43, %v348_v42 }
  0x1d   : > { %562 = vmatpush1.bf16.msra.mxu0 %v948_v23  ;;  %605 = vmatpush1.bf16.msra.mxu1 %v949_v24 }
  0x1e   : > { %563 = vmatprep.subr.bf16.mxu0 %v950_v25  ;;  %606 = vmatprep.subr.bf16.mxu1 %v952_v26 }
  0x21   : > { %564 = vmatpush1.bf16.msra.mxu0 %v954_v32  ;;  %607 = vmatpush1.bf16.msra.mxu1 %v955_v33 }
  0x22   : > { %565 = vmatprep.subr.bf16.mxu0 %v956_v36  ;;  %608 = vmatprep.subr.bf16.mxu1 %v958_v37 }
  0x25   : > { %566 = vmatpush1.bf16.msra.mxu0 %v960_v40  ;;  %609 = vmatpush1.bf16.msra.mxu1 %v961_v41 }
  0x28   : > { %584 = vmatmul.mubr.bf16.vlgmr.msra.gmra.mrb[0].mxu0 %v350_v44  ;;  %627 = vmatmul.mubr.bf16.vlgmr.msra.gmra.mrb[0].mxu1 %v350_v44 }
  0xfb   : > { %v585_v45 = vpop.f32.mrb[0].mxu0  ;;  %v628_v46 = vpop.f32.mrb[0].mxu1 }
  0xfc   : > { %v587_v47 = vpop.f32.mrb[1].mxu0  ;;  %v630_v48 = vpop.f32.mrb[1].mxu1 }
  0xfd   : > { %v881_v49 = vpack.c.bf16 %v587_v47, %v585_v45  ;;  %v882_v50 = vpack.c.bf16 %v630_v48, %v628_v46  ;;  %v589_v51 = vpop.f32.mrb[2].mxu0  ;;  %v632_v52 = vpop.f32.mrb[2].mxu1 }
  0xfe   : > { %v591_v53 = vpop.f32.mrb[3].mxu0  ;;  %v634_v54 = vpop.f32.mrb[3].mxu1 }
  0xff   : > { %688 = vst [vmem:[%s310_s28] sm:$0xff] %v881_v49  ;;  %689 = vst [vmem:[%s310_s28 + $0x8] sm:$0xff] %v882_v50  ;;  %v883_v55 = vpack.c.bf16 %v591_v53, %v589_v51  ;;  %v884_v56 = vpack.c.bf16 %v634_v54, %v632_v52 }
 0x101   : > { %690 = vst [vmem:[%s310_s28 + $0x10] sm:$0xff] %v883_v55  ;;  %691 = vst [vmem:[%s310_s28 + $0x18] sm:$0xff] %v884_v56 }
 0x102 PF: > { %s14_s17 = sadd.s32 1, %s984_s17   ;;  %s1159_s15 = smov %s980_s16 }
 0x103   : > { %p11_p5 = scmp.ge.s32.totalorder %s14_s17, 4   ;;  %s1160_s16 = smov %s1162_s18 }
 0x105   :  { %13 = sbr.rel (!%p11_p5) target bundleno = 2 (0x2), region = 83 }

// kernel: generator_forward.13
= control target key start
LH: loop header
LB: loop body
LE: loop exit
PB: predicated region body
PF: predicated region fallthrough
CT: control target
= control target key end

     0   :  { %v158_v0 = vmov 0.0   ;;  %s196_s0 = inlined_call_operand.vmem [shape: bf16[128,128], index: 0, kind: input, shape index: {}]   ;;  %s197_s1 = inlined_call_operand.vmem [shape: f32[8,128], index: 1, kind: output, shape index: {}]  }
   0x1   :  { %12 = vst [vmem:[#allocation2] sm:$0xff] %v158_v0  ;;  %v119_v1 = vld [vmem:[%s196_s0] sm:$0xff]   ;;  %v150_v2 = vld [vmem:[%s196_s0 + $0x8] sm:$0xff]   ;;  %v151_v6 = vld [vmem:[%s196_s0 + $0x10] sm:$0xff]  }
   0x2   :  { %v120_v3 = vunpack.c.l.bf16 %v119_v1  ;;  %v121_v4 = vunpack.c.h.bf16 %v119_v1  ;;  %v124_v5 = vunpack.c.l.bf16 %v150_v2  ;;  %v125_v7 = vunpack.c.h.bf16 %v150_v2  ;;  %v152_v14 = vld [vmem:[%s196_s0 + $0x18] sm:$0xff]   ;;  %v153_v23 = vld [vmem:[%s196_s0 + $0x20] sm:$0xff]   ;;  %v154_v32 = vld [vmem:[%s196_s0 + $0x28] sm:$0xff]  }
   0x3   :  { %v128_v11 = vunpack.c.l.bf16 %v151_v6  ;;  %v129_v15 = vunpack.c.h.bf16 %v151_v6  ;;  %v132_v19 = vunpack.c.l.bf16 %v152_v14  ;;  %v133_v24 = vunpack.c.h.bf16 %v152_v14  ;;  %v155_v41 = vld [vmem:[%s196_s0 + $0x30] sm:$0xff]   ;;  %v156_v50 = vld [vmem:[%s196_s0 + $0x38] sm:$0xff]  }
   0x4   :  { %v46_v8 = vadd.f32 %v121_v4, %v120_v3  ;;  %v70_v9 = vmul.f32 %v120_v3, %v120_v3  ;;  %v71_v10 = vmul.f32 %v121_v4, %v121_v4  ;;  %v72_v13 = vmul.f32 %v124_v5, %v124_v5 }
   0x5   :  { %v73_v17 = vmul.f32 %v125_v7, %v125_v7  ;;  %v74_v21 = vmul.f32 %v128_v11, %v128_v11  ;;  %v75_v26 = vmul.f32 %v129_v15, %v129_v15  ;;  %v136_v28 = vunpack.c.l.bf16 %v153_v23 }
   0x6   :  { %v47_v12 = vadd.f32 %v124_v5, %v46_v8  ;;  %v86_v18 = vadd.f32 %v71_v10, %v70_v9  ;;  %v76_v30 = vmul.f32 %v132_v19, %v132_v19  ;;  %v137_v33 = vunpack.c.h.bf16 %v153_v23 }
   0x7   :  { %v77_v35 = vmul.f32 %v133_v24, %v133_v24  ;;  %v140_v37 = vunpack.c.l.bf16 %v154_v32  ;;  %v78_v39 = vmul.f32 %v136_v28, %v136_v28  ;;  %v141_v42 = vunpack.c.h.bf16 %v154_v32 }
   0x8   :  { %v48_v16 = vadd.f32 %v125_v7, %v47_v12  ;;  %v87_v22 = vadd.f32 %v86_v18, %v72_v13  ;;  %v79_v44 = vmul.f32 %v137_v33, %v137_v33  ;;  %v144_v46 = vunpack.c.l.bf16 %v155_v41 }
   0x9   :  { %v80_v48 = vmul.f32 %v140_v37, %v140_v37  ;;  %v145_v51 = vunpack.c.h.bf16 %v155_v41  ;;  %v81_v53 = vmul.f32 %v141_v42, %v141_v42  ;;  %v148_v55 = vunpack.c.l.bf16 %v156_v50 }
   0xa   :  { %v49_v20 = vadd.f32 %v128_v11, %v48_v16  ;;  %v88_v27 = vadd.f32 %v87_v22, %v73_v17  ;;  %v82_v57 = vmul.f32 %v144_v46, %v144_v46  ;;  %v149_v59 = vunpack.c.h.bf16 %v156_v50 }
   0xb   :  { %v83_v61 = vmul.f32 %v145_v51, %v145_v51  ;;  %v84_v0 = vmul.f32 %v148_v55, %v148_v55 }
   0xc   :  { %v50_v25 = vadd.f32 %v129_v15, %v49_v20  ;;  %v89_v31 = vadd.f32 %v88_v27, %v74_v21  ;;  %v85_v3 = vmul.f32 %v149_v59, %v149_v59  ;;  %v45_v15 = vld [vmem:[#allocation2] sm:$0x1]  ;;  %v69_v20 = vld [vmem:[#allocation2 + $0x1] sm:$0x1] }
   0xe   :  { %v51_v29 = vadd.f32 %v132_v19, %v50_v25  ;;  %v90_v36 = vadd.f32 %v89_v31, %v75_v26 }
  0x10   :  { %v52_v34 = vadd.f32 %v133_v24, %v51_v29  ;;  %v91_v40 = vadd.f32 %v90_v36, %v76_v30 }
  0x12   :  { %v53_v38 = vadd.f32 %v136_v28, %v52_v34  ;;  %v92_v45 = vadd.f32 %v91_v40, %v77_v35 }
  0x14   :  { %v54_v43 = vadd.f32 %v137_v33, %v53_v38  ;;  %v93_v49 = vadd.f32 %v92_v45, %v78_v39 }
  0x16   :  { %v55_v47 = vadd.f32 %v140_v37, %v54_v43  ;;  %v94_v54 = vadd.f32 %v93_v49, %v79_v44 }
  0x18   :  { %v56_v52 = vadd.f32 %v141_v42, %v55_v47  ;;  %v95_v58 = vadd.f32 %v94_v54, %v80_v48 }
  0x1a   :  { %v57_v56 = vadd.f32 %v144_v46, %v56_v52  ;;  %v96_v62 = vadd.f32 %v95_v58, %v81_v53 }
  0x1c   :  { %v58_v60 = vadd.f32 %v145_v51, %v57_v56  ;;  %v97_v1 = vadd.f32 %v96_v62, %v82_v57 }
  0x1e   :  { %v59_v63 = vadd.f32 %v148_v55, %v58_v60  ;;  %v98_v4 = vadd.f32 %v97_v1, %v83_v61 }
  0x20   :  { %v60_v2 = vadd.f32 %v149_v59, %v59_v63  ;;  %v99_v6 = vadd.f32 %v98_v4, %v84_v0 }
  0x22   :  { %v61_v5 = vrot.slane %v60_v2, 4  ;;  %v100_v8 = vadd.f32 %v99_v6, %v85_v3 }
  0x24   :  { %v62_v7 = vadd.f32 %v61_v5, %v60_v2  ;;  %v101_v10 = vrot.slane %v100_v8, 4 }
  0x26   :  { %v63_v9 = vrot.slane %v62_v7, 2  ;;  %v102_v12 = vadd.f32 %v101_v10, %v100_v8 }
  0x28   :  { %v64_v11 = vadd.f32 %v63_v9, %v62_v7  ;;  %v103_v14 = vrot.slane %v102_v12, 2 }
  0x2a   :  { %v65_v13 = vrot.slane %v64_v11, 1  ;;  %v104_v17 = vadd.f32 %v103_v14, %v102_v12 }
  0x2c   :  { %v66_v16 = vadd.f32 %v65_v13, %v64_v11  ;;  %v105_v19 = vrot.slane %v104_v17, 1 }
  0x2e   :  { %v67_v18 = vadd.f32 %v66_v16, %v45_v15  ;;  %v106_v21 = vadd.f32 %v105_v19, %v104_v17 }
  0x30   :  { %68 = vst [vmem:[#allocation2] sm:$0x1] %v67_v18  ;;  %v107_v22 = vadd.f32 %v106_v21, %v69_v20 }
  0x32   :  { %108 = vst [vmem:[#allocation2 + $0x1] sm:$0x1] %v107_v22 }
  0x39   :  { %v112_v23 = vld [vmem:[#allocation2] sm:$0xff] }
  0x3a   :  { %113 = vst [vmem:[%s197_s1] sm:$0xff] %v112_v23 }

// kernel: generator_forward.14
= control target key start
LH: loop header
LB: loop body
LE: loop exit
PB: predicated region body
PF: predicated region fallthrough
CT: control target
= control target key end

     0   :  { %s1003_s15 = smov 0   ;;  %s1005_s16 = smov 0   ;;  %s1104_s0 = inlined_call_operand.vmem [shape: bf16[128,128], index: 0, kind: input, shape index: {}]   ;;  %s1105_s1 = inlined_call_operand.vmem [shape: bf16[128,256], index: 1, kind: input, shape index: {}]   ;;  %s1106_s2 = inlined_call_operand.vmem [shape: f32[1,128], index: 2, kind: input, shape index: {}]   ;;  %s1107_s3 = inlined_call_operand.vmem [shape: f32[1,128], index: 3, kind: input, shape index: {}]   ;;  %s1108_s4 = inlined_call_operand.vmem [shape: bf16[128,256], index: 4, kind: output, shape index: {}]  }
   0x1   :  { %s1007_s17 = smov 0  }
   0x2 LB: > { %s33_s18 = sadd.s32 1, %s971_s16  ;;  %p826_p0 = scmp.ge.s32.totalorder %s975_s17, 1  ;;  %s975_s17 = sphi %s1007_s17, %s14_s17   ;;  %s971_s16 = sphi %s1005_s16, %s1110_s16   ;;  %s967_s15 = sphi %s1003_s15, %s1109_s15  }
   0x3   : > { %p35_p1 = scmp.ge.s32.totalorder %s33_s18, 2  ;;  %p224_p2 = scmp.lt.s32.totalorder %s975_s17, 3 }
   0x5   : > { %s1112_s18 = smov (%p35_p1, %s33_s18), 0  ;;  %p225_p3 = pnand %p826_p0, %p224_p2 }
   0x6   : > { %v929_v0 = vld [vmem:[%s1105_s1 + $0x4] ss:$8 sps:$4 sm:$0xff] (!%p225_p3)   ;;  %s827_s21 = sshll.u32 (!%p225_p3), %s967_s15, 3  ;;  %v931_v1 = vld [vmem:[%s1105_s1] ss:$8 sps:$4 sm:$0xff] (!%p225_p3)   ;;  %v977_v2 = vmov (!%p225_p3), 0  }
   0x7   : > { %228 = sbr.rel (%p225_p3) target bundleno = 266 (0x10a), region = 36  ;;  %536 = vmatprep.mubr.bf16.mxu0 (!%p225_p3), %v977_v2  ;;  %556 = vmatprep.mubr.bf16.mxu1 (!%p225_p3), %v977_v2  ;;  %p275_p4 = scmp.lt.s32.totalorder (!%p225_p3), %s827_s21, 15  ;;  %v932_v3 = vld [vmem:[%s1105_s1 + $0x14] ss:$8 sps:$4 sm:$0xff] (!%p225_p3)   ;;  %v934_v4 = vld [vmem:[%s1105_s1 + $0x10] ss:$8 sps:$4 sm:$0xff] (!%p225_p3)  }
   0x8   : > { %504 = vmatprep.subr.bf16.mxu0 (!%p225_p3), %v929_v0  ;;  %888 = vmatprep.subr.bf16.mxu1 (!%p225_p3), %v929_v0  ;;  %v935_v5 = vld [vmem:[%s1105_s1 + $0x24] ss:$8 sps:$4 sm:$0xff] (!%p225_p3)   ;;  %v937_v6 = vld [vmem:[%s1105_s1 + $0x20] ss:$8 sps:$4 sm:$0xff] (!%p225_p3)   ;;  %v938_v7 = vld [vmem:[%s1105_s1 + $0x34] ss:$8 sps:$4 sm:$0xff] (!%p225_p3)  }
   0x9   : > { %505 = vmatpush1.bf16.msra.mxu0 (!%p225_p3), %v931_v1  ;;  %896 = vmatpush1.bf16.msra.mxu1 (!%p225_p3), %v931_v1  ;;  %v940_v9 = vld [vmem:[%s1105_s1 + $0x30] ss:$8 sps:$4 sm:$0xff] (!%p225_p3)   ;;  %v941_v11 = vld [vmem:[%s1105_s1 + $0x44] ss:$8 sps:$4 sm:$0xff] (!%p225_p3)   ;;  %v832_v14 = vld [vmem:[%s1106_s2] ss:$0 sm:$0xff] (!%p225_p3) }
   0xa   : > { %506 = vmatprep.subr.bf16.mxu0 (!%p225_p3), %v932_v3  ;;  %889 = vmatprep.subr.bf16.mxu1 (!%p225_p3), %v932_v3  ;;  %v943_v17 = vld [vmem:[%s1105_s1 + $0x40] ss:$8 sps:$4 sm:$0xff] (!%p225_p3)   ;;  %v944_v18 = vld [vmem:[%s1105_s1 + $0x54] ss:$8 sps:$4 sm:$0xff] (!%p225_p3)   ;;  %v946_v25 = vld [vmem:[%s1105_s1 + $0x50] ss:$8 sps:$4 sm:$0xff] (!%p225_p3)  }
   0xb   : > { %v833_v21 = vld [vmem:[%s1107_s3] ss:$0 sm:$0xff] (!%p225_p3)  ;;  %v947_v27 = vld [vmem:[%s1105_s1 + $0x64] ss:$8 sps:$4 sm:$0xff] (!%p225_p3)   ;;  %v950_v37 = vld [vmem:[%s1105_s1 + $0x74] ss:$8 sps:$4 sm:$0xff] (!%p225_p3)  }
   0xc   : > { %v949_v36 = vld [vmem:[%s1105_s1 + $0x60] ss:$8 sps:$4 sm:$0xff] (!%p225_p3)   ;;  %v952_v46 = vld [vmem:[%s1105_s1 + $0x70] ss:$8 sps:$4 sm:$0xff] (!%p225_p3)  }
   0xd   : > { %507 = vmatpush1.bf16.msra.mxu0 (!%p225_p3), %v934_v4  ;;  %897 = vmatpush1.bf16.msra.mxu1 (!%p225_p3), %v934_v4 }
   0xe   : > { %s1114_s21 = smov (!%p275_p4, %s827_s21), 15  ;;  %508 = vmatprep.subr.bf16.mxu0 %v935_v5  ;;  %890 = vmatprep.subr.bf16.mxu1 %v935_v5 }
   0xf   : > { %s828_s30 = sshll.u32 %s1114_s21, 2  ;;  %s860_s12 = sshll.u32 %s1114_s21, 3 }
  0x10   : > { %s1047_s9 = scalar_lea.vmem %s1104_s0, %s828_s30  ;;  %s310_s15 = scalar_lea.vmem %s1108_s4, %s860_s12 }
  0x11   : > { %v870_v8 = vld [vmem:[%s1047_s9] sm:$0xff]   ;;  %509 = vmatpush1.bf16.msra.mxu0 %v937_v6  ;;  %898 = vmatpush1.bf16.msra.mxu1 %v937_v6  ;;  %v886_v10 = vld [vmem:[%s1047_s9 + $0x10] sm:$0xff]   ;;  %v885_v24 = vld [vmem:[%s1047_s9 + $0x8] sm:$0xff]  }
  0x12   : > { %510 = vmatprep.subr.bf16.mxu0 %v938_v7  ;;  %891 = vmatprep.subr.bf16.mxu1 %v938_v7  ;;  %v871_v12 = vunpack.c.l.bf16 %v870_v8  ;;  %v872_v13 = vunpack.c.h.bf16 %v870_v8  ;;  %v879_v15 = vunpack.c.l.bf16 %v886_v10  ;;  %v880_v16 = vunpack.c.h.bf16 %v886_v10  ;;  %v887_v26 = vld [vmem:[%s1047_s9 + $0x18] sm:$0xff]  }
  0x13   : > { %v875_v30 = vunpack.c.l.bf16 %v885_v24  ;;  %v876_v31 = vunpack.c.h.bf16 %v885_v24  ;;  %v883_v34 = vunpack.c.l.bf16 %v887_v26  ;;  %v884_v35 = vunpack.c.h.bf16 %v887_v26 }
  0x14   : > { %v357_v19 = vmul.f32 %v871_v12, %v832_v14  ;;  %v358_v20 = vmul.f32 %v872_v13, %v832_v14  ;;  %v361_v22 = vmul.f32 %v879_v15, %v832_v14  ;;  %v362_v23 = vmul.f32 %v880_v16, %v832_v14 }
  0x15   : > { %511 = vmatpush1.bf16.msra.mxu0 %v940_v9  ;;  %899 = vmatpush1.bf16.msra.mxu1 %v940_v9  ;;  %v359_v40 = vmul.f32 %v875_v30, %v832_v14  ;;  %v360_v41 = vmul.f32 %v876_v31, %v832_v14  ;;  %v363_v44 = vmul.f32 %v883_v34, %v832_v14 }
  0x16   : > { %512 = vmatprep.subr.bf16.mxu0 %v941_v11  ;;  %892 = vmatprep.subr.bf16.mxu1 %v941_v11  ;;  %v372_v28 = vadd.f32 %v833_v21, %v357_v19  ;;  %v373_v29 = vadd.f32 %v833_v21, %v358_v20  ;;  %v376_v32 = vadd.f32 %v833_v21, %v361_v22 }
  0x17   : > { %v377_v33 = vadd.f32 %v833_v21, %v362_v23  ;;  %v364_v45 = vmul.f32 %v884_v35, %v832_v14  ;;  %v374_v47 = vadd.f32 %v833_v21, %v359_v40  ;;  %v375_v48 = vadd.f32 %v833_v21, %v360_v41 }
  0x18   : > { %v380_v38 = vmax.f32 %v372_v28, 0.0  ;;  %v381_v39 = vmax.f32 %v373_v29, 0.0  ;;  %v384_v42 = vmax.f32 %v376_v32, 0.0  ;;  %v378_v51 = vadd.f32 %v833_v21, %v363_v44 }
  0x19   : > { %513 = vmatpush1.bf16.msra.mxu0 %v943_v17  ;;  %900 = vmatpush1.bf16.msra.mxu1 %v943_v17  ;;  %v385_v43 = vmax.f32 %v377_v33, 0.0  ;;  %v379_v52 = vadd.f32 %v833_v21, %v364_v45  ;;  %v382_v53 = vmax.f32 %v374_v47, 0.0  ;;  %v383_v54 = vmax.f32 %v375_v48, 0.0 }
  0x1a   : > { %514 = vmatprep.subr.bf16.mxu0 %v944_v18  ;;  %893 = vmatprep.subr.bf16.mxu1 %v944_v18  ;;  %v388_v49 = vpack.c.bf16 %v381_v39, %v380_v38  ;;  %v386_v55 = vmax.f32 %v378_v51, 0.0 }
  0x1b   : > { %v390_v50 = vpack.c.bf16 %v385_v43, %v384_v42  ;;  %v387_v56 = vmax.f32 %v379_v52, 0.0  ;;  %v389_v57 = vpack.c.bf16 %v383_v54, %v382_v53 }
  0x1d   : > { %515 = vmatpush1.bf16.msra.mxu0 %v946_v25  ;;  %901 = vmatpush1.bf16.msra.mxu1 %v946_v25  ;;  %v391_v58 = vpack.c.bf16 %v387_v56, %v386_v55 }
  0x1e   : > { %516 = vmatprep.subr.bf16.mxu0 %v947_v27  ;;  %894 = vmatprep.subr.bf16.mxu1 %v947_v27 }
  0x21   : > { %517 = vmatpush1.bf16.msra.mxu0 %v949_v36  ;;  %902 = vmatpush1.bf16.msra.mxu1 %v949_v36 }
  0x22   : > { %518 = vmatprep.subr.bf16.mxu0 %v950_v37  ;;  %895 = vmatprep.subr.bf16.mxu1 %v950_v37 }
  0x25   : > { %519 = vmatpush1.bf16.msra.mxu0 %v952_v46  ;;  %903 = vmatpush1.bf16.msra.mxu1 %v952_v46 }
  0x28   : > { %537 = vmatmul.mubr.bf16.vlgmr.msra.gmra.mrb[0].mxu0 %v388_v49  ;;  %557 = vmatmul.mubr.bf16.vlgmr.msra.gmra.mrb[0].mxu1 %v390_v50 }
  0x29   : > { %546 = vmatprep.mubr.bf16.mxu0 %v977_v2  ;;  %566 = vmatprep.mubr.bf16.mxu1 %v977_v2 }
  0x30   : > { %547 = vmatmul.mubr.bf16.gmra.mrb[4].mxu0 %v389_v57  ;;  %567 = vmatmul.mubr.bf16.gmra.mrb[4].mxu1 %v391_v58 }
  0xfb   : > { %v538_v59 = vpop.f32.mrb[0].mxu0  ;;  %v558_v60 = vpop.f32.mrb[0].mxu1 }
  0xfc   : > { %v540_v61 = vpop.f32.mrb[1].mxu0  ;;  %v560_v62 = vpop.f32.mrb[1].mxu1 }
  0xfd   : > { %v861_v63 = vpack.c.bf16 %v540_v61, %v538_v59  ;;  %v865_v0 = vpack.c.bf16 %v560_v62, %v558_v60  ;;  %v542_v1 = vpop.f32.mrb[2].mxu0  ;;  %v562_v3 = vpop.f32.mrb[2].mxu1 }
  0xfe   : > { %v544_v4 = vpop.f32.mrb[3].mxu0  ;;  %v564_v5 = vpop.f32.mrb[3].mxu1 }
  0xff   : > { %676 = vst [vmem:[%s310_s15] sm:$0xff] %v861_v63  ;;  %680 = vst [vmem:[%s310_s15 + $0x20] sm:$0xff] %v865_v0  ;;  %v862_v2 = vpack.c.bf16 %v544_v4, %v542_v1  ;;  %v866_v6 = vpack.c.bf16 %v564_v5, %v562_v3 }
 0x101   : > { %677 = vst [vmem:[%s310_s15 + $0x8] sm:$0xff] %v862_v2  ;;  %681 = vst [vmem:[%s310_s15 + $0x28] sm:$0xff] %v866_v6 }
 0x103   : > { %v548_v7 = vpop.f32.mrb[4].mxu0  ;;  %v568_v8 = vpop.f32.mrb[4].mxu1 }
 0x104   : > { %v550_v9 = vpop.f32.mrb[5].mxu0  ;;  %v570_v10 = vpop.f32.mrb[5].mxu1 }
 0x105   : > { %v863_v11 = vpack.c.bf16 %v550_v9, %v548_v7  ;;  %v867_v12 = vpack.c.bf16 %v570_v10, %v568_v8  ;;  %v552_v13 = vpop.f32.mrb[6].mxu0  ;;  %v572_v14 = vpop.f32.mrb[6].mxu1 }
 0x106   : > { %v554_v15 = vpop.f32.mrb[7].mxu0  ;;  %v574_v16 = vpop.f32.mrb[7].mxu1 }
 0x107   : > { %678 = vst [vmem:[%s310_s15 + $0x10] sm:$0xff] %v863_v11  ;;  %682 = vst [vmem:[%s310_s15 + $0x30] sm:$0xff] %v867_v12  ;;  %v864_v17 = vpack.c.bf16 %v554_v15, %v552_v13  ;;  %v868_v18 = vpack.c.bf16 %v574_v16, %v572_v14 }
 0x109   : > { %679 = vst [vmem:[%s310_s15 + $0x18] sm:$0xff] %v864_v17  ;;  %683 = vst [vmem:[%s310_s15 + $0x38] sm:$0xff] %v868_v18 }
 0x10a PF: > { %s14_s17 = sadd.s32 1, %s975_s17   ;;  %s1109_s15 = smov %s971_s16 }
 0x10b   : > { %p11_p5 = scmp.ge.s32.totalorder %s14_s17, 4   ;;  %s1110_s16 = smov %s1112_s18 }
 0x10d   :  { %13 = sbr.rel (!%p11_p5) target bundleno = 2 (0x2), region = 83 }

// kernel: generator_forward.15
= control target key start
LH: loop header
LB: loop body
LE: loop exit
PB: predicated region body
PF: predicated region fallthrough
CT: control target
= control target key end

     0   :  { %v518_v0 = vmov 0.0   ;;  %s628_s0 = inlined_call_operand.vmem [shape: bf16[512,128], index: 0, kind: input, shape index: {}]   ;;  %s629_s1 = inlined_call_operand.vmem [shape: f32[8,128], index: 1, kind: output, shape index: {}]  }
   0x1   :  { %12 = vst [vmem:[#allocation2] sm:$0xff] %v518_v0  ;;  %v359_v1 = vld [vmem:[%s628_s0] sm:$0xff]   ;;  %v486_v2 = vld [vmem:[%s628_s0 + $0x8] sm:$0xff]   ;;  %v487_v7 = vld [vmem:[%s628_s0 + $0x10] sm:$0xff]  }
   0x2   :  { %v360_v3 = vunpack.c.l.bf16 %v359_v1  ;;  %v361_v4 = vunpack.c.h.bf16 %v359_v1  ;;  %v364_v5 = vunpack.c.l.bf16 %v486_v2  ;;  %v365_v8 = vunpack.c.h.bf16 %v486_v2  ;;  %v488_v12 = vld [vmem:[%s628_s0 + $0x18] sm:$0xff]   ;;  %v489_v17 = vld [vmem:[%s628_s0 + $0x20] sm:$0xff]   ;;  %v490_v22 = vld [vmem:[%s628_s0 + $0x28] sm:$0xff]  }
   0x3   :  { %v368_v10 = vunpack.c.l.bf16 %v487_v7  ;;  %v369_v13 = vunpack.c.h.bf16 %v487_v7  ;;  %v372_v15 = vunpack.c.l.bf16 %v488_v12  ;;  %v373_v18 = vunpack.c.h.bf16 %v488_v12  ;;  %v491_v30 = vld [vmem:[%s628_s0 + $0x30] sm:$0xff]   ;;  %v492_v39 = vld [vmem:[%s628_s0 + $0x38] sm:$0xff]   ;;  %v493_v48 = vld [vmem:[%s628_s0 + $0x40] sm:$0xff]  }
   0x4   :  { %v142_v6 = vadd.f32 %v361_v4, %v360_v3  ;;  %v376_v20 = vunpack.c.l.bf16 %v489_v17  ;;  %v377_v23 = vunpack.c.h.bf16 %v489_v17  ;;  %v214_v25 = vmul.f32 %v360_v3, %v360_v3  ;;  %v494_v57 = vld [vmem:[%s628_s0 + $0x48] sm:$0xff]   ;;  %v495_v2 = vld [vmem:[%s628_s0 + $0x50] sm:$0xff]  }
   0x5   :  { %v215_v26 = vmul.f32 %v361_v4, %v361_v4  ;;  %v380_v27 = vunpack.c.l.bf16 %v490_v22  ;;  %v216_v29 = vmul.f32 %v364_v5, %v364_v5  ;;  %v381_v31 = vunpack.c.h.bf16 %v490_v22 }
   0x6   :  { %v143_v9 = vadd.f32 %v364_v5, %v142_v6  ;;  %v217_v33 = vmul.f32 %v365_v8, %v365_v8  ;;  %v384_v35 = vunpack.c.l.bf16 %v491_v30  ;;  %v218_v37 = vmul.f32 %v368_v10, %v368_v10 }
   0x7   :  { %v278_v34 = vadd.f32 %v215_v26, %v214_v25  ;;  %v385_v40 = vunpack.c.h.bf16 %v491_v30  ;;  %v219_v42 = vmul.f32 %v369_v13, %v369_v13  ;;  %v388_v44 = vunpack.c.l.bf16 %v492_v39 }
   0x8   :  { %v144_v11 = vadd.f32 %v365_v8, %v143_v9  ;;  %v220_v46 = vmul.f32 %v372_v15, %v372_v15  ;;  %v389_v49 = vunpack.c.h.bf16 %v492_v39  ;;  %v221_v51 = vmul.f32 %v373_v18, %v373_v18 }
   0x9   :  { %v279_v38 = vadd.f32 %v278_v34, %v216_v29  ;;  %v392_v53 = vunpack.c.l.bf16 %v493_v48  ;;  %v222_v55 = vmul.f32 %v376_v20, %v376_v20  ;;  %v393_v58 = vunpack.c.h.bf16 %v493_v48  ;;  %v498_v29 = vld [vmem:[%s628_s0 + $0x68] sm:$0xff]  }
   0xa   :  { %v145_v14 = vadd.f32 %v368_v10, %v144_v11  ;;  %v223_v60 = vmul.f32 %v377_v23, %v377_v23  ;;  %v396_v62 = vunpack.c.l.bf16 %v494_v57  ;;  %v224_v0 = vmul.f32 %v380_v27, %v380_v27  ;;  %v496_v11 = vld [vmem:[%s628_s0 + $0x58] sm:$0xff]  }
   0xb   :  { %v280_v43 = vadd.f32 %v279_v38, %v217_v33  ;;  %v397_v3 = vunpack.c.h.bf16 %v494_v57  ;;  %v225_v5 = vmul.f32 %v381_v31, %v381_v31  ;;  %v400_v7 = vunpack.c.l.bf16 %v495_v2  ;;  %v499_v38 = vld [vmem:[%s628_s0 + $0x70] sm:$0xff]  }
   0xc   :  { %v146_v16 = vadd.f32 %v369_v13, %v145_v14  ;;  %v226_v9 = vmul.f32 %v384_v35, %v384_v35  ;;  %v401_v12 = vunpack.c.h.bf16 %v495_v2  ;;  %v227_v14 = vmul.f32 %v385_v40, %v385_v40 }
   0xd   :  { %v281_v47 = vadd.f32 %v280_v43, %v218_v37  ;;  %v412_v34 = vunpack.c.l.bf16 %v498_v29  ;;  %v413_v39 = vunpack.c.h.bf16 %v498_v29  ;;  %v416_v43 = vunpack.c.l.bf16 %v499_v38 }
   0xe   :  { %v147_v19 = vadd.f32 %v372_v15, %v146_v16  ;;  %v404_v16 = vunpack.c.l.bf16 %v496_v11  ;;  %v417_v48 = vunpack.c.h.bf16 %v499_v38 }
   0xf   :  { %v282_v52 = vadd.f32 %v281_v47, %v219_v42  ;;  %v500_v47 = vld [vmem:[%s628_s0 + $0x78] sm:$0xff]  }
  0x10   :  { %v148_v21 = vadd.f32 %v373_v18, %v147_v19  ;;  %v228_v18 = vmul.f32 %v388_v44, %v388_v44  ;;  %v421_v57 = vunpack.c.h.bf16 %v500_v47 }
  0x11   :  { %v283_v56 = vadd.f32 %v282_v52, %v220_v46  ;;  %v420_v52 = vunpack.c.l.bf16 %v500_v47 }
  0x12   :  { %v149_v24 = vadd.f32 %v376_v20, %v148_v21  ;;  %v497_v20 = vld [vmem:[%s628_s0 + $0x60] sm:$0xff]   ;;  %v405_v21 = vunpack.c.h.bf16 %v496_v11 }
  0x13   :  { %v284_v61 = vadd.f32 %v283_v56, %v221_v51  ;;  %v408_v25 = vunpack.c.l.bf16 %v497_v20  ;;  %v409_v30 = vunpack.c.h.bf16 %v497_v20  ;;  %v501_v56 = vld [vmem:[%s628_s0 + $0x80] sm:$0xff]  }
  0x14   :  { %v150_v28 = vadd.f32 %v377_v23, %v149_v24  ;;  %v229_v23 = vmul.f32 %v389_v49, %v389_v49  ;;  %v425_v2 = vunpack.c.h.bf16 %v501_v56 }
  0x15   :  { %v285_v1 = vadd.f32 %v284_v61, %v222_v55  ;;  %v424_v61 = vunpack.c.l.bf16 %v501_v56 }
  0x16   :  { %v151_v32 = vadd.f32 %v380_v27, %v150_v28  ;;  %v230_v27 = vmul.f32 %v392_v53, %v392_v53 }
  0x17   :  { %v286_v6 = vadd.f32 %v285_v1, %v223_v60  ;;  %v502_v1 = vld [vmem:[%s628_s0 + $0x88] sm:$0xff]  }
  0x18   :  { %v152_v36 = vadd.f32 %v381_v31, %v151_v32  ;;  %v231_v32 = vmul.f32 %v393_v58, %v393_v58  ;;  %v429_v11 = vunpack.c.h.bf16 %v502_v1 }
  0x19   :  { %v287_v10 = vadd.f32 %v286_v6, %v224_v0  ;;  %v428_v6 = vunpack.c.l.bf16 %v502_v1 }
  0x1a   :  { %v153_v41 = vadd.f32 %v384_v35, %v152_v36  ;;  %v232_v36 = vmul.f32 %v396_v62, %v396_v62 }
  0x1b   :  { %v288_v15 = vadd.f32 %v287_v10, %v225_v5  ;;  %v503_v10 = vld [vmem:[%s628_s0 + $0x90] sm:$0xff]  }
  0x1c   :  { %v154_v45 = vadd.f32 %v385_v40, %v153_v41  ;;  %v233_v41 = vmul.f32 %v397_v3, %v397_v3  ;;  %v433_v20 = vunpack.c.h.bf16 %v503_v10 }
  0x1d   :  { %v289_v19 = vadd.f32 %v288_v15, %v226_v9  ;;  %v432_v15 = vunpack.c.l.bf16 %v503_v10 }
  0x1e   :  { %v155_v50 = vadd.f32 %v388_v44, %v154_v45  ;;  %v234_v45 = vmul.f32 %v400_v7, %v400_v7 }
  0x1f   :  { %v290_v24 = vadd.f32 %v289_v19, %v227_v14  ;;  %v504_v19 = vld [vmem:[%s628_s0 + $0x98] sm:$0xff]  }
  0x20   :  { %v156_v54 = vadd.f32 %v389_v49, %v155_v50  ;;  %v235_v50 = vmul.f32 %v401_v12, %v401_v12  ;;  %v437_v29 = vunpack.c.h.bf16 %v504_v19 }
  0x21   :  { %v291_v28 = vadd.f32 %v290_v24, %v228_v18  ;;  %v436_v24 = vunpack.c.l.bf16 %v504_v19 }
  0x22   :  { %v157_v59 = vadd.f32 %v392_v53, %v156_v54  ;;  %v236_v54 = vmul.f32 %v404_v16, %v404_v16 }
  0x23   :  { %v292_v33 = vadd.f32 %v291_v28, %v229_v23  ;;  %v505_v28 = vld [vmem:[%s628_s0 + $0xa0] sm:$0xff]  }
  0x24   :  { %v158_v63 = vadd.f32 %v393_v58, %v157_v59  ;;  %v237_v59 = vmul.f32 %v405_v21, %v405_v21  ;;  %v441_v38 = vunpack.c.h.bf16 %v505_v28 }
  0x25   :  { %v293_v37 = vadd.f32 %v292_v33, %v230_v27  ;;  %v440_v33 = vunpack.c.l.bf16 %v505_v28 }
  0x26   :  { %v159_v4 = vadd.f32 %v396_v62, %v158_v63  ;;  %v238_v63 = vmul.f32 %v408_v25, %v408_v25 }
  0x27   :  { %v294_v42 = vadd.f32 %v293_v37, %v231_v32  ;;  %v506_v37 = vld [vmem:[%s628_s0 + $0xa8] sm:$0xff]  }
  0x28   :  { %v160_v8 = vadd.f32 %v397_v3, %v159_v4  ;;  %v239_v4 = vmul.f32 %v409_v30, %v409_v30  ;;  %v445_v47 = vunpack.c.h.bf16 %v506_v37 }
  0x29   :  { %v295_v46 = vadd.f32 %v294_v42, %v232_v36  ;;  %v444_v42 = vunpack.c.l.bf16 %v506_v37 }
  0x2a   :  { %v161_v13 = vadd.f32 %v400_v7, %v160_v8  ;;  %v240_v8 = vmul.f32 %v412_v34, %v412_v34 }
  0x2b   :  { %v296_v51 = vadd.f32 %v295_v46, %v233_v41  ;;  %v507_v46 = vld [vmem:[%s628_s0 + $0xb0] sm:$0xff]  }
  0x2c   :  { %v162_v17 = vadd.f32 %v401_v12, %v161_v13  ;;  %v241_v13 = vmul.f32 %v413_v39, %v413_v39  ;;  %v449_v56 = vunpack.c.h.bf16 %v507_v46 }
  0x2d   :  { %v297_v55 = vadd.f32 %v296_v51, %v234_v45  ;;  %v448_v51 = vunpack.c.l.bf16 %v507_v46 }
  0x2e   :  { %v163_v22 = vadd.f32 %v404_v16, %v162_v17  ;;  %v242_v17 = vmul.f32 %v416_v43, %v416_v43 }
  0x2f   :  { %v298_v60 = vadd.f32 %v297_v55, %v235_v50  ;;  %v508_v55 = vld [vmem:[%s628_s0 + $0xb8] sm:$0xff]  }
  0x30   :  { %v164_v26 = vadd.f32 %v405_v21, %v163_v22  ;;  %v243_v22 = vmul.f32 %v417_v48, %v417_v48  ;;  %v453_v1 = vunpack.c.h.bf16 %v508_v55 }
  0x31   :  { %v299_v0 = vadd.f32 %v298_v60, %v236_v54  ;;  %v452_v60 = vunpack.c.l.bf16 %v508_v55 }
  0x32   :  { %v165_v31 = vadd.f32 %v408_v25, %v164_v26  ;;  %v244_v26 = vmul.f32 %v420_v52, %v420_v52 }
  0x33   :  { %v300_v5 = vadd.f32 %v299_v0, %v237_v59  ;;  %v509_v0 = vld [vmem:[%s628_s0 + $0xc0] sm:$0xff]  }
  0x34   :  { %v166_v35 = vadd.f32 %v409_v30, %v165_v31  ;;  %v245_v31 = vmul.f32 %v421_v57, %v421_v57  ;;  %v457_v10 = vunpack.c.h.bf16 %v509_v0 }
  0x35   :  { %v301_v9 = vadd.f32 %v300_v5, %v238_v63  ;;  %v456_v5 = vunpack.c.l.bf16 %v509_v0 }
  0x36   :  { %v167_v40 = vadd.f32 %v412_v34, %v166_v35  ;;  %v246_v35 = vmul.f32 %v424_v61, %v424_v61 }
  0x37   :  { %v302_v14 = vadd.f32 %v301_v9, %v239_v4  ;;  %v510_v9 = vld [vmem:[%s628_s0 + $0xc8] sm:$0xff]  }
  0x38   :  { %v168_v44 = vadd.f32 %v413_v39, %v167_v40  ;;  %v247_v40 = vmul.f32 %v425_v2, %v425_v2  ;;  %v461_v19 = vunpack.c.h.bf16 %v510_v9 }
  0x39   :  { %v303_v18 = vadd.f32 %v302_v14, %v240_v8  ;;  %v460_v14 = vunpack.c.l.bf16 %v510_v9 }
  0x3a   :  { %v169_v49 = vadd.f32 %v416_v43, %v168_v44  ;;  %v248_v44 = vmul.f32 %v428_v6, %v428_v6 }
  0x3b   :  { %v304_v23 = vadd.f32 %v303_v18, %v241_v13  ;;  %v511_v18 = vld [vmem:[%s628_s0 + $0xd0] sm:$0xff]  }
  0x3c   :  { %v170_v53 = vadd.f32 %v417_v48, %v169_v49  ;;  %v249_v49 = vmul.f32 %v429_v11, %v429_v11  ;;  %v465_v28 = vunpack.c.h.bf16 %v511_v18 }
  0x3d   :  { %v305_v27 = vadd.f32 %v304_v23, %v242_v17  ;;  %v464_v23 = vunpack.c.l.bf16 %v511_v18 }
  0x3e   :  { %v171_v58 = vadd.f32 %v420_v52, %v170_v53  ;;  %v250_v53 = vmul.f32 %v432_v15, %v432_v15 }
  0x3f   :  { %v306_v32 = vadd.f32 %v305_v27, %v243_v22  ;;  %v512_v27 = vld [vmem:[%s628_s0 + $0xd8] sm:$0xff]  }
  0x40   :  { %v172_v62 = vadd.f32 %v421_v57, %v171_v58  ;;  %v251_v58 = vmul.f32 %v433_v20, %v433_v20  ;;  %v469_v37 = vunpack.c.h.bf16 %v512_v27 }
  0x41   :  { %v307_v36 = vadd.f32 %v306_v32, %v244_v26  ;;  %v468_v32 = vunpack.c.l.bf16 %v512_v27 }
  0x42   :  { %v173_v3 = vadd.f32 %v424_v61, %v172_v62  ;;  %v252_v62 = vmul.f32 %v436_v24, %v436_v24 }
  0x43   :  { %v308_v41 = vadd.f32 %v307_v36, %v245_v31  ;;  %v513_v36 = vld [vmem:[%s628_s0 + $0xe0] sm:$0xff]  }
  0x44   :  { %v174_v7 = vadd.f32 %v425_v2, %v173_v3  ;;  %v253_v3 = vmul.f32 %v437_v29, %v437_v29  ;;  %v473_v46 = vunpack.c.h.bf16 %v513_v36 }
  0x45   :  { %v309_v45 = vadd.f32 %v308_v41, %v246_v35  ;;  %v472_v41 = vunpack.c.l.bf16 %v513_v36 }
  0x46   :  { %v175_v12 = vadd.f32 %v428_v6, %v174_v7  ;;  %v254_v7 = vmul.f32 %v440_v33, %v440_v33 }
  0x47   :  { %v310_v50 = vadd.f32 %v309_v45, %v247_v40  ;;  %v514_v45 = vld [vmem:[%s628_s0 + $0xe8] sm:$0xff]  }
  0x48   :  { %v176_v16 = vadd.f32 %v429_v11, %v175_v12  ;;  %v255_v12 = vmul.f32 %v441_v38, %v441_v38  ;;  %v477_v55 = vunpack.c.h.bf16 %v514_v45 }
  0x49   :  { %v311_v54 = vadd.f32 %v310_v50, %v248_v44  ;;  %v476_v50 = vunpack.c.l.bf16 %v514_v45 }
  0x4a   :  { %v177_v21 = vadd.f32 %v432_v15, %v176_v16  ;;  %v256_v16 = vmul.f32 %v444_v42, %v444_v42 }
  0x4b   :  { %v312_v59 = vadd.f32 %v311_v54, %v249_v49  ;;  %v515_v54 = vld [vmem:[%s628_s0 + $0xf0] sm:$0xff]  }
  0x4c   :  { %v178_v25 = vadd.f32 %v433_v20, %v177_v21  ;;  %v257_v21 = vmul.f32 %v445_v47, %v445_v47  ;;  %v481_v0 = vunpack.c.h.bf16 %v515_v54 }
  0x4d   :  { %v313_v63 = vadd.f32 %v312_v59, %v250_v53  ;;  %v480_v59 = vunpack.c.l.bf16 %v515_v54 }
  0x4e   :  { %v179_v30 = vadd.f32 %v436_v24, %v178_v25  ;;  %v258_v25 = vmul.f32 %v448_v51, %v448_v51 }
  0x4f   :  { %v314_v4 = vadd.f32 %v313_v63, %v251_v58  ;;  %v516_v63 = vld [vmem:[%s628_s0 + $0xf8] sm:$0xff]  }
  0x50   :  { %v180_v34 = vadd.f32 %v437_v29, %v179_v30  ;;  %v259_v30 = vmul.f32 %v449_v56, %v449_v56 }
  0x51   :  { %v315_v8 = vadd.f32 %v314_v4, %v252_v62  ;;  %v484_v4 = vunpack.c.l.bf16 %v516_v63 }
  0x52   :  { %v181_v39 = vadd.f32 %v440_v33, %v180_v34  ;;  %v260_v34 = vmul.f32 %v452_v60, %v452_v60 }
  0x53   :  { %v316_v13 = vadd.f32 %v315_v8, %v253_v3  ;;  %v485_v8 = vunpack.c.h.bf16 %v516_v63 }
  0x54   :  { %v182_v43 = vadd.f32 %v441_v38, %v181_v39  ;;  %v261_v39 = vmul.f32 %v453_v1, %v453_v1 }
  0x55   :  { %v317_v17 = vadd.f32 %v316_v13, %v254_v7  ;;  %v270_v13 = vmul.f32 %v472_v41, %v472_v41 }
  0x56   :  { %v183_v48 = vadd.f32 %v444_v42, %v182_v43  ;;  %v262_v43 = vmul.f32 %v456_v5, %v456_v5 }
  0x57   :  { %v318_v22 = vadd.f32 %v317_v17, %v255_v12 }
  0x58   :  { %v184_v52 = vadd.f32 %v445_v47, %v183_v48  ;;  %v263_v48 = vmul.f32 %v457_v10, %v457_v10 }
  0x59   :  { %v319_v26 = vadd.f32 %v318_v22, %v256_v16  ;;  %v271_v16 = vmul.f32 %v473_v46, %v473_v46  ;;  %v273_v22 = vmul.f32 %v477_v55, %v477_v55 }
  0x5a   :  { %v185_v57 = vadd.f32 %v448_v51, %v184_v52  ;;  %v264_v52 = vmul.f32 %v460_v14, %v460_v14 }
  0x5b   :  { %v320_v31 = vadd.f32 %v319_v26, %v257_v21 }
  0x5c   :  { %v186_v61 = vadd.f32 %v449_v56, %v185_v57  ;;  %v265_v57 = vmul.f32 %v461_v19, %v461_v19 }
  0x5d   :  { %v321_v35 = vadd.f32 %v320_v31, %v258_v25  ;;  %v274_v25 = vmul.f32 %v480_v59, %v480_v59 }
  0x5e   :  { %v187_v2 = vadd.f32 %v452_v60, %v186_v61  ;;  %v266_v61 = vmul.f32 %v464_v23, %v464_v23 }
  0x5f   :  { %v322_v40 = vadd.f32 %v321_v35, %v259_v30  ;;  %v141_v30 = vld [vmem:[#allocation2] sm:$0x1]  ;;  %v277_v35 = vmul.f32 %v485_v8, %v485_v8 }
  0x60   :  { %v188_v6 = vadd.f32 %v453_v1, %v187_v2  ;;  %v267_v2 = vmul.f32 %v465_v28, %v465_v28 }
  0x61   :  { %v323_v44 = vadd.f32 %v322_v40, %v260_v34 }
  0x62   :  { %v189_v11 = vadd.f32 %v456_v5, %v188_v6  ;;  %v268_v6 = vmul.f32 %v468_v32, %v468_v32 }
  0x63   :  { %v324_v49 = vadd.f32 %v323_v44, %v261_v39  ;;  %v213_v44 = vld [vmem:[#allocation2 + $0x1] sm:$0x1] }
  0x64   :  { %v190_v15 = vadd.f32 %v457_v10, %v189_v11  ;;  %v269_v10 = vmul.f32 %v469_v37, %v469_v37 }
  0x65   :  { %v325_v53 = vadd.f32 %v324_v49, %v262_v43 }
  0x66   :  { %v191_v20 = vadd.f32 %v460_v14, %v190_v15 }
  0x67   :  { %v326_v58 = vadd.f32 %v325_v53, %v263_v48 }
  0x68   :  { %v192_v24 = vadd.f32 %v461_v19, %v191_v20  ;;  %v272_v19 = vmul.f32 %v476_v50, %v476_v50 }
  0x69   :  { %v327_v62 = vadd.f32 %v326_v58, %v264_v52 }
  0x6a   :  { %v193_v29 = vadd.f32 %v464_v23, %v192_v24 }
  0x6b   :  { %v328_v3 = vadd.f32 %v327_v62, %v265_v57 }
  0x6c   :  { %v194_v33 = vadd.f32 %v465_v28, %v193_v29  ;;  %v275_v28 = vmul.f32 %v481_v0, %v481_v0 }
  0x6d   :  { %v329_v7 = vadd.f32 %v328_v3, %v266_v61 }
  0x6e   :  { %v195_v38 = vadd.f32 %v468_v32, %v194_v33  ;;  %v276_v32 = vmul.f32 %v484_v4, %v484_v4 }
  0x6f   :  { %v330_v11 = vadd.f32 %v329_v7, %v267_v2 }
  0x70   :  { %v196_v42 = vadd.f32 %v469_v37, %v195_v38 }
  0x71   :  { %v331_v14 = vadd.f32 %v330_v11, %v268_v6 }
  0x72   :  { %v197_v47 = vadd.f32 %v472_v41, %v196_v42 }
  0x73   :  { %v332_v17 = vadd.f32 %v331_v14, %v269_v10 }
  0x74   :  { %v198_v51 = vadd.f32 %v473_v46, %v197_v47 }
  0x75   :  { %v333_v20 = vadd.f32 %v332_v17, %v270_v13 }
  0x76   :  { %v199_v56 = vadd.f32 %v476_v50, %v198_v51 }
  0x77   :  { %v334_v23 = vadd.f32 %v333_v20, %v271_v16 }
  0x78   :  { %v200_v60 = vadd.f32 %v477_v55, %v199_v56 }
  0x79   :  { %v335_v26 = vadd.f32 %v334_v23, %v272_v19 }
  0x7a   :  { %v201_v1 = vadd.f32 %v480_v59, %v200_v60 }
  0x7b   :  { %v336_v29 = vadd.f32 %v335_v26, %v273_v22 }
  0x7c   :  { %v202_v5 = vadd.f32 %v481_v0, %v201_v1 }
  0x7d   :  { %v337_v33 = vadd.f32 %v336_v29, %v274_v25 }
  0x7e   :  { %v203_v9 = vadd.f32 %v484_v4, %v202_v5 }
  0x7f   :  { %v338_v36 = vadd.f32 %v337_v33, %v275_v28 }
  0x80   :  { %v204_v12 = vadd.f32 %v485_v8, %v203_v9 }
  0x81   :  { %v339_v37 = vadd.f32 %v338_v36, %v276_v32 }
  0x82   :  { %v205_v15 = vrot.slane %v204_v12, 4 }
  0x83   :  { %v340_v38 = vadd.f32 %v339_v37, %v277_v35 }
  0x84   :  { %v206_v18 = vadd.f32 %v205_v15, %v204_v12 }
  0x85   :  { %v341_v39 = vrot.slane %v340_v38, 4 }
  0x86   :  { %v207_v21 = vrot.slane %v206_v18, 2 }
  0x87   :  { %v342_v40 = vadd.f32 %v341_v39, %v340_v38 }
  0x88   :  { %v208_v24 = vadd.f32 %v207_v21, %v206_v18 }
  0x89   :  { %v343_v41 = vrot.slane %v342_v40, 2 }
  0x8a   :  { %v209_v27 = vrot.slane %v208_v24, 1 }
  0x8b   :  { %v344_v42 = vadd.f32 %v343_v41, %v342_v40 }
  0x8c   :  { %v210_v31 = vadd.f32 %v209_v27, %v208_v24 }
  0x8d   :  { %v345_v43 = vrot.slane %v344_v42, 1 }
  0x8e   :  { %v211_v34 = vadd.f32 %v210_v31, %v141_v30 }
  0x8f   :  { %v346_v45 = vadd.f32 %v345_v43, %v344_v42 }
  0x90   :  { %212 = vst [vmem:[#allocation2] sm:$0x1] %v211_v34 }
  0x91   :  { %v347_v46 = vadd.f32 %v346_v45, %v213_v44 }
  0x93   :  { %348 = vst [vmem:[#allocation2 + $0x1] sm:$0x1] %v347_v46 }
  0x9a   :  { %v352_v47 = vld [vmem:[#allocation2] sm:$0xff] }
  0x9b   :  { %353 = vst [vmem:[%s629_s1] sm:$0xff] %v352_v47 }

// kernel: generator_forward.16
= control target key start
LH: loop header
LB: loop body
LE: loop exit
PB: predicated region body
PF: predicated region fallthrough
CT: control target
= control target key end

     0   :  { %s1597_s15 = smov 0   ;;  %s1599_s16 = smov 0   ;;  %s1771_s0 = inlined_call_operand.vmem [shape: bf16[512,128], index: 0, kind: input, shape index: {}]   ;;  %s1772_s1 = inlined_call_operand.vmem [shape: bf16[128,128], index: 1, kind: input, shape index: {}]   ;;  %s1773_s2 = inlined_call_operand.vmem [shape: f32[1,128], index: 2, kind: input, shape index: {}]   ;;  %s1774_s3 = inlined_call_operand.vmem [shape: f32[1,128], index: 3, kind: input, shape index: {}]   ;;  %s1775_s4 = inlined_call_operand.vmem [shape: bf16[512,128], index: 4, kind: output, shape index: {}]  }
   0x1   :  { %s1601_s17 = smov 0  }
   0x2 LB: > { %s33_s18 = sadd.s32 1, %s1566_s16  ;;  %p1173_p0 = scmp.ge.s32.totalorder %s1570_s17, 1  ;;  %s1570_s17 = sphi %s1601_s17, %s14_s17   ;;  %s1566_s16 = sphi %s1599_s16, %s1777_s16   ;;  %s1562_s15 = sphi %s1597_s15, %s1776_s15  }
   0x3   : > { %p35_p1 = scmp.ge.s32.totalorder %s33_s18, 2  ;;  %p221_p2 = scmp.lt.s32.totalorder %s1570_s17, 3 }
   0x5   : > { %s1779_s18 = smov (%p35_p1, %s33_s18), 0  ;;  %p222_p3 = pnand %p1173_p0, %p221_p2 }
   0x6   : > { %v1540_v0 = vld [vmem:[%s1772_s1] sm:$0xff] (!%p222_p3)   ;;  %s1174_s21 = sshll.u32 (!%p222_p3), %s1562_s15, 5  ;;  %v1541_v1 = vld [vmem:[%s1772_s1 + $0x8] sm:$0xff] (!%p222_p3)   ;;  %v1542_v2 = vld [vmem:[%s1772_s1 + $0x10] sm:$0xff] (!%p222_p3)  }
   0x7   : > { %225 = sbr.rel (%p222_p3) target bundleno = 282 (0x11a), region = 36  ;;  %p268_p4 = scmp.lt.s32.totalorder (!%p222_p3), %s1174_s21, 63  ;;  %1452 = vmatprep.subr.bf16.mxu0 (!%p222_p3), %v1540_v0  ;;  %1500 = vmatprep.subr.bf16.mxu1 (!%p222_p3), %v1540_v0  ;;  %v1543_v3 = vld [vmem:[%s1772_s1 + $0x18] sm:$0xff] (!%p222_p3)   ;;  %v1641_v5 = vld [vmem:[%s1773_s2] ss:$0 sm:$0xff] (!%p222_p3)  ;;  %v1545_v37 = vld [vmem:[%s1772_s1 + $0x28] sm:$0xff] (!%p222_p3)  }
   0x8   : > { %1453 = vmatpush3.bf16.msra.mxu0 (!%p222_p3), %v1540_v0  ;;  %1508 = vmatpush3.bf16.msra.mxu1 (!%p222_p3), %v1540_v0  ;;  %v1649_v11 = vld [vmem:[%s1774_s3] ss:$0 sm:$0xff] (!%p222_p3)  ;;  %v1546_v54 = vld [vmem:[%s1772_s1 + $0x30] sm:$0xff] (!%p222_p3)  }
   0x9   : > { %1454 = vmatprep.subr.bf16.mxu0 (!%p222_p3), %v1541_v1  ;;  %1501 = vmatprep.subr.bf16.mxu1 (!%p222_p3), %v1541_v1  ;;  %v1544_v21 = vld [vmem:[%s1772_s1 + $0x20] sm:$0xff] (!%p222_p3)  }
   0xc   : > { %1455 = vmatpush3.bf16.msra.mxu0 (!%p222_p3), %v1541_v1  ;;  %1509 = vmatpush3.bf16.msra.mxu1 (!%p222_p3), %v1541_v1 }
   0xd   : > { %1456 = vmatprep.subr.bf16.mxu0 (!%p222_p3), %v1542_v2  ;;  %1502 = vmatprep.subr.bf16.mxu1 (!%p222_p3), %v1542_v2 }
   0xe   : > { %s1781_s21 = smov (!%p268_p4, %s1174_s21), 63 }
   0xf   : > { %s1175_s26 = sshll.u32 %s1781_s21, 2 }
  0x10   : > { %s1632_s29 = scalar_lea.vmem %s1771_s0, %s1175_s26  ;;  %1457 = vmatpush3.bf16.msra.mxu0 %v1542_v2  ;;  %1510 = vmatpush3.bf16.msra.mxu1 %v1542_v2  ;;  %s1744_s24 = scalar_lea.vmem %s1775_s4, %s1175_s26 }
  0x11   : > { %v1255_v4 = vld [vmem:[%s1632_s29] sm:$0xff]   ;;  %v1398_v9 = vld [vmem:[%s1632_s29 + $0x8] sm:$0xff]   ;;  %v1399_v20 = vld [vmem:[%s1632_s29 + $0x10] sm:$0xff]   ;;  %1458 = vmatprep.subr.bf16.mxu0 %v1543_v3  ;;  %1503 = vmatprep.subr.bf16.mxu1 %v1543_v3 }
  0x12   : > { %v1256_v6 = vunpack.c.l.bf16 %v1255_v4  ;;  %v1257_v7 = vunpack.c.h.bf16 %v1255_v4  ;;  %v1405_v8 = vld [vmem:[%s1632_s29 + $0x40] sm:$0xff]   ;;  %v1406_v10 = vld [vmem:[%s1632_s29 + $0x48] sm:$0xff]   ;;  %v1260_v14 = vunpack.c.l.bf16 %v1398_v9  ;;  %v1261_v15 = vunpack.c.h.bf16 %v1398_v9  ;;  %v1407_v36 = vld [vmem:[%s1632_s29 + $0x50] sm:$0xff]  }
  0x13   : > { %v1288_v12 = vunpack.c.l.bf16 %v1405_v8  ;;  %v1289_v13 = vunpack.c.h.bf16 %v1405_v8  ;;  %v1292_v18 = vunpack.c.l.bf16 %v1406_v10  ;;  %v1293_v19 = vunpack.c.h.bf16 %v1406_v10  ;;  %v1400_v41 = vld [vmem:[%s1632_s29 + $0x18] sm:$0xff]   ;;  %v1401_v63 = vld [vmem:[%s1632_s29 + $0x20] sm:$0xff]  }
  0x14   : > { %v408_v16 = vmul.f32 %v1256_v6, %v1641_v5  ;;  %v409_v17 = vmul.f32 %v1257_v7, %v1641_v5  ;;  %v410_v24 = vmul.f32 %v1260_v14, %v1641_v5  ;;  %v411_v27 = vmul.f32 %v1261_v15, %v1641_v5  ;;  %1459 = vmatpush3.bf16.msra.mxu0 %v1543_v3  ;;  %v1408_v49 = vld [vmem:[%s1632_s29 + $0x58] sm:$0xff]   ;;  %v1409_v15 = vld [vmem:[%s1632_s29 + $0x60] sm:$0xff]  }
  0x15   : > { %v424_v22 = vmul.f32 %v1288_v12, %v1641_v5  ;;  %v425_v23 = vmul.f32 %v1289_v13, %v1641_v5  ;;  %v426_v28 = vmul.f32 %v1292_v18, %v1641_v5  ;;  %v1264_v32 = vunpack.c.l.bf16 %v1399_v20  ;;  %1511 = vmatpush3.bf16.msra.mxu1 %v1543_v3  ;;  %1460 = vmatprep.subr.bf16.mxu0 %v1544_v21  ;;  %v1547_v9 = vld [vmem:[%s1772_s1 + $0x38] sm:$0xff]  }
  0x16   : > { %v447_v25 = vadd.f32 %v1649_v11, %v408_v16  ;;  %v448_v26 = vadd.f32 %v1649_v11, %v409_v17  ;;  %v449_v31 = vadd.f32 %v1649_v11, %v410_v24  ;;  %v427_v35 = vmul.f32 %v1293_v19, %v1641_v5  ;;  %1504 = vmatprep.subr.bf16.mxu1 %v1544_v21 }
  0x17   : > { %v463_v29 = vadd.f32 %v1649_v11, %v424_v22  ;;  %v464_v30 = vadd.f32 %v1649_v11, %v425_v23  ;;  %v450_v40 = vadd.f32 %v1649_v11, %v411_v27  ;;  %v465_v43 = vadd.f32 %v1649_v11, %v426_v28  ;;  %v1402_v22 = vld [vmem:[%s1632_s29 + $0x28] sm:$0xff]  }
  0x18   : > { %v479_v33 = vmax.f32 %v447_v25, 0.0  ;;  %v480_v34 = vmax.f32 %v448_v26, 0.0  ;;  %v1265_v44 = vunpack.c.h.bf16 %v1399_v20  ;;  %v481_v46 = vmax.f32 %v449_v31, 0.0  ;;  %1461 = vmatpush3.bf16.msra.mxu0 %v1544_v21  ;;  %v1410_v27 = vld [vmem:[%s1632_s29 + $0x68] sm:$0xff]  }
  0x19   : > { %v495_v38 = vmax.f32 %v463_v29, 0.0  ;;  %v496_v39 = vmax.f32 %v464_v30, 0.0  ;;  %v412_v47 = vmul.f32 %v1264_v32, %v1641_v5  ;;  %v1296_v48 = vunpack.c.l.bf16 %v1407_v36  ;;  %1512 = vmatpush3.bf16.msra.mxu1 %v1544_v21  ;;  %1462 = vmatprep.subr.bf16.mxu0 %v1545_v37 }
  0x1a   : > { %v511_v42 = vpack.c.bf16 %v480_v34, %v479_v33  ;;  %v466_v50 = vadd.f32 %v1649_v11, %v427_v35  ;;  %v413_v51 = vmul.f32 %v1265_v44, %v1641_v5  ;;  %v1297_v52 = vunpack.c.h.bf16 %v1407_v36  ;;  %1505 = vmatprep.subr.bf16.mxu1 %v1545_v37  ;;  %v1403_v36 = vld [vmem:[%s1632_s29 + $0x30] sm:$0xff]  }
  0x1b   : > { %v519_v45 = vpack.c.bf16 %v496_v39, %v495_v38  ;;  %v1268_v53 = vunpack.c.l.bf16 %v1400_v41  ;;  %v482_v55 = vmax.f32 %v450_v40, 0.0  ;;  %v451_v56 = vadd.f32 %v1649_v11, %v412_v47 }
  0x1c   : > { %v428_v57 = vmul.f32 %v1296_v48, %v1641_v5  ;;  %v1269_v58 = vunpack.c.h.bf16 %v1400_v41  ;;  %1468 = vmatprep.mubr.bf16.mxu0 %v511_v42  ;;  %v452_v59 = vadd.f32 %v1649_v11, %v413_v51  ;;  %v429_v60 = vmul.f32 %v1297_v52, %v1641_v5  ;;  %1463 = vmatpush3.bf16.msra.mxu0 %v1545_v37  ;;  %v1411_v52 = vld [vmem:[%s1632_s29 + $0x70] sm:$0xff]  }
  0x1d   : > { %1484 = vmatprep.mubr.bf16.mxu1 %v519_v45  ;;  %v414_v61 = vmul.f32 %v1268_v53, %v1641_v5  ;;  %v1300_v62 = vunpack.c.l.bf16 %v1408_v49  ;;  %v497_v0 = vmax.f32 %v465_v43, 0.0  ;;  %v1301_v3 = vunpack.c.h.bf16 %v1408_v49  ;;  %1513 = vmatpush3.bf16.msra.mxu1 %v1545_v37 }
  0x1e   : > { %v467_v1 = vadd.f32 %v1649_v11, %v428_v57  ;;  %v415_v2 = vmul.f32 %v1269_v58, %v1641_v5  ;;  %v498_v4 = vmax.f32 %v466_v50, 0.0  ;;  %v483_v6 = vmax.f32 %v451_v56, 0.0  ;;  %1464 = vmatprep.subr.bf16.mxu0 %v1546_v54  ;;  %1506 = vmatprep.subr.bf16.mxu1 %v1546_v54 }
  0x1f   : > { %v484_v7 = vmax.f32 %v452_v59, 0.0  ;;  %v468_v8 = vadd.f32 %v1649_v11, %v429_v60  ;;  %v453_v10 = vadd.f32 %v1649_v11, %v414_v61  ;;  %v430_v12 = vmul.f32 %v1300_v62, %v1641_v5  ;;  %v1404_v60 = vld [vmem:[%s1632_s29 + $0x38] sm:$0xff]  }
  0x20   : > { %v431_v13 = vmul.f32 %v1301_v3, %v1641_v5  ;;  %v1272_v14 = vunpack.c.l.bf16 %v1401_v63  ;;  %v512_v16 = vpack.c.bf16 %v482_v55, %v481_v46  ;;  %v499_v17 = vmax.f32 %v467_v1, 0.0  ;;  %1465 = vmatpush3.bf16.msra.mxu0 %v1546_v54 }
  0x21   : > { %v500_v18 = vmax.f32 %v468_v8, 0.0  ;;  %v454_v19 = vadd.f32 %v1649_v11, %v415_v2  ;;  %v1273_v20 = vunpack.c.h.bf16 %v1401_v63  ;;  %1514 = vmatpush3.bf16.msra.mxu1 %v1546_v54  ;;  %v520_v23 = vpack.c.bf16 %v498_v4, %v497_v0  ;;  %1466 = vmatprep.subr.bf16.mxu0 %v1547_v9 }
  0x22   : > { %v416_v21 = vmul.f32 %v1272_v14, %v1641_v5  ;;  %v513_v24 = vpack.c.bf16 %v484_v7, %v483_v6  ;;  %v1304_v25 = vunpack.c.l.bf16 %v1409_v15  ;;  %v1305_v26 = vunpack.c.h.bf16 %v1409_v15  ;;  %1507 = vmatprep.subr.bf16.mxu1 %v1547_v9  ;;  %v1412_v6 = vld [vmem:[%s1632_s29 + $0x78] sm:$0xff]  }
  0x23   : > { %v485_v28 = vmax.f32 %v453_v10, 0.0  ;;  %v469_v29 = vadd.f32 %v1649_v11, %v430_v12  ;;  %v470_v30 = vadd.f32 %v1649_v11, %v431_v13  ;;  %v417_v31 = vmul.f32 %v1273_v20, %v1641_v5 }
  0x24   : > { %v432_v32 = vmul.f32 %v1304_v25, %v1641_v5  ;;  %v433_v33 = vmul.f32 %v1305_v26, %v1641_v5  ;;  %v1276_v34 = vunpack.c.l.bf16 %v1402_v22  ;;  %v1277_v35 = vunpack.c.h.bf16 %v1402_v22  ;;  %1467 = vmatpush3.bf16.msra.mxu0 %v1547_v9 }
  0x25   : > { %v521_v37 = vpack.c.bf16 %v500_v18, %v499_v17  ;;  %v486_v38 = vmax.f32 %v454_v19, 0.0  ;;  %v455_v39 = vadd.f32 %v1649_v11, %v416_v21  ;;  %v1308_v40 = vunpack.c.l.bf16 %v1410_v27  ;;  %1515 = vmatpush3.bf16.msra.mxu1 %v1547_v9 }
  0x26   : > { %v456_v41 = vadd.f32 %v1649_v11, %v417_v31  ;;  %v471_v42 = vadd.f32 %v1649_v11, %v432_v32  ;;  %v472_v43 = vadd.f32 %v1649_v11, %v433_v33  ;;  %v1309_v44 = vunpack.c.h.bf16 %v1410_v27 }
  0x27   : > { %v418_v45 = vmul.f32 %v1276_v34, %v1641_v5  ;;  %v419_v46 = vmul.f32 %v1277_v35, %v1641_v5  ;;  %v1280_v47 = vunpack.c.l.bf16 %v1403_v36  ;;  %v501_v48 = vmax.f32 %v469_v29, 0.0  ;;  %1469 = vmatmul.mubr.bf16.vlgmr.msra.gmra.mrb[0].mxu0 %v512_v16 }
  0x28   : > { %v502_v49 = vmax.f32 %v470_v30, 0.0  ;;  %v434_v50 = vmul.f32 %v1308_v40, %v1641_v5  ;;  %v435_v51 = vmul.f32 %v1309_v44, %v1641_v5  ;;  %1485 = vmatmul.mubr.bf16.vlgmr.msra.gmra.mrb[0].mxu1 %v520_v23  ;;  %v514_v53 = vpack.c.bf16 %v486_v38, %v485_v28  ;;  %1472 = vmatprep.mubr.bf16.mxu0 %v513_v24 }
  0x29   : > { %v487_v54 = vmax.f32 %v455_v39, 0.0  ;;  %v1281_v55 = vunpack.c.h.bf16 %v1403_v36  ;;  %1488 = vmatprep.mubr.bf16.mxu1 %v521_v37  ;;  %v488_v56 = vmax.f32 %v456_v41, 0.0  ;;  %v503_v57 = vmax.f32 %v471_v42, 0.0 }
  0x2a   : > { %v504_v58 = vmax.f32 %v472_v43, 0.0  ;;  %v420_v59 = vmul.f32 %v1280_v47, %v1641_v5  ;;  %v457_v61 = vadd.f32 %v1649_v11, %v418_v45  ;;  %v458_v62 = vadd.f32 %v1649_v11, %v419_v46 }
  0x2b   : > { %v421_v63 = vmul.f32 %v1281_v55, %v1641_v5  ;;  %v1312_v0 = vunpack.c.l.bf16 %v1411_v52  ;;  %v522_v1 = vpack.c.bf16 %v502_v49, %v501_v48  ;;  %v473_v2 = vadd.f32 %v1649_v11, %v434_v50 }
  0x2c   : > { %v474_v3 = vadd.f32 %v1649_v11, %v435_v51  ;;  %v1313_v4 = vunpack.c.h.bf16 %v1411_v52  ;;  %v459_v7 = vadd.f32 %v1649_v11, %v420_v59  ;;  %v1284_v9 = vunpack.c.l.bf16 %v1404_v60 }
  0x2d   : > { %v436_v8 = vmul.f32 %v1312_v0, %v1641_v5  ;;  %v1285_v10 = vunpack.c.h.bf16 %v1404_v60  ;;  %v515_v12 = vpack.c.bf16 %v488_v56, %v487_v54  ;;  %v523_v13 = vpack.c.bf16 %v504_v58, %v503_v57 }
  0x2e   : > { %v460_v14 = vadd.f32 %v1649_v11, %v421_v63  ;;  %v437_v15 = vmul.f32 %v1313_v4, %v1641_v5  ;;  %v489_v16 = vmax.f32 %v457_v61, 0.0  ;;  %v490_v17 = vmax.f32 %v458_v62, 0.0 }
  0x2f   : > { %v475_v18 = vadd.f32 %v1649_v11, %v436_v8  ;;  %v1316_v19 = vunpack.c.l.bf16 %v1412_v6  ;;  %v505_v20 = vmax.f32 %v473_v2, 0.0  ;;  %v506_v21 = vmax.f32 %v474_v3, 0.0  ;;  %1473 = vmatmul.mubr.bf16.gmra.mrb[4].mxu0 %v514_v53 }
  0x30   : > { %v476_v22 = vadd.f32 %v1649_v11, %v437_v15  ;;  %v1317_v23 = vunpack.c.h.bf16 %v1412_v6  ;;  %1489 = vmatmul.mubr.bf16.gmra.mrb[4].mxu1 %v522_v1  ;;  %v491_v24 = vmax.f32 %v459_v7, 0.0  ;;  %v422_v25 = vmul.f32 %v1284_v9, %v1641_v5  ;;  %1476 = vmatprep.mubr.bf16.mxu0 %v515_v12 }
  0x31   : > { %v423_v26 = vmul.f32 %v1285_v10, %v1641_v5  ;;  %v438_v27 = vmul.f32 %v1316_v19, %v1641_v5  ;;  %1492 = vmatprep.mubr.bf16.mxu1 %v523_v13  ;;  %v492_v28 = vmax.f32 %v460_v14, 0.0  ;;  %v507_v29 = vmax.f32 %v475_v18, 0.0 }
  0x32   : > { %v508_v30 = vmax.f32 %v476_v22, 0.0  ;;  %v439_v31 = vmul.f32 %v1317_v23, %v1641_v5  ;;  %v516_v32 = vpack.c.bf16 %v490_v17, %v489_v16  ;;  %v524_v33 = vpack.c.bf16 %v506_v21, %v505_v20 }
  0x33   : > { %v461_v34 = vadd.f32 %v1649_v11, %v422_v25  ;;  %v462_v35 = vadd.f32 %v1649_v11, %v423_v26  ;;  %v477_v36 = vadd.f32 %v1649_v11, %v438_v27  ;;  %v517_v38 = vpack.c.bf16 %v492_v28, %v491_v24 }
  0x34   : > { %v478_v37 = vadd.f32 %v1649_v11, %v439_v31  ;;  %v525_v39 = vpack.c.bf16 %v508_v30, %v507_v29 }
  0x35   : > { %v493_v40 = vmax.f32 %v461_v34, 0.0  ;;  %v494_v41 = vmax.f32 %v462_v35, 0.0  ;;  %v509_v42 = vmax.f32 %v477_v36, 0.0 }
  0x36   : > { %v510_v43 = vmax.f32 %v478_v37, 0.0 }
  0x37   : > { %1477 = vmatmul.mubr.bf16.gmra.mrb[8].mxu0 %v516_v32  ;;  %v518_v5 = vpack.c.bf16 %v494_v41, %v493_v40 }
  0x38   : > { %1493 = vmatmul.mubr.bf16.gmra.mrb[8].mxu1 %v524_v33  ;;  %1480 = vmatprep.mubr.bf16.mxu0 %v517_v38  ;;  %v526_v44 = vpack.c.bf16 %v510_v43, %v509_v42 }
  0x39   : > { %1496 = vmatprep.mubr.bf16.mxu1 %v525_v39 }
  0x3f   : > { %1481 = vmatmul.mubr.bf16.gmra.mrb[12].mxu0 %v518_v5 }
  0x40   : > { %1497 = vmatmul.mubr.bf16.gmra.mrb[12].mxu1 %v526_v44 }
  0xfa   : > { %v1470_v45 = vpop.f32.mrb[0].mxu0 }
  0xfb   : > { %v1486_v46 = vpop.f32.mrb[0].mxu1  ;;  %v657_v47 = vpop.f32.mrb[1].mxu0 }
  0xfc   : > { %v721_v48 = vpop.f32.mrb[1].mxu1  ;;  %v1471_v11 = vpop.f32.mrb[2].mxu0 }
  0xfd   : > { %v1487_v49 = vpop.f32.mrb[2].mxu1  ;;  %v1326_v50 = vpack.c.bf16 %v1471_v11, %v1470_v45  ;;  %v660_v52 = vpop.f32.mrb[3].mxu0 }
  0xfe   : > { %v1366_v51 = vpack.c.bf16 %v1487_v49, %v1486_v46  ;;  %v724_v53 = vpop.f32.mrb[3].mxu1  ;;  %v1321_v54 = vpack.c.bf16 %v660_v52, %v657_v47 }
  0xff   : > { %v1361_v55 = vpack.c.bf16 %v724_v53, %v721_v48  ;;  %1413 = vst [vmem:[%s1744_s24 + $0x8] sm:$0xff] %v1326_v50  }
 0x100   : > { %1421 = vst [vmem:[%s1744_s24 + $0x48] sm:$0xff] %v1366_v51   ;;  %1322 = vst [vmem:[%s1744_s24] sm:$0xff] %v1321_v54  }
 0x101   : > { %1420 = vst [vmem:[%s1744_s24 + $0x40] sm:$0xff] %v1361_v55  }
 0x102   : > { %v1474_v56 = vpop.f32.mrb[4].mxu0 }
 0x103   : > { %v1490_v57 = vpop.f32.mrb[4].mxu1  ;;  %v673_v58 = vpop.f32.mrb[5].mxu0 }
 0x104   : > { %v737_v59 = vpop.f32.mrb[5].mxu1  ;;  %v1475_v60 = vpop.f32.mrb[6].mxu0 }
 0x105   : > { %v1491_v61 = vpop.f32.mrb[6].mxu1  ;;  %v1336_v62 = vpack.c.bf16 %v1475_v60, %v1474_v56  ;;  %v676_v0 = vpop.f32.mrb[7].mxu0 }
 0x106   : > { %v1376_v63 = vpack.c.bf16 %v1491_v61, %v1490_v57  ;;  %v740_v1 = vpop.f32.mrb[7].mxu1  ;;  %v1331_v2 = vpack.c.bf16 %v676_v0, %v673_v58 }
 0x107   : > { %v1371_v3 = vpack.c.bf16 %v740_v1, %v737_v59  ;;  %1415 = vst [vmem:[%s1744_s24 + $0x18] sm:$0xff] %v1336_v62  }
 0x108   : > { %1423 = vst [vmem:[%s1744_s24 + $0x58] sm:$0xff] %v1376_v63   ;;  %1414 = vst [vmem:[%s1744_s24 + $0x10] sm:$0xff] %v1331_v2  }
 0x109   : > { %1422 = vst [vmem:[%s1744_s24 + $0x50] sm:$0xff] %v1371_v3  }
 0x10a   : > { %v1478_v4 = vpop.f32.mrb[8].mxu0 }
 0x10b   : > { %v1494_v6 = vpop.f32.mrb[8].mxu1  ;;  %v689_v7 = vpop.f32.mrb[9].mxu0 }
 0x10c   : > { %v753_v8 = vpop.f32.mrb[9].mxu1  ;;  %v1479_v9 = vpop.f32.mrb[10].mxu0 }
 0x10d   : > { %v1495_v10 = vpop.f32.mrb[10].mxu1  ;;  %v1346_v12 = vpack.c.bf16 %v1479_v9, %v1478_v4  ;;  %v692_v14 = vpop.f32.mrb[11].mxu0 }
 0x10e   : > { %v1386_v13 = vpack.c.bf16 %v1495_v10, %v1494_v6  ;;  %v756_v15 = vpop.f32.mrb[11].mxu1  ;;  %v1341_v16 = vpack.c.bf16 %v692_v14, %v689_v7 }
 0x10f   : > { %v1381_v17 = vpack.c.bf16 %v756_v15, %v753_v8  ;;  %1417 = vst [vmem:[%s1744_s24 + $0x28] sm:$0xff] %v1346_v12  }
 0x110   : > { %1425 = vst [vmem:[%s1744_s24 + $0x68] sm:$0xff] %v1386_v13   ;;  %1416 = vst [vmem:[%s1744_s24 + $0x20] sm:$0xff] %v1341_v16  }
 0x111   : > { %1424 = vst [vmem:[%s1744_s24 + $0x60] sm:$0xff] %v1381_v17  }
 0x112   : > { %v1482_v18 = vpop.f32.mrb[12].mxu0 }
 0x113   : > { %v1498_v19 = vpop.f32.mrb[12].mxu1  ;;  %v705_v20 = vpop.f32.mrb[13].mxu0 }
 0x114   : > { %v769_v21 = vpop.f32.mrb[13].mxu1  ;;  %v1483_v22 = vpop.f32.mrb[14].mxu0 }
 0x115   : > { %v1499_v23 = vpop.f32.mrb[14].mxu1  ;;  %v1356_v24 = vpack.c.bf16 %v1483_v22, %v1482_v18  ;;  %v708_v26 = vpop.f32.mrb[15].mxu0 }
 0x116   : > { %v1396_v25 = vpack.c.bf16 %v1499_v23, %v1498_v19  ;;  %v772_v27 = vpop.f32.mrb[15].mxu1  ;;  %v1351_v28 = vpack.c.bf16 %v708_v26, %v705_v20 }
 0x117   : > { %v1391_v29 = vpack.c.bf16 %v772_v27, %v769_v21  ;;  %1419 = vst [vmem:[%s1744_s24 + $0x38] sm:$0xff] %v1356_v24  }
 0x118   : > { %1427 = vst [vmem:[%s1744_s24 + $0x78] sm:$0xff] %v1396_v25   ;;  %1418 = vst [vmem:[%s1744_s24 + $0x30] sm:$0xff] %v1351_v28  }
 0x119   : > { %1426 = vst [vmem:[%s1744_s24 + $0x70] sm:$0xff] %v1391_v29  }
 0x11a PF: > { %s14_s17 = sadd.s32 1, %s1570_s17   ;;  %s1776_s15 = smov %s1566_s16 }
 0x11b   : > { %p11_p5 = scmp.ge.s32.totalorder %s14_s17, 4   ;;  %s1777_s16 = smov %s1779_s18 }
 0x11d   :  { %13 = sbr.rel (!%p11_p5) target bundleno = 2 (0x2), region = 83 }

// kernel: generator_forward.17
= control target key start
LH: loop header
LB: loop body
LE: loop exit
PB: predicated region body
PF: predicated region fallthrough
CT: control target
= control target key end

     0   :  { %s676_s6 = smov 0   ;;  %s732_s0 = inlined_call_operand.vmem [shape: bf16[2048,128], index: 0, kind: input, shape index: {}]   ;;  %s733_s1 = inlined_call_operand.vmem [shape: f32[8,128], index: 1, kind: output, shape index: {}]  }
   0x1 LB: > { %s682_s7 = sadd.s32 4294967295, %s663_s6   ;;  %p482_p0 = scmp.ge.s32.totalorder %s663_s6, 1  ;;  %s663_s6 = sphi %s676_s6, %s11_s6  }
   0x2   : > { %p83_p1 = scmp.lt.s32.totalorder %s663_s6, 5 }
   0x4   : > { %p84_p2 = pnand %p482_p0, %p83_p1 }
   0x5   : > { %s483_s8 = sshll.u32 (!%p84_p2), %s682_s7, 6  ;;  %p485_p4 = scmp.ne.s32.totalorder (!%p84_p2), %s682_s7, 0 }
   0x6   : > { %87 = sbr.rel (%p84_p2) target bundleno = 175 (0xaf), region = 24  ;;  %p99_p3 = scmp.lt.s32.totalorder (!%p84_p2), %s483_s8, 255 }
   0xd   : > { %s735_s8 = smov (!%p99_p3, %s483_s8), 255  ;;  %107 = sbr.rel (%p485_p4) target bundleno = 20 (0x14), region = 28 }
   0xe   : > { %s484_s9 = sshll.u32 %s735_s8, 2  ;;  %v665_v0 = vmov (!%p485_p4), 0.0  }
   0xf   : > { %s690_s12 = scalar_lea.vmem %s732_s0, %s484_s9  ;;  %108 = vst [vmem:[#allocation2] sm:$0xff] (!%p485_p4), %v665_v0 }
  0x14 PF: > { %v490_v1 = vld [vmem:[%s690_s12] sm:$0xff]   ;;  %v617_v2 = vld [vmem:[%s690_s12 + $0x8] sm:$0xff]   ;;  %v618_v7 = vld [vmem:[%s690_s12 + $0x10] sm:$0xff]   ;;  %p486_p5 = scmp.ne.s32.totalorder %s682_s7, 3 }
  0x15   : > { %v491_v3 = vunpack.c.l.bf16 %v490_v1  ;;  %v492_v4 = vunpack.c.h.bf16 %v490_v1  ;;  %v495_v5 = vunpack.c.l.bf16 %v617_v2  ;;  %v496_v8 = vunpack.c.h.bf16 %v617_v2  ;;  %v619_v12 = vld [vmem:[%s690_s12 + $0x18] sm:$0xff]   ;;  %v620_v17 = vld [vmem:[%s690_s12 + $0x20] sm:$0xff]   ;;  %v621_v22 = vld [vmem:[%s690_s12 + $0x28] sm:$0xff]  }
  0x16   : > { %v499_v10 = vunpack.c.l.bf16 %v618_v7  ;;  %v500_v13 = vunpack.c.h.bf16 %v618_v7  ;;  %v503_v15 = vunpack.c.l.bf16 %v619_v12  ;;  %v504_v18 = vunpack.c.h.bf16 %v619_v12  ;;  %v622_v30 = vld [vmem:[%s690_s12 + $0x30] sm:$0xff]   ;;  %v623_v39 = vld [vmem:[%s690_s12 + $0x38] sm:$0xff]   ;;  %v624_v48 = vld [vmem:[%s690_s12 + $0x40] sm:$0xff]  }
  0x17   : > { %v238_v6 = vadd.f32 %v492_v4, %v491_v3  ;;  %v507_v20 = vunpack.c.l.bf16 %v620_v17  ;;  %v508_v23 = vunpack.c.h.bf16 %v620_v17  ;;  %v310_v25 = vmul.f32 %v491_v3, %v491_v3  ;;  %v625_v57 = vld [vmem:[%s690_s12 + $0x48] sm:$0xff]   ;;  %v626_v2 = vld [vmem:[%s690_s12 + $0x50] sm:$0xff]  }
  0x18   : > { %v311_v26 = vmul.f32 %v492_v4, %v492_v4  ;;  %v511_v27 = vunpack.c.l.bf16 %v621_v22  ;;  %v312_v29 = vmul.f32 %v495_v5, %v495_v5  ;;  %v512_v31 = vunpack.c.h.bf16 %v621_v22 }
  0x19   : > { %v239_v9 = vadd.f32 %v495_v5, %v238_v6  ;;  %v313_v33 = vmul.f32 %v496_v8, %v496_v8  ;;  %v515_v35 = vunpack.c.l.bf16 %v622_v30  ;;  %v314_v37 = vmul.f32 %v499_v10, %v499_v10 }
  0x1a   : > { %v374_v34 = vadd.f32 %v311_v26, %v310_v25  ;;  %v516_v40 = vunpack.c.h.bf16 %v622_v30  ;;  %v315_v42 = vmul.f32 %v500_v13, %v500_v13  ;;  %v519_v44 = vunpack.c.l.bf16 %v623_v39 }
  0x1b   : > { %v240_v11 = vadd.f32 %v496_v8, %v239_v9  ;;  %v316_v46 = vmul.f32 %v503_v15, %v503_v15  ;;  %v520_v49 = vunpack.c.h.bf16 %v623_v39  ;;  %v317_v51 = vmul.f32 %v504_v18, %v504_v18 }
  0x1c   : > { %v375_v38 = vadd.f32 %v374_v34, %v312_v29  ;;  %v523_v53 = vunpack.c.l.bf16 %v624_v48  ;;  %v318_v55 = vmul.f32 %v507_v20, %v507_v20  ;;  %v524_v58 = vunpack.c.h.bf16 %v624_v48  ;;  %v629_v29 = vld [vmem:[%s690_s12 + $0x68] sm:$0xff]  }
  0x1d   : > { %v241_v14 = vadd.f32 %v499_v10, %v240_v11  ;;  %v319_v60 = vmul.f32 %v508_v23, %v508_v23  ;;  %v527_v62 = vunpack.c.l.bf16 %v625_v57  ;;  %v320_v0 = vmul.f32 %v511_v27, %v511_v27  ;;  %v627_v11 = vld [vmem:[%s690_s12 + $0x58] sm:$0xff]  }
  0x1e   : > { %v376_v43 = vadd.f32 %v375_v38, %v313_v33  ;;  %v528_v3 = vunpack.c.h.bf16 %v625_v57  ;;  %v321_v5 = vmul.f32 %v512_v31, %v512_v31  ;;  %v531_v7 = vunpack.c.l.bf16 %v626_v2  ;;  %v630_v38 = vld [vmem:[%s690_s12 + $0x70] sm:$0xff]  }
  0x1f   : > { %v242_v16 = vadd.f32 %v500_v13, %v241_v14  ;;  %v322_v9 = vmul.f32 %v515_v35, %v515_v35  ;;  %v532_v12 = vunpack.c.h.bf16 %v626_v2  ;;  %v323_v14 = vmul.f32 %v516_v40, %v516_v40 }
  0x20   : > { %v377_v47 = vadd.f32 %v376_v43, %v314_v37  ;;  %v543_v34 = vunpack.c.l.bf16 %v629_v29  ;;  %v544_v39 = vunpack.c.h.bf16 %v629_v29  ;;  %v547_v43 = vunpack.c.l.bf16 %v630_v38 }
  0x21   : > { %v243_v19 = vadd.f32 %v503_v15, %v242_v16  ;;  %v535_v16 = vunpack.c.l.bf16 %v627_v11  ;;  %v548_v48 = vunpack.c.h.bf16 %v630_v38 }
  0x22   : > { %v378_v52 = vadd.f32 %v377_v47, %v315_v42  ;;  %v631_v47 = vld [vmem:[%s690_s12 + $0x78] sm:$0xff]  }
  0x23   : > { %v244_v21 = vadd.f32 %v504_v18, %v243_v19  ;;  %v324_v18 = vmul.f32 %v519_v44, %v519_v44  ;;  %v552_v57 = vunpack.c.h.bf16 %v631_v47 }
  0x24   : > { %v379_v56 = vadd.f32 %v378_v52, %v316_v46  ;;  %v551_v52 = vunpack.c.l.bf16 %v631_v47 }
  0x25   : > { %v245_v24 = vadd.f32 %v507_v20, %v244_v21  ;;  %v628_v20 = vld [vmem:[%s690_s12 + $0x60] sm:$0xff]   ;;  %v536_v21 = vunpack.c.h.bf16 %v627_v11 }
  0x26   : > { %v380_v61 = vadd.f32 %v379_v56, %v317_v51  ;;  %v539_v25 = vunpack.c.l.bf16 %v628_v20  ;;  %v540_v30 = vunpack.c.h.bf16 %v628_v20  ;;  %v632_v56 = vld [vmem:[%s690_s12 + $0x80] sm:$0xff]  }
  0x27   : > { %v246_v28 = vadd.f32 %v508_v23, %v245_v24  ;;  %v325_v23 = vmul.f32 %v520_v49, %v520_v49  ;;  %v556_v2 = vunpack.c.h.bf16 %v632_v56 }
  0x28   : > { %v381_v1 = vadd.f32 %v380_v61, %v318_v55  ;;  %v555_v61 = vunpack.c.l.bf16 %v632_v56 }
  0x29   : > { %v247_v32 = vadd.f32 %v511_v27, %v246_v28  ;;  %v326_v27 = vmul.f32 %v523_v53, %v523_v53 }
  0x2a   : > { %v382_v6 = vadd.f32 %v381_v1, %v319_v60  ;;  %v633_v1 = vld [vmem:[%s690_s12 + $0x88] sm:$0xff]  }
  0x2b   : > { %v248_v36 = vadd.f32 %v512_v31, %v247_v32  ;;  %v327_v32 = vmul.f32 %v524_v58, %v524_v58  ;;  %v560_v11 = vunpack.c.h.bf16 %v633_v1 }
  0x2c   : > { %v383_v10 = vadd.f32 %v382_v6, %v320_v0  ;;  %v559_v6 = vunpack.c.l.bf16 %v633_v1 }
  0x2d   : > { %v249_v41 = vadd.f32 %v515_v35, %v248_v36  ;;  %v328_v36 = vmul.f32 %v527_v62, %v527_v62 }
  0x2e   : > { %v384_v15 = vadd.f32 %v383_v10, %v321_v5  ;;  %v634_v10 = vld [vmem:[%s690_s12 + $0x90] sm:$0xff]  }
  0x2f   : > { %v250_v45 = vadd.f32 %v516_v40, %v249_v41  ;;  %v329_v41 = vmul.f32 %v528_v3, %v528_v3  ;;  %v564_v20 = vunpack.c.h.bf16 %v634_v10 }
  0x30   : > { %v385_v19 = vadd.f32 %v384_v15, %v322_v9  ;;  %v563_v15 = vunpack.c.l.bf16 %v634_v10 }
  0x31   : > { %v251_v50 = vadd.f32 %v519_v44, %v250_v45  ;;  %v330_v45 = vmul.f32 %v531_v7, %v531_v7 }
  0x32   : > { %v386_v24 = vadd.f32 %v385_v19, %v323_v14  ;;  %v635_v19 = vld [vmem:[%s690_s12 + $0x98] sm:$0xff]  }
  0x33   : > { %v252_v54 = vadd.f32 %v520_v49, %v251_v50  ;;  %v331_v50 = vmul.f32 %v532_v12, %v532_v12  ;;  %v568_v29 = vunpack.c.h.bf16 %v635_v19 }
  0x34   : > { %v387_v28 = vadd.f32 %v386_v24, %v324_v18  ;;  %v567_v24 = vunpack.c.l.bf16 %v635_v19 }
  0x35   : > { %v253_v59 = vadd.f32 %v523_v53, %v252_v54  ;;  %v332_v54 = vmul.f32 %v535_v16, %v535_v16 }
  0x36   : > { %v388_v33 = vadd.f32 %v387_v28, %v325_v23  ;;  %v636_v28 = vld [vmem:[%s690_s12 + $0xa0] sm:$0xff]  }
  0x37   : > { %v254_v63 = vadd.f32 %v524_v58, %v253_v59  ;;  %v333_v59 = vmul.f32 %v536_v21, %v536_v21  ;;  %v572_v38 = vunpack.c.h.bf16 %v636_v28 }
  0x38   : > { %v389_v37 = vadd.f32 %v388_v33, %v326_v27  ;;  %v571_v33 = vunpack.c.l.bf16 %v636_v28 }
  0x39   : > { %v255_v4 = vadd.f32 %v527_v62, %v254_v63  ;;  %v334_v63 = vmul.f32 %v539_v25, %v539_v25 }
  0x3a   : > { %v390_v42 = vadd.f32 %v389_v37, %v327_v32  ;;  %v637_v37 = vld [vmem:[%s690_s12 + $0xa8] sm:$0xff]  }
  0x3b   : > { %v256_v8 = vadd.f32 %v528_v3, %v255_v4  ;;  %v335_v4 = vmul.f32 %v540_v30, %v540_v30  ;;  %v576_v47 = vunpack.c.h.bf16 %v637_v37 }
  0x3c   : > { %v391_v46 = vadd.f32 %v390_v42, %v328_v36  ;;  %v575_v42 = vunpack.c.l.bf16 %v637_v37 }
  0x3d   : > { %v257_v13 = vadd.f32 %v531_v7, %v256_v8  ;;  %v336_v8 = vmul.f32 %v543_v34, %v543_v34 }
  0x3e   : > { %v392_v51 = vadd.f32 %v391_v46, %v329_v41  ;;  %v638_v46 = vld [vmem:[%s690_s12 + $0xb0] sm:$0xff]  }
  0x3f   : > { %v258_v17 = vadd.f32 %v532_v12, %v257_v13  ;;  %v337_v13 = vmul.f32 %v544_v39, %v544_v39  ;;  %v580_v56 = vunpack.c.h.bf16 %v638_v46 }
  0x40   : > { %v393_v55 = vadd.f32 %v392_v51, %v330_v45  ;;  %v579_v51 = vunpack.c.l.bf16 %v638_v46 }
  0x41   : > { %v259_v22 = vadd.f32 %v535_v16, %v258_v17  ;;  %v338_v17 = vmul.f32 %v547_v43, %v547_v43 }
  0x42   : > { %v394_v60 = vadd.f32 %v393_v55, %v331_v50  ;;  %v639_v55 = vld [vmem:[%s690_s12 + $0xb8] sm:$0xff]  }
  0x43   : > { %v260_v26 = vadd.f32 %v536_v21, %v259_v22  ;;  %v339_v22 = vmul.f32 %v548_v48, %v548_v48  ;;  %v584_v1 = vunpack.c.h.bf16 %v639_v55 }
  0x44   : > { %v395_v0 = vadd.f32 %v394_v60, %v332_v54  ;;  %v583_v60 = vunpack.c.l.bf16 %v639_v55 }
  0x45   : > { %v261_v31 = vadd.f32 %v539_v25, %v260_v26  ;;  %v340_v26 = vmul.f32 %v551_v52, %v551_v52 }
  0x46   : > { %v396_v5 = vadd.f32 %v395_v0, %v333_v59  ;;  %v640_v0 = vld [vmem:[%s690_s12 + $0xc0] sm:$0xff]  }
  0x47   : > { %v262_v35 = vadd.f32 %v540_v30, %v261_v31  ;;  %v341_v31 = vmul.f32 %v552_v57, %v552_v57  ;;  %v588_v10 = vunpack.c.h.bf16 %v640_v0 }
  0x48   : > { %v397_v9 = vadd.f32 %v396_v5, %v334_v63  ;;  %v587_v5 = vunpack.c.l.bf16 %v640_v0 }
  0x49   : > { %v263_v40 = vadd.f32 %v543_v34, %v262_v35  ;;  %v342_v35 = vmul.f32 %v555_v61, %v555_v61 }
  0x4a   : > { %v398_v14 = vadd.f32 %v397_v9, %v335_v4  ;;  %v641_v9 = vld [vmem:[%s690_s12 + $0xc8] sm:$0xff]  }
  0x4b   : > { %v264_v44 = vadd.f32 %v544_v39, %v263_v40  ;;  %v343_v40 = vmul.f32 %v556_v2, %v556_v2  ;;  %v592_v19 = vunpack.c.h.bf16 %v641_v9 }
  0x4c   : > { %v399_v18 = vadd.f32 %v398_v14, %v336_v8  ;;  %v591_v14 = vunpack.c.l.bf16 %v641_v9 }
  0x4d   : > { %v265_v49 = vadd.f32 %v547_v43, %v264_v44  ;;  %v344_v44 = vmul.f32 %v559_v6, %v559_v6 }
  0x4e   : > { %v400_v23 = vadd.f32 %v399_v18, %v337_v13  ;;  %v642_v18 = vld [vmem:[%s690_s12 + $0xd0] sm:$0xff]  }
  0x4f   : > { %v266_v53 = vadd.f32 %v548_v48, %v265_v49  ;;  %v345_v49 = vmul.f32 %v560_v11, %v560_v11  ;;  %v596_v28 = vunpack.c.h.bf16 %v642_v18 }
  0x50   : > { %v401_v27 = vadd.f32 %v400_v23, %v338_v17  ;;  %v595_v23 = vunpack.c.l.bf16 %v642_v18 }
  0x51   : > { %v267_v58 = vadd.f32 %v551_v52, %v266_v53  ;;  %v346_v53 = vmul.f32 %v563_v15, %v563_v15 }
  0x52   : > { %v402_v32 = vadd.f32 %v401_v27, %v339_v22  ;;  %v643_v27 = vld [vmem:[%s690_s12 + $0xd8] sm:$0xff]  }
  0x53   : > { %v268_v62 = vadd.f32 %v552_v57, %v267_v58  ;;  %v347_v58 = vmul.f32 %v564_v20, %v564_v20  ;;  %v600_v37 = vunpack.c.h.bf16 %v643_v27 }
  0x54   : > { %v403_v36 = vadd.f32 %v402_v32, %v340_v26  ;;  %v599_v32 = vunpack.c.l.bf16 %v643_v27 }
  0x55   : > { %v269_v3 = vadd.f32 %v555_v61, %v268_v62  ;;  %v348_v62 = vmul.f32 %v567_v24, %v567_v24 }
  0x56   : > { %v404_v41 = vadd.f32 %v403_v36, %v341_v31  ;;  %v644_v36 = vld [vmem:[%s690_s12 + $0xe0] sm:$0xff]  }
  0x57   : > { %v270_v7 = vadd.f32 %v556_v2, %v269_v3  ;;  %v349_v3 = vmul.f32 %v568_v29, %v568_v29  ;;  %v604_v46 = vunpack.c.h.bf16 %v644_v36 }
  0x58   : > { %v405_v45 = vadd.f32 %v404_v41, %v342_v35  ;;  %v603_v41 = vunpack.c.l.bf16 %v644_v36 }
  0x59   : > { %v271_v12 = vadd.f32 %v559_v6, %v270_v7  ;;  %v350_v7 = vmul.f32 %v571_v33, %v571_v33 }
  0x5a   : > { %v406_v50 = vadd.f32 %v405_v45, %v343_v40  ;;  %v645_v45 = vld [vmem:[%s690_s12 + $0xe8] sm:$0xff]  }
  0x5b   : > { %v272_v16 = vadd.f32 %v560_v11, %v271_v12  ;;  %v351_v12 = vmul.f32 %v572_v38, %v572_v38  ;;  %v608_v55 = vunpack.c.h.bf16 %v645_v45 }
  0x5c   : > { %v407_v54 = vadd.f32 %v406_v50, %v344_v44  ;;  %v607_v50 = vunpack.c.l.bf16 %v645_v45 }
  0x5d   : > { %v273_v21 = vadd.f32 %v563_v15, %v272_v16  ;;  %v352_v16 = vmul.f32 %v575_v42, %v575_v42 }
  0x5e   : > { %v408_v59 = vadd.f32 %v407_v54, %v345_v49  ;;  %v646_v54 = vld [vmem:[%s690_s12 + $0xf0] sm:$0xff]  }
  0x5f   : > { %v274_v25 = vadd.f32 %v564_v20, %v273_v21  ;;  %v353_v21 = vmul.f32 %v576_v47, %v576_v47  ;;  %v612_v0 = vunpack.c.h.bf16 %v646_v54 }
  0x60   : > { %v409_v63 = vadd.f32 %v408_v59, %v346_v53  ;;  %v611_v59 = vunpack.c.l.bf16 %v646_v54 }
  0x61   : > { %v275_v30 = vadd.f32 %v567_v24, %v274_v25  ;;  %v354_v25 = vmul.f32 %v579_v51, %v579_v51 }
  0x62   : > { %v410_v4 = vadd.f32 %v409_v63, %v347_v58  ;;  %v647_v63 = vld [vmem:[%s690_s12 + $0xf8] sm:$0xff]  }
  0x63   : > { %v276_v34 = vadd.f32 %v568_v29, %v275_v30  ;;  %v355_v30 = vmul.f32 %v580_v56, %v580_v56 }
  0x64   : > { %v411_v8 = vadd.f32 %v410_v4, %v348_v62  ;;  %v615_v4 = vunpack.c.l.bf16 %v647_v63 }
  0x65   : > { %v277_v39 = vadd.f32 %v571_v33, %v276_v34  ;;  %v356_v34 = vmul.f32 %v583_v60, %v583_v60 }
  0x66   : > { %v412_v13 = vadd.f32 %v411_v8, %v349_v3  ;;  %v616_v8 = vunpack.c.h.bf16 %v647_v63 }
  0x67   : > { %v278_v43 = vadd.f32 %v572_v38, %v277_v39  ;;  %v357_v39 = vmul.f32 %v584_v1, %v584_v1 }
  0x68   : > { %v413_v17 = vadd.f32 %v412_v13, %v350_v7  ;;  %v366_v13 = vmul.f32 %v603_v41, %v603_v41 }
  0x69   : > { %v279_v48 = vadd.f32 %v575_v42, %v278_v43  ;;  %v358_v43 = vmul.f32 %v587_v5, %v587_v5 }
  0x6a   : > { %v414_v22 = vadd.f32 %v413_v17, %v351_v12 }
  0x6b   : > { %v280_v52 = vadd.f32 %v576_v47, %v279_v48  ;;  %v359_v48 = vmul.f32 %v588_v10, %v588_v10 }
  0x6c   : > { %v415_v26 = vadd.f32 %v414_v22, %v352_v16  ;;  %v367_v16 = vmul.f32 %v604_v46, %v604_v46  ;;  %v369_v22 = vmul.f32 %v608_v55, %v608_v55 }
  0x6d   : > { %v281_v57 = vadd.f32 %v579_v51, %v280_v52  ;;  %v360_v52 = vmul.f32 %v591_v14, %v591_v14 }
  0x6e   : > { %v416_v31 = vadd.f32 %v415_v26, %v353_v21 }
  0x6f   : > { %v282_v61 = vadd.f32 %v580_v56, %v281_v57  ;;  %v361_v57 = vmul.f32 %v592_v19, %v592_v19 }
  0x70   : > { %v417_v35 = vadd.f32 %v416_v31, %v354_v25  ;;  %v370_v25 = vmul.f32 %v611_v59, %v611_v59 }
  0x71   : > { %v283_v2 = vadd.f32 %v583_v60, %v282_v61  ;;  %v362_v61 = vmul.f32 %v595_v23, %v595_v23 }
  0x72   : > { %v418_v40 = vadd.f32 %v417_v35, %v355_v30  ;;  %v237_v30 = vld [vmem:[#allocation2] sm:$0x1]  ;;  %v373_v35 = vmul.f32 %v616_v8, %v616_v8 }
  0x73   : > { %v284_v6 = vadd.f32 %v584_v1, %v283_v2  ;;  %v363_v2 = vmul.f32 %v596_v28, %v596_v28 }
  0x74   : > { %v419_v44 = vadd.f32 %v418_v40, %v356_v34 }
  0x75   : > { %v285_v11 = vadd.f32 %v587_v5, %v284_v6  ;;  %v364_v6 = vmul.f32 %v599_v32, %v599_v32 }
  0x76   : > { %v420_v49 = vadd.f32 %v419_v44, %v357_v39  ;;  %v309_v44 = vld [vmem:[#allocation2 + $0x1] sm:$0x1] }
  0x77   : > { %v286_v15 = vadd.f32 %v588_v10, %v285_v11  ;;  %v365_v10 = vmul.f32 %v600_v37, %v600_v37 }
  0x78   : > { %v421_v53 = vadd.f32 %v420_v49, %v358_v43 }
  0x79   : > { %v287_v20 = vadd.f32 %v591_v14, %v286_v15 }
  0x7a   : > { %v422_v58 = vadd.f32 %v421_v53, %v359_v48 }
  0x7b   : > { %v288_v24 = vadd.f32 %v592_v19, %v287_v20  ;;  %v368_v19 = vmul.f32 %v607_v50, %v607_v50 }
  0x7c   : > { %v423_v62 = vadd.f32 %v422_v58, %v360_v52 }
  0x7d   : > { %v289_v29 = vadd.f32 %v595_v23, %v288_v24 }
  0x7e   : > { %v424_v3 = vadd.f32 %v423_v62, %v361_v57 }
  0x7f   : > { %v290_v33 = vadd.f32 %v596_v28, %v289_v29  ;;  %v371_v28 = vmul.f32 %v612_v0, %v612_v0 }
  0x80   : > { %v425_v7 = vadd.f32 %v424_v3, %v362_v61 }
  0x81   : > { %v291_v38 = vadd.f32 %v599_v32, %v290_v33  ;;  %v372_v32 = vmul.f32 %v615_v4, %v615_v4 }
  0x82   : > { %v426_v11 = vadd.f32 %v425_v7, %v363_v2 }
  0x83   : > { %v292_v42 = vadd.f32 %v600_v37, %v291_v38 }
  0x84   : > { %v427_v14 = vadd.f32 %v426_v11, %v364_v6 }
  0x85   : > { %v293_v47 = vadd.f32 %v603_v41, %v292_v42 }
  0x86   : > { %v428_v17 = vadd.f32 %v427_v14, %v365_v10 }
  0x87   : > { %v294_v51 = vadd.f32 %v604_v46, %v293_v47 }
  0x88   : > { %v429_v20 = vadd.f32 %v428_v17, %v366_v13 }
  0x89   : > { %v295_v56 = vadd.f32 %v607_v50, %v294_v51 }
  0x8a   : > { %v430_v23 = vadd.f32 %v429_v20, %v367_v16 }
  0x8b   : > { %v296_v60 = vadd.f32 %v608_v55, %v295_v56 }
  0x8c   : > { %v431_v26 = vadd.f32 %v430_v23, %v368_v19 }
  0x8d   : > { %v297_v1 = vadd.f32 %v611_v59, %v296_v60 }
  0x8e   : > { %v432_v29 = vadd.f32 %v431_v26, %v369_v22 }
  0x8f   : > { %v298_v5 = vadd.f32 %v612_v0, %v297_v1 }
  0x90   : > { %v433_v33 = vadd.f32 %v432_v29, %v370_v25 }
  0x91   : > { %v299_v9 = vadd.f32 %v615_v4, %v298_v5 }
  0x92   : > { %v434_v36 = vadd.f32 %v433_v33, %v371_v28 }
  0x93   : > { %v300_v12 = vadd.f32 %v616_v8, %v299_v9 }
  0x94   : > { %v435_v37 = vadd.f32 %v434_v36, %v372_v32 }
  0x95   : > { %v301_v15 = vrot.slane %v300_v12, 4 }
  0x96   : > { %v436_v38 = vadd.f32 %v435_v37, %v373_v35 }
  0x97   : > { %v302_v18 = vadd.f32 %v301_v15, %v300_v12 }
  0x98   : > { %v437_v39 = vrot.slane %v436_v38, 4 }
  0x99   : > { %v303_v21 = vrot.slane %v302_v18, 2 }
  0x9a   : > { %v438_v40 = vadd.f32 %v437_v39, %v436_v38 }
  0x9b   : > { %v304_v24 = vadd.f32 %v303_v21, %v302_v18 }
  0x9c   : > { %v439_v41 = vrot.slane %v438_v40, 2 }
  0x9d   : > { %v305_v27 = vrot.slane %v304_v24, 1 }
  0x9e   : > { %v440_v42 = vadd.f32 %v439_v41, %v438_v40 }
  0x9f   : > { %v306_v31 = vadd.f32 %v305_v27, %v304_v24 }
  0xa0   : > { %v441_v43 = vrot.slane %v440_v42, 1  ;;  %448 = sbr.rel (%p486_p5) target bundleno = 175 (0xaf), region = 32 }
  0xa1   : > { %v307_v34 = vadd.f32 %v306_v31, %v237_v30 }
  0xa2   : > { %v442_v45 = vadd.f32 %v441_v43, %v440_v42 }
  0xa3   : > { %308 = vst [vmem:[#allocation2] sm:$0x1] %v307_v34 }
  0xa4   : > { %v443_v46 = vadd.f32 %v442_v45, %v309_v44 }
  0xa6   : > { %444 = vst [vmem:[#allocation2 + $0x1] sm:$0x1] %v443_v46 }
  0xad   : > { %v449_v47 = vld [vmem:[#allocation2] sm:$0xff] }
  0xae   : > { %450 = vst [vmem:[%s733_s1] sm:$0xff] %v449_v47 }
  0xaf PF: > { %s11_s6 = sadd.s32 1, %s663_s6  }
  0xb0   : > { %p8_p6 = scmp.ge.s32.totalorder %s11_s6, 6  }
  0xb2   :  { %10 = sbr.rel (!%p8_p6) target bundleno = 1 (0x1), region = 58 }

// kernel: generator_forward.18
= control target key start
LH: loop header
LB: loop body
LE: loop exit
PB: predicated region body
PF: predicated region fallthrough
CT: control target
= control target key end

     0   :  { %s1934_s15 = smov 0   ;;  %s1936_s16 = smov 0   ;;  %s2242_s0 = inlined_call_operand.vmem [shape: bf16[2048,128], index: 0, kind: input, shape index: {}]   ;;  %s2243_s1 = inlined_call_operand.vmem [shape: bf16[128,128], index: 1, kind: input, shape index: {}]   ;;  %s2244_s2 = inlined_call_operand.vmem [shape: f32[1,128], index: 2, kind: input, shape index: {}]   ;;  %s2245_s3 = inlined_call_operand.vmem [shape: f32[1,128], index: 3, kind: input, shape index: {}]   ;;  %s2246_s4 = inlined_call_operand.vmem [shape: f32[2048,128], index: 4, kind: output, shape index: {}]  }
   0x1   :  { %s1938_s17 = smov 0  }
   0x2 LB: > { %s33_s18 = sadd.s32 1, %s1903_s16  ;;  %p1541_p0 = scmp.ge.s32.totalorder %s1907_s17, 1  ;;  %s1907_s17 = sphi %s1938_s17, %s14_s17   ;;  %s1903_s16 = sphi %s1936_s16, %s2248_s16   ;;  %s1899_s15 = sphi %s1934_s15, %s2247_s15  }
   0x3   : > { %p35_p1 = scmp.ge.s32.totalorder %s33_s18, 4  ;;  %p221_p2 = scmp.lt.s32.totalorder %s1907_s17, 5 }
   0x5   : > { %s2250_s18 = smov (%p35_p1, %s33_s18), 0  ;;  %p222_p3 = pnand %p1541_p0, %p221_p2 }
   0x6   : > { %v1877_v0 = vld [vmem:[%s2243_s1] sm:$0xff] (!%p222_p3)   ;;  %s1542_s21 = sshll.u32 (!%p222_p3), %s1899_s15, 6  ;;  %v1878_v1 = vld [vmem:[%s2243_s1 + $0x8] sm:$0xff] (!%p222_p3)   ;;  %v1879_v2 = vld [vmem:[%s2243_s1 + $0x10] sm:$0xff] (!%p222_p3)  }
   0x7   : > { %225 = sbr.rel (%p222_p3) target bundleno = 312 (0x138), region = 36  ;;  %p268_p4 = scmp.lt.s32.totalorder (!%p222_p3), %s1542_s21, 255  ;;  %1757 = vmatprep.subr.bf16.mxu0 (!%p222_p3), %v1877_v0  ;;  %1837 = vmatprep.subr.bf16.mxu1 (!%p222_p3), %v1877_v0  ;;  %v1880_v3 = vld [vmem:[%s2243_s1 + $0x18] sm:$0xff] (!%p222_p3)   ;;  %v1976_v5 = vld [vmem:[%s2244_s2] ss:$0 sm:$0xff] (!%p222_p3)  ;;  %v1882_v39 = vld [vmem:[%s2243_s1 + $0x28] sm:$0xff] (!%p222_p3)  }
   0x8   : > { %1758 = vmatpush3.bf16.msra.mxu0 (!%p222_p3), %v1877_v0  ;;  %1845 = vmatpush3.bf16.msra.mxu1 (!%p222_p3), %v1877_v0  ;;  %v1984_v11 = vld [vmem:[%s2245_s3] ss:$0 sm:$0xff] (!%p222_p3)  ;;  %v1883_v58 = vld [vmem:[%s2243_s1 + $0x30] sm:$0xff] (!%p222_p3)  }
   0x9   : > { %1759 = vmatprep.subr.bf16.mxu0 (!%p222_p3), %v1878_v1  ;;  %1838 = vmatprep.subr.bf16.mxu1 (!%p222_p3), %v1878_v1  ;;  %v1881_v21 = vld [vmem:[%s2243_s1 + $0x20] sm:$0xff] (!%p222_p3)  }
   0xc   : > { %1760 = vmatpush3.bf16.msra.mxu0 (!%p222_p3), %v1878_v1  ;;  %1846 = vmatpush3.bf16.msra.mxu1 (!%p222_p3), %v1878_v1 }
   0xd   : > { %1761 = vmatprep.subr.bf16.mxu0 (!%p222_p3), %v1879_v2  ;;  %1839 = vmatprep.subr.bf16.mxu1 (!%p222_p3), %v1879_v2 }
   0xe   : > { %s2252_s21 = smov (!%p268_p4, %s1542_s21), 255 }
   0xf   : > { %s1543_s26 = sshll.u32 %s2252_s21, 2  ;;  %s1545_s22 = sshll.u32 %s2252_s21, 3 }
  0x10   : > { %s1967_s29 = scalar_lea.vmem %s2242_s0, %s1543_s26  ;;  %1762 = vmatpush3.bf16.msra.mxu0 %v1879_v2  ;;  %1847 = vmatpush3.bf16.msra.mxu1 %v1879_v2  ;;  %s2167_s25 = scalar_lea.vmem %s2246_s4, %s1545_s22 }
  0x11   : > { %v1559_v4 = vld [vmem:[%s1967_s29] sm:$0xff]   ;;  %v1686_v9 = vld [vmem:[%s1967_s29 + $0x8] sm:$0xff]   ;;  %v1687_v16 = vld [vmem:[%s1967_s29 + $0x10] sm:$0xff]   ;;  %1763 = vmatprep.subr.bf16.mxu0 %v1880_v3  ;;  %1840 = vmatprep.subr.bf16.mxu1 %v1880_v3 }
  0x12   : > { %v1560_v6 = vunpack.c.l.bf16 %v1559_v4  ;;  %v1561_v7 = vunpack.c.h.bf16 %v1559_v4  ;;  %v1701_v8 = vld [vmem:[%s1967_s29 + $0x80] sm:$0xff]   ;;  %v1702_v10 = vld [vmem:[%s1967_s29 + $0x88] sm:$0xff]   ;;  %v1564_v14 = vunpack.c.l.bf16 %v1686_v9  ;;  %v1565_v15 = vunpack.c.h.bf16 %v1686_v9  ;;  %v1703_v38 = vld [vmem:[%s1967_s29 + $0x90] sm:$0xff]  }
  0x13   : > { %v1624_v12 = vunpack.c.l.bf16 %v1701_v8  ;;  %v1625_v13 = vunpack.c.h.bf16 %v1701_v8  ;;  %v1628_v19 = vunpack.c.l.bf16 %v1702_v10  ;;  %v1629_v20 = vunpack.c.h.bf16 %v1702_v10  ;;  %v1688_v44 = vld [vmem:[%s1967_s29 + $0x18] sm:$0xff]  }
  0x14   : > { %v504_v17 = vmul.f32 %v1560_v6, %v1976_v5  ;;  %v505_v18 = vmul.f32 %v1561_v7, %v1976_v5  ;;  %v506_v24 = vmul.f32 %v1564_v14, %v1976_v5  ;;  %v1568_v25 = vunpack.c.l.bf16 %v1687_v16  ;;  %1764 = vmatpush3.bf16.msra.mxu0 %v1880_v3  ;;  %1848 = vmatpush3.bf16.msra.mxu1 %v1880_v3  ;;  %v1704_v53 = vld [vmem:[%s1967_s29 + $0x98] sm:$0xff]   ;;  %v1689_v3 = vld [vmem:[%s1967_s29 + $0x20] sm:$0xff]  }
  0x15   : > { %v536_v22 = vmul.f32 %v1624_v12, %v1976_v5  ;;  %v537_v23 = vmul.f32 %v1625_v13, %v1976_v5  ;;  %v507_v28 = vmul.f32 %v1565_v15, %v1976_v5  ;;  %v538_v29 = vmul.f32 %v1628_v19, %v1976_v5  ;;  %1765 = vmatprep.subr.bf16.mxu0 %v1881_v21  ;;  %v1884_v14 = vld [vmem:[%s2243_s1 + $0x38] sm:$0xff]   ;;  %v1705_v19 = vld [vmem:[%s1967_s29 + $0xa0] sm:$0xff]  }
  0x16   : > { %v575_v26 = vadd.f32 %v1984_v11, %v504_v17  ;;  %v576_v27 = vadd.f32 %v1984_v11, %v505_v18  ;;  %v577_v32 = vadd.f32 %v1984_v11, %v506_v24  ;;  %v539_v33 = vmul.f32 %v1629_v20, %v1976_v5  ;;  %1841 = vmatprep.subr.bf16.mxu1 %v1881_v21 }
  0x17   : > { %v607_v30 = vadd.f32 %v1984_v11, %v536_v22  ;;  %v608_v31 = vadd.f32 %v1984_v11, %v537_v23  ;;  %v578_v36 = vadd.f32 %v1984_v11, %v507_v28  ;;  %v609_v37 = vadd.f32 %v1984_v11, %v538_v29  ;;  %v1690_v28 = vld [vmem:[%s1967_s29 + $0x28] sm:$0xff]  }
  0x18   : > { %v639_v34 = vmax.f32 %v575_v26, 0.0  ;;  %v640_v35 = vmax.f32 %v576_v27, 0.0  ;;  %v641_v42 = vmax.f32 %v577_v32, 0.0  ;;  %v610_v43 = vadd.f32 %v1984_v11, %v539_v33  ;;  %1766 = vmatpush3.bf16.msra.mxu0 %v1881_v21  ;;  %1849 = vmatpush3.bf16.msra.mxu1 %v1881_v21  ;;  %v1706_v33 = vld [vmem:[%s1967_s29 + $0xa8] sm:$0xff]  }
  0x19   : > { %v671_v40 = vmax.f32 %v607_v30, 0.0  ;;  %v672_v41 = vmax.f32 %v608_v31, 0.0  ;;  %v642_v46 = vmax.f32 %v578_v36, 0.0  ;;  %v673_v47 = vmax.f32 %v609_v37, 0.0  ;;  %1767 = vmatprep.subr.bf16.mxu0 %v1882_v39  ;;  %1842 = vmatprep.subr.bf16.mxu1 %v1882_v39 }
  0x1a   : > { %v703_v45 = vpack.c.bf16 %v640_v35, %v639_v34  ;;  %v1569_v48 = vunpack.c.h.bf16 %v1687_v16  ;;  %v674_v50 = vmax.f32 %v610_v43, 0.0  ;;  %v508_v51 = vmul.f32 %v1568_v25, %v1976_v5 }
  0x1b   : > { %v719_v49 = vpack.c.bf16 %v672_v41, %v671_v40  ;;  %v1632_v52 = vunpack.c.l.bf16 %v1703_v38  ;;  %v2013_v54 = vpack.c.bf16 %v642_v46, %v641_v42  ;;  %v1633_v56 = vunpack.c.h.bf16 %v1703_v38  ;;  %v1691_v42 = vld [vmem:[%s1967_s29 + $0x30] sm:$0xff]  }
  0x1c   : > { %v509_v55 = vmul.f32 %v1569_v48, %v1976_v5  ;;  %v1572_v57 = vunpack.c.l.bf16 %v1688_v44  ;;  %v2019_v59 = vpack.c.bf16 %v674_v50, %v673_v47  ;;  %v579_v60 = vadd.f32 %v1984_v11, %v508_v51  ;;  %1773 = vmatprep.mubr.bf16.mxu0 %v703_v45  ;;  %1768 = vmatpush3.bf16.msra.mxu0 %v1882_v39 }
  0x1d   : > { %v540_v61 = vmul.f32 %v1632_v52, %v1976_v5  ;;  %v1573_v62 = vunpack.c.h.bf16 %v1688_v44  ;;  %1805 = vmatprep.mubr.bf16.mxu1 %v719_v49  ;;  %v541_v0 = vmul.f32 %v1633_v56, %v1976_v5  ;;  %v1636_v2 = vunpack.c.l.bf16 %v1704_v53  ;;  %1850 = vmatpush3.bf16.msra.mxu1 %v1882_v39 }
  0x1e   : > { %v580_v63 = vadd.f32 %v1984_v11, %v509_v55  ;;  %v510_v1 = vmul.f32 %v1572_v57, %v1976_v5  ;;  %v643_v4 = vmax.f32 %v579_v60, 0.0  ;;  %v1637_v8 = vunpack.c.h.bf16 %v1704_v53  ;;  %1769 = vmatprep.subr.bf16.mxu0 %v1883_v58  ;;  %1843 = vmatprep.subr.bf16.mxu1 %v1883_v58 }
  0x1f   : > { %v611_v6 = vadd.f32 %v1984_v11, %v540_v61  ;;  %v511_v7 = vmul.f32 %v1573_v62, %v1976_v5  ;;  %v612_v10 = vadd.f32 %v1984_v11, %v541_v0  ;;  %v542_v13 = vmul.f32 %v1636_v2, %v1976_v5  ;;  %v1707_v61 = vld [vmem:[%s1967_s29 + $0xb0] sm:$0xff]   ;;  %v1692_v2 = vld [vmem:[%s1967_s29 + $0x38] sm:$0xff]  }
  0x20   : > { %v644_v9 = vmax.f32 %v580_v63, 0.0  ;;  %v581_v12 = vadd.f32 %v1984_v11, %v510_v1  ;;  %v543_v17 = vmul.f32 %v1637_v8, %v1976_v5  ;;  %v1576_v18 = vunpack.c.l.bf16 %v1689_v3  ;;  %1770 = vmatpush3.bf16.msra.mxu0 %v1883_v58 }
  0x21   : > { %v675_v15 = vmax.f32 %v611_v6, 0.0  ;;  %v582_v16 = vadd.f32 %v1984_v11, %v511_v7  ;;  %v676_v21 = vmax.f32 %v612_v10, 0.0  ;;  %v613_v23 = vadd.f32 %v1984_v11, %v542_v13  ;;  %1851 = vmatpush3.bf16.msra.mxu1 %v1883_v58  ;;  %1771 = vmatprep.subr.bf16.mxu0 %v1884_v14 }
  0x22   : > { %v705_v20 = vpack.c.bf16 %v644_v9, %v643_v4  ;;  %v645_v22 = vmax.f32 %v581_v12, 0.0  ;;  %v614_v25 = vadd.f32 %v1984_v11, %v543_v17  ;;  %v1577_v26 = vunpack.c.h.bf16 %v1689_v3  ;;  %1844 = vmatprep.subr.bf16.mxu1 %v1884_v14 }
  0x23   : > { %v646_v24 = vmax.f32 %v582_v16, 0.0  ;;  %v512_v27 = vmul.f32 %v1576_v18, %v1976_v5  ;;  %v721_v29 = vpack.c.bf16 %v676_v21, %v675_v15  ;;  %v677_v30 = vmax.f32 %v613_v23, 0.0  ;;  %v1708_v15 = vld [vmem:[%s1967_s29 + $0xb8] sm:$0xff]  }
  0x24   : > { %v1640_v31 = vunpack.c.l.bf16 %v1705_v19  ;;  %v1641_v32 = vunpack.c.h.bf16 %v1705_v19  ;;  %v678_v35 = vmax.f32 %v614_v25, 0.0  ;;  %v513_v36 = vmul.f32 %v1577_v26, %v1976_v5  ;;  %1772 = vmatpush3.bf16.msra.mxu0 %v1884_v14 }
  0x25   : > { %v2043_v34 = vpack.c.bf16 %v646_v24, %v645_v22  ;;  %v583_v37 = vadd.f32 %v1984_v11, %v512_v27  ;;  %v1580_v40 = vunpack.c.l.bf16 %v1690_v28  ;;  %v1581_v41 = vunpack.c.h.bf16 %v1690_v28  ;;  %1852 = vmatpush3.bf16.msra.mxu1 %v1884_v14 }
  0x26   : > { %v544_v38 = vmul.f32 %v1640_v31, %v1976_v5  ;;  %v545_v39 = vmul.f32 %v1641_v32, %v1976_v5  ;;  %v722_v43 = vpack.c.bf16 %v678_v35, %v677_v30  ;;  %v584_v44 = vadd.f32 %v1984_v11, %v513_v36 }
  0x27   : > { %v647_v45 = vmax.f32 %v583_v37, 0.0  ;;  %v1644_v46 = vunpack.c.l.bf16 %v1706_v33  ;;  %v514_v49 = vmul.f32 %v1580_v40, %v1976_v5  ;;  %v1645_v50 = vunpack.c.h.bf16 %v1706_v33  ;;  %1774 = vmatmul.mubr.bf16.vlgmr.msra.gmra.mrb[0].mxu0 %v2013_v54  ;;  %v1709_v33 = vld [vmem:[%s1967_s29 + $0xc0] sm:$0xff]  }
  0x28   : > { %v615_v47 = vadd.f32 %v1984_v11, %v544_v38  ;;  %v616_v48 = vadd.f32 %v1984_v11, %v545_v39  ;;  %v648_v51 = vmax.f32 %v584_v44, 0.0  ;;  %v515_v52 = vmul.f32 %v1581_v41, %v1976_v5  ;;  %1806 = vmatmul.mubr.bf16.vlgmr.msra.gmra.mrb[0].mxu1 %v2019_v59  ;;  %1777 = vmatprep.mubr.bf16.mxu0 %v705_v20  ;;  %v1693_v20 = vld [vmem:[%s1967_s29 + $0x40] sm:$0xff]  }
  0x29   : > { %v546_v53 = vmul.f32 %v1644_v46, %v1976_v5  ;;  %v1584_v55 = vunpack.c.l.bf16 %v1691_v42  ;;  %v585_v58 = vadd.f32 %v1984_v11, %v514_v49  ;;  %v547_v60 = vmul.f32 %v1645_v50, %v1976_v5  ;;  %1809 = vmatprep.mubr.bf16.mxu1 %v721_v29  ;;  %v1694_v46 = vld [vmem:[%s1967_s29 + $0x48] sm:$0xff]  }
  0x2a   : > { %v679_v56 = vmax.f32 %v615_v47, 0.0  ;;  %v680_v57 = vmax.f32 %v616_v48, 0.0  ;;  %v707_v62 = vpack.c.bf16 %v648_v51, %v647_v45  ;;  %v586_v63 = vadd.f32 %v1984_v11, %v515_v52  ;;  %v1710_v51 = vld [vmem:[%s1967_s29 + $0xc8] sm:$0xff]  }
  0x2b   : > { %v617_v0 = vadd.f32 %v1984_v11, %v546_v53  ;;  %v1585_v1 = vunpack.c.h.bf16 %v1691_v42  ;;  %v649_v4 = vmax.f32 %v585_v58, 0.0  ;;  %v618_v6 = vadd.f32 %v1984_v11, %v547_v60 }
  0x2c   : > { %v723_v3 = vpack.c.bf16 %v680_v57, %v679_v56  ;;  %v516_v7 = vmul.f32 %v1584_v55, %v1976_v5  ;;  %v650_v54 = vmax.f32 %v586_v63, 0.0  ;;  %v1648_v9 = vunpack.c.l.bf16 %v1707_v61 }
  0x2d   : > { %v681_v8 = vmax.f32 %v617_v0, 0.0  ;;  %v517_v59 = vmul.f32 %v1585_v1, %v1976_v5  ;;  %v682_v10 = vmax.f32 %v618_v6, 0.0  ;;  %v1649_v13 = vunpack.c.h.bf16 %v1707_v61 }
  0x2e   : > { %v587_v12 = vadd.f32 %v1984_v11, %v516_v7  ;;  %v1588_v14 = vunpack.c.l.bf16 %v1692_v2  ;;  %v708_v16 = vpack.c.bf16 %v650_v54, %v649_v4  ;;  %v548_v18 = vmul.f32 %v1648_v9, %v1976_v5 }
  0x2f   : > { %v588_v17 = vadd.f32 %v1984_v11, %v517_v59  ;;  %v1589_v19 = vunpack.c.h.bf16 %v1692_v2  ;;  %v724_v21 = vpack.c.bf16 %v682_v10, %v681_v8  ;;  %v549_v23 = vmul.f32 %v1649_v13, %v1976_v5  ;;  %1778 = vmatmul.mubr.bf16.gmra.mrb[4].mxu0 %v2043_v34  ;;  %v1695_v2 = vld [vmem:[%s1967_s29 + $0x50] sm:$0xff]  }
  0x30   : > { %v651_v22 = vmax.f32 %v587_v12, 0.0  ;;  %v518_v24 = vmul.f32 %v1588_v14, %v1976_v5  ;;  %v619_v26 = vadd.f32 %v1984_v11, %v548_v18  ;;  %v1652_v28 = vunpack.c.l.bf16 %v1708_v15  ;;  %1810 = vmatmul.mubr.bf16.gmra.mrb[4].mxu1 %v722_v43  ;;  %1781 = vmatprep.mubr.bf16.mxu0 %v707_v62  ;;  %v1711_v10 = vld [vmem:[%s1967_s29 + $0xd0] sm:$0xff]  }
  0x31   : > { %v652_v25 = vmax.f32 %v588_v17, 0.0  ;;  %v519_v27 = vmul.f32 %v1589_v19, %v1976_v5  ;;  %v620_v29 = vadd.f32 %v1984_v11, %v549_v23  ;;  %v1653_v31 = vunpack.c.h.bf16 %v1708_v15  ;;  %1813 = vmatprep.mubr.bf16.mxu1 %v723_v3 }
  0x32   : > { %v589_v30 = vadd.f32 %v1984_v11, %v518_v24  ;;  %v1592_v32 = vunpack.c.l.bf16 %v1693_v20  ;;  %v683_v36 = vmax.f32 %v619_v26, 0.0  ;;  %v550_v38 = vmul.f32 %v1652_v28, %v1976_v5 }
  0x33   : > { %v709_v35 = vpack.c.bf16 %v652_v25, %v651_v22  ;;  %v590_v37 = vadd.f32 %v1984_v11, %v519_v27  ;;  %v684_v39 = vmax.f32 %v620_v29, 0.0  ;;  %v551_v41 = vmul.f32 %v1653_v31, %v1976_v5 }
  0x34   : > { %v653_v40 = vmax.f32 %v589_v30, 0.0  ;;  %v1593_v42 = vunpack.c.h.bf16 %v1693_v20  ;;  %v621_v45 = vadd.f32 %v1984_v11, %v550_v38  ;;  %v520_v34 = vmul.f32 %v1592_v32, %v1976_v5  ;;  %v1696_v20 = vld [vmem:[%s1967_s29 + $0x58] sm:$0xff]  }
  0x35   : > { %v654_v44 = vmax.f32 %v590_v37, 0.0  ;;  %v1656_v43 = vunpack.c.l.bf16 %v1709_v33  ;;  %v725_v47 = vpack.c.bf16 %v684_v39, %v683_v36  ;;  %v622_v48 = vadd.f32 %v1984_v11, %v551_v41 }
  0x36   : > { %v521_v49 = vmul.f32 %v1593_v42, %v1976_v5  ;;  %v1657_v50 = vunpack.c.h.bf16 %v1709_v33  ;;  %v685_v53 = vmax.f32 %v621_v45, 0.0  ;;  %v591_v55 = vadd.f32 %v1984_v11, %v520_v34  ;;  %v1712_v33 = vld [vmem:[%s1967_s29 + $0xd8] sm:$0xff]  }
  0x37   : > { %v710_v52 = vpack.c.bf16 %v654_v44, %v653_v40  ;;  %v552_v56 = vmul.f32 %v1656_v43, %v1976_v5  ;;  %v686_v57 = vmax.f32 %v622_v48, 0.0  ;;  %v1596_v61 = vunpack.c.l.bf16 %v1694_v46  ;;  %1782 = vmatmul.mubr.bf16.gmra.mrb[8].mxu0 %v708_v16  ;;  %v1697_v44 = vld [vmem:[%s1967_s29 + $0x60] sm:$0xff]  }
  0x38   : > { %v592_v58 = vadd.f32 %v1984_v11, %v521_v49  ;;  %v553_v60 = vmul.f32 %v1657_v50, %v1976_v5  ;;  %v655_v62 = vmax.f32 %v591_v55, 0.0  ;;  %v1597_v0 = vunpack.c.h.bf16 %v1694_v46  ;;  %1814 = vmatmul.mubr.bf16.gmra.mrb[8].mxu1 %v724_v21  ;;  %1785 = vmatprep.mubr.bf16.mxu0 %v709_v35 }
  0x39   : > { %v623_v63 = vadd.f32 %v1984_v11, %v552_v56  ;;  %v1660_v1 = vunpack.c.l.bf16 %v1710_v51  ;;  %v726_v3 = vpack.c.bf16 %v686_v57, %v685_v53  ;;  %v522_v7 = vmul.f32 %v1596_v61, %v1976_v5  ;;  %1817 = vmatprep.mubr.bf16.mxu1 %v725_v47 }
  0x3a   : > { %v656_v4 = vmax.f32 %v592_v58, 0.0  ;;  %v624_v6 = vadd.f32 %v1984_v11, %v553_v60  ;;  %v523_v8 = vmul.f32 %v1597_v0, %v1976_v5  ;;  %v1661_v59 = vunpack.c.h.bf16 %v1710_v51  ;;  %v1713_v51 = vld [vmem:[%s1967_s29 + $0xe0] sm:$0xff]  }
  0x3b   : > { %v687_v54 = vmax.f32 %v623_v63, 0.0  ;;  %v554_v9 = vmul.f32 %v1660_v1, %v1976_v5  ;;  %v593_v14 = vadd.f32 %v1984_v11, %v522_v7  ;;  %v1600_v15 = vunpack.c.l.bf16 %v1695_v2 }
  0x3c   : > { %v711_v12 = vpack.c.bf16 %v656_v4, %v655_v62  ;;  %v688_v13 = vmax.f32 %v624_v6, 0.0  ;;  %v594_v17 = vadd.f32 %v1984_v11, %v523_v8  ;;  %v555_v16 = vmul.f32 %v1661_v59, %v1976_v5 }
  0x3d   : > { %v625_v18 = vadd.f32 %v1984_v11, %v554_v9  ;;  %v1601_v19 = vunpack.c.h.bf16 %v1695_v2  ;;  %v657_v22 = vmax.f32 %v593_v14, 0.0  ;;  %v524_v23 = vmul.f32 %v1600_v15, %v1976_v5  ;;  %v1698_v2 = vld [vmem:[%s1967_s29 + $0x68] sm:$0xff]  }
  0x3e   : > { %v727_v21 = vpack.c.bf16 %v688_v13, %v687_v54  ;;  %v1664_v24 = vunpack.c.l.bf16 %v1711_v10  ;;  %v658_v25 = vmax.f32 %v594_v17, 0.0  ;;  %v626_v26 = vadd.f32 %v1984_v11, %v555_v16  ;;  %v1714_v54 = vld [vmem:[%s1967_s29 + $0xe8] sm:$0xff]  }
  0x3f   : > { %v689_v27 = vmax.f32 %v625_v18, 0.0  ;;  %v525_v28 = vmul.f32 %v1601_v19, %v1976_v5  ;;  %v595_v29 = vadd.f32 %v1984_v11, %v524_v23  ;;  %v1665_v30 = vunpack.c.h.bf16 %v1711_v10  ;;  %1786 = vmatmul.mubr.bf16.gmra.mrb[12].mxu0 %v710_v52  ;;  %v1699_v19 = vld [vmem:[%s1967_s29 + $0x70] sm:$0xff]  }
  0x40   : > { %v556_v31 = vmul.f32 %v1664_v24, %v1976_v5  ;;  %v1604_v32 = vunpack.c.l.bf16 %v1696_v20  ;;  %v712_v35 = vpack.c.bf16 %v658_v25, %v657_v22  ;;  %v690_v36 = vmax.f32 %v626_v26, 0.0  ;;  %1818 = vmatmul.mubr.bf16.gmra.mrb[12].mxu1 %v726_v3  ;;  %1789 = vmatprep.mubr.bf16.mxu0 %v711_v12 }
  0x41   : > { %v596_v37 = vadd.f32 %v1984_v11, %v525_v28  ;;  %v1605_v38 = vunpack.c.h.bf16 %v1696_v20  ;;  %v659_v39 = vmax.f32 %v595_v29, 0.0  ;;  %v557_v40 = vmul.f32 %v1665_v30, %v1976_v5  ;;  %1821 = vmatprep.mubr.bf16.mxu1 %v727_v21  ;;  %v1715_v28 = vld [vmem:[%s1967_s29 + $0xf0] sm:$0xff]  }
  0x42   : > { %v627_v41 = vadd.f32 %v1984_v11, %v556_v31  ;;  %v526_v42 = vmul.f32 %v1604_v32, %v1976_v5  ;;  %v728_v45 = vpack.c.bf16 %v690_v36, %v689_v27  ;;  %v1668_v46 = vunpack.c.l.bf16 %v1712_v33 }
  0x43   : > { %v660_v34 = vmax.f32 %v596_v37, 0.0  ;;  %v527_v43 = vmul.f32 %v1605_v38, %v1976_v5  ;;  %v628_v47 = vadd.f32 %v1984_v11, %v557_v40  ;;  %v1669_v50 = vunpack.c.h.bf16 %v1712_v33  ;;  %v1700_v38 = vld [vmem:[%s1967_s29 + $0x78] sm:$0xff]  }
  0x44   : > { %v691_v48 = vmax.f32 %v627_v41, 0.0  ;;  %v597_v49 = vadd.f32 %v1984_v11, %v526_v42  ;;  %v558_v52 = vmul.f32 %v1668_v46, %v1976_v5  ;;  %v1608_v56 = vunpack.c.l.bf16 %v1697_v44 }
  0x45   : > { %v713_v53 = vpack.c.bf16 %v660_v34, %v659_v39  ;;  %v598_v55 = vadd.f32 %v1984_v11, %v527_v43  ;;  %v692_v57 = vmax.f32 %v628_v47, 0.0  ;;  %v559_v60 = vmul.f32 %v1669_v50, %v1976_v5  ;;  %v1716_v50 = vld [vmem:[%s1967_s29 + $0xf8] sm:$0xff]  }
  0x46   : > { %v661_v58 = vmax.f32 %v597_v49, 0.0  ;;  %v1609_v61 = vunpack.c.h.bf16 %v1697_v44  ;;  %v629_v63 = vadd.f32 %v1984_v11, %v558_v52  ;;  %v528_v0 = vmul.f32 %v1608_v56, %v1976_v5 }
  0x47   : > { %v662_v62 = vmax.f32 %v598_v55, 0.0  ;;  %v1672_v1 = vunpack.c.l.bf16 %v1713_v51  ;;  %v729_v3 = vpack.c.bf16 %v692_v57, %v691_v48  ;;  %v630_v4 = vadd.f32 %v1984_v11, %v559_v60  ;;  %1790 = vmatmul.mubr.bf16.gmra.mrb[16].mxu0 %v712_v35 }
  0x48   : > { %v529_v6 = vmul.f32 %v1609_v61, %v1976_v5  ;;  %v1673_v7 = vunpack.c.h.bf16 %v1713_v51  ;;  %v693_v8 = vmax.f32 %v629_v63, 0.0  ;;  %v599_v59 = vadd.f32 %v1984_v11, %v528_v0  ;;  %1822 = vmatmul.mubr.bf16.gmra.mrb[16].mxu1 %v728_v45  ;;  %1793 = vmatprep.mubr.bf16.mxu0 %v713_v53 }
  0x49   : > { %v560_v9 = vmul.f32 %v1672_v1, %v1976_v5  ;;  %v694_v10 = vmax.f32 %v630_v4, 0.0  ;;  %v1612_v14 = vunpack.c.l.bf16 %v1698_v2  ;;  %v714_v15 = vpack.c.bf16 %v662_v62, %v661_v58  ;;  %1825 = vmatprep.mubr.bf16.mxu1 %v729_v3 }
  0x4a   : > { %v600_v12 = vadd.f32 %v1984_v11, %v529_v6  ;;  %v561_v13 = vmul.f32 %v1673_v7, %v1976_v5  ;;  %v1613_v16 = vunpack.c.h.bf16 %v1698_v2  ;;  %v1676_v18 = vunpack.c.l.bf16 %v1714_v54 }
  0x4b   : > { %v631_v17 = vadd.f32 %v1984_v11, %v560_v9  ;;  %v663_v20 = vmax.f32 %v599_v59, 0.0  ;;  %v530_v23 = vmul.f32 %v1612_v14, %v1976_v5  ;;  %v1677_v26 = vunpack.c.h.bf16 %v1714_v54 }
  0x4c   : > { %v664_v21 = vmax.f32 %v600_v12, 0.0  ;;  %v632_v22 = vadd.f32 %v1984_v11, %v561_v13  ;;  %v531_v25 = vmul.f32 %v1613_v16, %v1976_v5  ;;  %v562_v27 = vmul.f32 %v1676_v18, %v1976_v5 }
  0x4d   : > { %v695_v24 = vmax.f32 %v631_v17, 0.0  ;;  %v730_v29 = vpack.c.bf16 %v694_v10, %v693_v8  ;;  %v601_v31 = vadd.f32 %v1984_v11, %v530_v23  ;;  %v1616_v32 = vunpack.c.l.bf16 %v1699_v19 }
  0x4e   : > { %v696_v30 = vmax.f32 %v632_v22, 0.0  ;;  %v602_v33 = vadd.f32 %v1984_v11, %v531_v25  ;;  %v563_v35 = vmul.f32 %v1677_v26, %v1976_v5  ;;  %v633_v36 = vadd.f32 %v1984_v11, %v562_v27 }
  0x4f   : > { %v1617_v37 = vunpack.c.h.bf16 %v1699_v19  ;;  %v715_v39 = vpack.c.bf16 %v664_v21, %v663_v20  ;;  %v532_v41 = vmul.f32 %v1616_v32, %v1976_v5  ;;  %v1680_v42 = vunpack.c.l.bf16 %v1715_v28  ;;  %1794 = vmatmul.mubr.bf16.gmra.mrb[20].mxu0 %v714_v15 }
  0x50   : > { %v731_v40 = vpack.c.bf16 %v696_v30, %v695_v24  ;;  %v665_v44 = vmax.f32 %v601_v31, 0.0  ;;  %v666_v45 = vmax.f32 %v602_v33, 0.0  ;;  %v634_v34 = vadd.f32 %v1984_v11, %v563_v35  ;;  %1826 = vmatmul.mubr.bf16.gmra.mrb[20].mxu1 %v730_v29 }
  0x51   : > { %v533_v43 = vmul.f32 %v1617_v37, %v1976_v5  ;;  %v603_v46 = vadd.f32 %v1984_v11, %v532_v41  ;;  %v1681_v47 = vunpack.c.h.bf16 %v1715_v28  ;;  %v564_v48 = vmul.f32 %v1680_v42, %v1976_v5  ;;  %1797 = vmatprep.mubr.bf16.mxu0 %v715_v39 }
  0x52   : > { %v1620_v49 = vunpack.c.l.bf16 %v1700_v38  ;;  %v697_v51 = vmax.f32 %v633_v36, 0.0  ;;  %v698_v53 = vmax.f32 %v634_v34, 0.0  ;;  %v1621_v52 = vunpack.c.h.bf16 %v1700_v38  ;;  %1829 = vmatprep.mubr.bf16.mxu1 %v731_v40 }
  0x53   : > { %v604_v55 = vadd.f32 %v1984_v11, %v533_v43  ;;  %v667_v56 = vmax.f32 %v603_v46, 0.0  ;;  %v565_v57 = vmul.f32 %v1681_v47, %v1976_v5  ;;  %v635_v58 = vadd.f32 %v1984_v11, %v564_v48 }
  0x54   : > { %v534_v60 = vmul.f32 %v1620_v49, %v1976_v5  ;;  %v535_v62 = vmul.f32 %v1621_v52, %v1976_v5  ;;  %v1684_v63 = vunpack.c.l.bf16 %v1716_v50  ;;  %v716_v0 = vpack.c.bf16 %v666_v45, %v665_v44 }
  0x55   : > { %v668_v61 = vmax.f32 %v604_v55, 0.0  ;;  %v636_v1 = vadd.f32 %v1984_v11, %v565_v57  ;;  %v699_v2 = vmax.f32 %v635_v58, 0.0  ;;  %v1685_v3 = vunpack.c.h.bf16 %v1716_v50 }
  0x56   : > { %v732_v4 = vpack.c.bf16 %v698_v53, %v697_v51  ;;  %v605_v6 = vadd.f32 %v1984_v11, %v534_v60  ;;  %v606_v7 = vadd.f32 %v1984_v11, %v535_v62  ;;  %v566_v54 = vmul.f32 %v1684_v63, %v1976_v5 }
  0x57   : > { %v717_v8 = vpack.c.bf16 %v668_v61, %v667_v56  ;;  %v700_v59 = vmax.f32 %v636_v1, 0.0  ;;  %v567_v9 = vmul.f32 %v1685_v3, %v1976_v5  ;;  %1798 = vmatmul.mubr.bf16.gmra.mrb[24].mxu0 %v716_v0 }
  0x58   : > { %v637_v10 = vadd.f32 %v1984_v11, %v566_v54  ;;  %1830 = vmatmul.mubr.bf16.gmra.mrb[24].mxu1 %v732_v4  ;;  %v669_v14 = vmax.f32 %v605_v6, 0.0  ;;  %v670_v15 = vmax.f32 %v606_v7, 0.0 }
  0x59   : > { %v733_v12 = vpack.c.bf16 %v700_v59, %v699_v2  ;;  %v638_v13 = vadd.f32 %v1984_v11, %v567_v9  ;;  %1801 = vmatprep.mubr.bf16.mxu0 %v717_v8 }
  0x5a   : > { %v701_v17 = vmax.f32 %v637_v10, 0.0  ;;  %v718_v18 = vpack.c.bf16 %v670_v15, %v669_v14 }
  0x5b   : > { %1833 = vmatprep.mubr.bf16.mxu1 %v733_v12  ;;  %v702_v16 = vmax.f32 %v638_v13, 0.0 }
  0x5d   : > { %v734_v19 = vpack.c.bf16 %v702_v16, %v701_v17 }
  0x5f   : > { %1802 = vmatmul.mubr.bf16.gmra.mrb[28].mxu0 %v718_v18 }
  0x60   : > { %1834 = vmatmul.mubr.bf16.gmra.mrb[28].mxu1 %v734_v19 }
  0xfa   : > { %v1775_v5 = vpop.f32.mrb[0].mxu0 }
  0xfb   : > { %v1807_v11 = vpop.f32.mrb[0].mxu1  ;;  %1349 = vst [vmem:[%s2167_s25 + $0x10] sm:$0xff] %v1775_v5  ;;  %v897_v20 = vpop.f32.mrb[1].mxu0 }
  0xfc   : > { %1381 = vst [vmem:[%s2167_s25 + $0x110] sm:$0xff] %v1807_v11  ;;  %v1025_v21 = vpop.f32.mrb[1].mxu1  ;;  %1347 = vst [vmem:[%s2167_s25] sm:$0xff] %v897_v20  ;;  %v1776_v22 = vpop.f32.mrb[2].mxu0 }
  0xfd   : > { %1379 = vst [vmem:[%s2167_s25 + $0x100] sm:$0xff] %v1025_v21  ;;  %v1808_v23 = vpop.f32.mrb[2].mxu1  ;;  %1350 = vst [vmem:[%s2167_s25 + $0x18] sm:$0xff] %v1776_v22  ;;  %v900_v24 = vpop.f32.mrb[3].mxu0 }
  0xfe   : > { %1382 = vst [vmem:[%s2167_s25 + $0x118] sm:$0xff] %v1808_v23  ;;  %v1028_v25 = vpop.f32.mrb[3].mxu1  ;;  %1348 = vst [vmem:[%s2167_s25 + $0x8] sm:$0xff] %v900_v24 }
  0xff   : > { %1380 = vst [vmem:[%s2167_s25 + $0x108] sm:$0xff] %v1028_v25 }
 0x102   : > { %v1779_v26 = vpop.f32.mrb[4].mxu0 }
 0x103   : > { %v1811_v27 = vpop.f32.mrb[4].mxu1  ;;  %1353 = vst [vmem:[%s2167_s25 + $0x30] sm:$0xff] %v1779_v26  ;;  %v913_v28 = vpop.f32.mrb[5].mxu0 }
 0x104   : > { %1385 = vst [vmem:[%s2167_s25 + $0x130] sm:$0xff] %v1811_v27  ;;  %v1041_v29 = vpop.f32.mrb[5].mxu1  ;;  %1351 = vst [vmem:[%s2167_s25 + $0x20] sm:$0xff] %v913_v28  ;;  %v1780_v30 = vpop.f32.mrb[6].mxu0 }
 0x105   : > { %1383 = vst [vmem:[%s2167_s25 + $0x120] sm:$0xff] %v1041_v29  ;;  %v1812_v31 = vpop.f32.mrb[6].mxu1  ;;  %1354 = vst [vmem:[%s2167_s25 + $0x38] sm:$0xff] %v1780_v30  ;;  %v916_v32 = vpop.f32.mrb[7].mxu0 }
 0x106   : > { %1386 = vst [vmem:[%s2167_s25 + $0x138] sm:$0xff] %v1812_v31  ;;  %v1044_v33 = vpop.f32.mrb[7].mxu1  ;;  %1352 = vst [vmem:[%s2167_s25 + $0x28] sm:$0xff] %v916_v32 }
 0x107   : > { %1384 = vst [vmem:[%s2167_s25 + $0x128] sm:$0xff] %v1044_v33 }
 0x10a   : > { %v1783_v35 = vpop.f32.mrb[8].mxu0 }
 0x10b   : > { %v1815_v36 = vpop.f32.mrb[8].mxu1  ;;  %1357 = vst [vmem:[%s2167_s25 + $0x50] sm:$0xff] %v1783_v35  ;;  %v929_v37 = vpop.f32.mrb[9].mxu0 }
 0x10c   : > { %1389 = vst [vmem:[%s2167_s25 + $0x150] sm:$0xff] %v1815_v36  ;;  %v1057_v38 = vpop.f32.mrb[9].mxu1  ;;  %1355 = vst [vmem:[%s2167_s25 + $0x40] sm:$0xff] %v929_v37  ;;  %v1784_v39 = vpop.f32.mrb[10].mxu0 }
 0x10d   : > { %1387 = vst [vmem:[%s2167_s25 + $0x140] sm:$0xff] %v1057_v38  ;;  %v1816_v40 = vpop.f32.mrb[10].mxu1  ;;  %1358 = vst [vmem:[%s2167_s25 + $0x58] sm:$0xff] %v1784_v39  ;;  %v932_v41 = vpop.f32.mrb[11].mxu0 }
 0x10e   : > { %1390 = vst [vmem:[%s2167_s25 + $0x158] sm:$0xff] %v1816_v40  ;;  %v1060_v42 = vpop.f32.mrb[11].mxu1  ;;  %1356 = vst [vmem:[%s2167_s25 + $0x48] sm:$0xff] %v932_v41 }
 0x10f   : > { %1388 = vst [vmem:[%s2167_s25 + $0x148] sm:$0xff] %v1060_v42 }
 0x112   : > { %v1787_v44 = vpop.f32.mrb[12].mxu0 }
 0x113   : > { %v1819_v45 = vpop.f32.mrb[12].mxu1  ;;  %1361 = vst [vmem:[%s2167_s25 + $0x70] sm:$0xff] %v1787_v44  ;;  %v945_v34 = vpop.f32.mrb[13].mxu0 }
 0x114   : > { %1393 = vst [vmem:[%s2167_s25 + $0x170] sm:$0xff] %v1819_v45  ;;  %v1073_v43 = vpop.f32.mrb[13].mxu1  ;;  %1359 = vst [vmem:[%s2167_s25 + $0x60] sm:$0xff] %v945_v34  ;;  %v1788_v46 = vpop.f32.mrb[14].mxu0 }
 0x115   : > { %1391 = vst [vmem:[%s2167_s25 + $0x160] sm:$0xff] %v1073_v43  ;;  %v1820_v47 = vpop.f32.mrb[14].mxu1  ;;  %1362 = vst [vmem:[%s2167_s25 + $0x78] sm:$0xff] %v1788_v46  ;;  %v948_v48 = vpop.f32.mrb[15].mxu0 }
 0x116   : > { %1394 = vst [vmem:[%s2167_s25 + $0x178] sm:$0xff] %v1820_v47  ;;  %v1076_v49 = vpop.f32.mrb[15].mxu1  ;;  %1360 = vst [vmem:[%s2167_s25 + $0x68] sm:$0xff] %v948_v48 }
 0x117   : > { %1392 = vst [vmem:[%s2167_s25 + $0x168] sm:$0xff] %v1076_v49 }
 0x11a   : > { %v1791_v50 = vpop.f32.mrb[16].mxu0 }
 0x11b   : > { %v1823_v51 = vpop.f32.mrb[16].mxu1  ;;  %1365 = vst [vmem:[%s2167_s25 + $0x90] sm:$0xff] %v1791_v50  ;;  %v961_v53 = vpop.f32.mrb[17].mxu0 }
 0x11c   : > { %1397 = vst [vmem:[%s2167_s25 + $0x190] sm:$0xff] %v1823_v51  ;;  %v1089_v55 = vpop.f32.mrb[17].mxu1  ;;  %1363 = vst [vmem:[%s2167_s25 + $0x80] sm:$0xff] %v961_v53  ;;  %v1792_v52 = vpop.f32.mrb[18].mxu0 }
 0x11d   : > { %1395 = vst [vmem:[%s2167_s25 + $0x180] sm:$0xff] %v1089_v55  ;;  %v1824_v56 = vpop.f32.mrb[18].mxu1  ;;  %1366 = vst [vmem:[%s2167_s25 + $0x98] sm:$0xff] %v1792_v52  ;;  %v964_v57 = vpop.f32.mrb[19].mxu0 }
 0x11e   : > { %1398 = vst [vmem:[%s2167_s25 + $0x198] sm:$0xff] %v1824_v56  ;;  %v1092_v58 = vpop.f32.mrb[19].mxu1  ;;  %1364 = vst [vmem:[%s2167_s25 + $0x88] sm:$0xff] %v964_v57 }
 0x11f   : > { %1396 = vst [vmem:[%s2167_s25 + $0x188] sm:$0xff] %v1092_v58 }
 0x122   : > { %v1795_v60 = vpop.f32.mrb[20].mxu0 }
 0x123   : > { %v1827_v61 = vpop.f32.mrb[20].mxu1  ;;  %1369 = vst [vmem:[%s2167_s25 + $0xb0] sm:$0xff] %v1795_v60  ;;  %v977_v62 = vpop.f32.mrb[21].mxu0 }
 0x124   : > { %1401 = vst [vmem:[%s2167_s25 + $0x1b0] sm:$0xff] %v1827_v61  ;;  %v1105_v63 = vpop.f32.mrb[21].mxu1  ;;  %1367 = vst [vmem:[%s2167_s25 + $0xa0] sm:$0xff] %v977_v62  ;;  %v1796_v0 = vpop.f32.mrb[22].mxu0 }
 0x125   : > { %1399 = vst [vmem:[%s2167_s25 + $0x1a0] sm:$0xff] %v1105_v63  ;;  %v1828_v1 = vpop.f32.mrb[22].mxu1  ;;  %1370 = vst [vmem:[%s2167_s25 + $0xb8] sm:$0xff] %v1796_v0  ;;  %v980_v2 = vpop.f32.mrb[23].mxu0 }
 0x126   : > { %1402 = vst [vmem:[%s2167_s25 + $0x1b8] sm:$0xff] %v1828_v1  ;;  %v1108_v3 = vpop.f32.mrb[23].mxu1  ;;  %1368 = vst [vmem:[%s2167_s25 + $0xa8] sm:$0xff] %v980_v2 }
 0x127   : > { %1400 = vst [vmem:[%s2167_s25 + $0x1a8] sm:$0xff] %v1108_v3 }
 0x12a   : > { %v1799_v4 = vpop.f32.mrb[24].mxu0 }
 0x12b   : > { %v1831_v6 = vpop.f32.mrb[24].mxu1  ;;  %1373 = vst [vmem:[%s2167_s25 + $0xd0] sm:$0xff] %v1799_v4  ;;  %v993_v7 = vpop.f32.mrb[25].mxu0 }
 0x12c   : > { %1405 = vst [vmem:[%s2167_s25 + $0x1d0] sm:$0xff] %v1831_v6  ;;  %v1121_v54 = vpop.f32.mrb[25].mxu1  ;;  %1371 = vst [vmem:[%s2167_s25 + $0xc0] sm:$0xff] %v993_v7  ;;  %v1800_v8 = vpop.f32.mrb[26].mxu0 }
 0x12d   : > { %1403 = vst [vmem:[%s2167_s25 + $0x1c0] sm:$0xff] %v1121_v54  ;;  %v1832_v59 = vpop.f32.mrb[26].mxu1  ;;  %1374 = vst [vmem:[%s2167_s25 + $0xd8] sm:$0xff] %v1800_v8  ;;  %v996_v9 = vpop.f32.mrb[27].mxu0 }
 0x12e   : > { %1406 = vst [vmem:[%s2167_s25 + $0x1d8] sm:$0xff] %v1832_v59  ;;  %v1124_v10 = vpop.f32.mrb[27].mxu1  ;;  %1372 = vst [vmem:[%s2167_s25 + $0xc8] sm:$0xff] %v996_v9 }
 0x12f   : > { %1404 = vst [vmem:[%s2167_s25 + $0x1c8] sm:$0xff] %v1124_v10 }
 0x132   : > { %v1803_v12 = vpop.f32.mrb[28].mxu0 }
 0x133   : > { %v1835_v13 = vpop.f32.mrb[28].mxu1  ;;  %1377 = vst [vmem:[%s2167_s25 + $0xf0] sm:$0xff] %v1803_v12  ;;  %v1009_v14 = vpop.f32.mrb[29].mxu0 }
 0x134   : > { %1409 = vst [vmem:[%s2167_s25 + $0x1f0] sm:$0xff] %v1835_v13  ;;  %v1137_v15 = vpop.f32.mrb[29].mxu1  ;;  %1375 = vst [vmem:[%s2167_s25 + $0xe0] sm:$0xff] %v1009_v14  ;;  %v1804_v17 = vpop.f32.mrb[30].mxu0 }
 0x135   : > { %1407 = vst [vmem:[%s2167_s25 + $0x1e0] sm:$0xff] %v1137_v15  ;;  %v1836_v16 = vpop.f32.mrb[30].mxu1  ;;  %1378 = vst [vmem:[%s2167_s25 + $0xf8] sm:$0xff] %v1804_v17  ;;  %v1012_v18 = vpop.f32.mrb[31].mxu0 }
 0x136   : > { %1410 = vst [vmem:[%s2167_s25 + $0x1f8] sm:$0xff] %v1836_v16  ;;  %v1140_v19 = vpop.f32.mrb[31].mxu1  ;;  %1376 = vst [vmem:[%s2167_s25 + $0xe8] sm:$0xff] %v1012_v18 }
 0x137   : > { %1408 = vst [vmem:[%s2167_s25 + $0x1e8] sm:$0xff] %v1140_v19 }
 0x138 PF: > { %s14_s17 = sadd.s32 1, %s1907_s17   ;;  %s2247_s15 = smov %s1903_s16 }
 0x139   : > { %p11_p5 = scmp.ge.s32.totalorder %s14_s17, 6   ;;  %s2248_s16 = smov %s2250_s18 }
 0x13b   :  { %13 = sbr.rel (!%p11_p5) target bundleno = 2 (0x2), region = 83 }

// kernel: generator_forward.19
= control target key start
LH: loop header
LB: loop body
LE: loop exit
PB: predicated region body
PF: predicated region fallthrough
CT: control target
= control target key end

     0   :  { %vm73_vm0 = vcmask 523264   ;;  %s391_s0 = inlined_call_operand.vmem [shape: f32[128,192], index: 0, kind: input, shape index: {}]   ;;  %s392_s1 = inlined_call_operand.vmem [shape: f32[128,192], index: 1, kind: output, shape index: {}]  }
   0x1   :  { %v8_v0 = vld [vmem:[%s391_s0] sm:$0xff]  ;;  %v9_v1 = vld [vmem:[%s391_s0 + $0x8] sm:$0xff]  ;;  %v10_v2 = vld [vmem:[%s391_s0 + $0x10] sm:$0xff] }
   0x2   :  { %109 = vtanh.f32 %v8_v0  ;;  %v11_v3 = vld [vmem:[%s391_s0 + $0x18] sm:$0xff]  ;;  %v12_v4 = vld [vmem:[%s391_s0 + $0x20] sm:$0xff]  ;;  %v13_v5 = vld [vmem:[%s391_s0 + $0x28] sm:$0xff] }
   0x3   :  { %111 = vtanh.f32 %v9_v1  ;;  %v14_v6 = vld [vmem:[%s391_s0 + $0x30] sm:$0xff]  ;;  %v15_v7 = vld [vmem:[%s391_s0 + $0x38] sm:$0xff]  ;;  %v16_v8 = vld [vmem:[%s391_s0 + $0x40] sm:$0xff] }
   0x4   :  { %113 = vtanh.f32 %v10_v2  ;;  %v17_v9 = vld [vmem:[%s391_s0 + $0x48] sm:$0xff]  ;;  %v18_v10 = vld [vmem:[%s391_s0 + $0x50] sm:$0xff]  ;;  %v19_v11 = vld [vmem:[%s391_s0 + $0x58] sm:$0xff] }
   0x5   :  { %115 = vtanh.f32 %v11_v3  ;;  %v20_v12 = vld [vmem:[%s391_s0 + $0x60] sm:$0xff]  ;;  %v21_v14 = vld [vmem:[%s391_s0 + $0x68] sm:$0xff]  ;;  %v22_v16 = vld [vmem:[%s391_s0 + $0x70] sm:$0xff] }
   0x6   :  { %117 = vtanh.f32 %v12_v4  ;;  %v23_v18 = vld [vmem:[%s391_s0 + $0x78] sm:$0xff]  ;;  %v24_v20 = vld [vmem:[%s391_s0 + $0x80] sm:$0xff]  ;;  %v25_v22 = vld [vmem:[%s391_s0 + $0x88] sm:$0xff] }
   0x7   :  { %119 = vtanh.f32 %v13_v5  ;;  %v26_v24 = vld [vmem:[%s391_s0 + $0x90] sm:$0xff]  ;;  %v27_v26 = vld [vmem:[%s391_s0 + $0x98] sm:$0xff]  ;;  %v28_v28 = vld [vmem:[%s391_s0 + $0xa0] sm:$0xff] }
   0x8   :  { %121 = vtanh.f32 %v14_v6  ;;  %v29_v30 = vld [vmem:[%s391_s0 + $0xa8] sm:$0xff]  ;;  %v30_v32 = vld [vmem:[%s391_s0 + $0xb0] sm:$0xff]  ;;  %v31_v34 = vld [vmem:[%s391_s0 + $0xb8] sm:$0xff] }
   0x9   :  { %123 = vtanh.f32 %v15_v7  ;;  %v32_v36 = vld [vmem:[%s391_s0 + $0xc0] sm:$0xff]  ;;  %v33_v38 = vld [vmem:[%s391_s0 + $0xc8] sm:$0xff]  ;;  %v34_v40 = vld [vmem:[%s391_s0 + $0xd0] sm:$0xff] }
   0xa   :  { %125 = vtanh.f32 %v16_v8  ;;  %v35_v42 = vld [vmem:[%s391_s0 + $0xd8] sm:$0xff]  ;;  %v36_v44 = vld [vmem:[%s391_s0 + $0xe0] sm:$0xff]  ;;  %v37_v46 = vld [vmem:[%s391_s0 + $0xe8] sm:$0xff] }
   0xb   :  { %127 = vtanh.f32 %v17_v9  ;;  %v38_v48 = vld [vmem:[%s391_s0 + $0xf0] sm:$0xff]  ;;  %v39_v50 = vld [vmem:[%s391_s0 + $0xf8] sm:$0xff] }
   0xc   :  { %v110_v13 = vpop.eup %109  ;;  %129 = vtanh.f32 %v18_v10 }
   0xd   :  { %v112_v15 = vpop.eup %111  ;;  %72 = vst [vmem:[%s392_s1] sm:$0xff] %v110_v13  ;;  %131 = vtanh.f32 %v19_v11 }
   0xe   :  { %v114_v17 = vpop.eup %113  ;;  %74 = vst.msk [vmem:[%s392_s1 + $0x8] sm:$0xff] %vm73_vm0, %v112_v15  ;;  %133 = vtanh.f32 %v20_v12 }
   0xf   :  { %v116_v19 = vpop.eup %115  ;;  %75 = vst [vmem:[%s392_s1 + $0x10] sm:$0xff] %v114_v17  ;;  %135 = vtanh.f32 %v21_v14 }
  0x10   :  { %v118_v21 = vpop.eup %117  ;;  %76 = vst.msk [vmem:[%s392_s1 + $0x18] sm:$0xff] %vm73_vm0, %v116_v19  ;;  %137 = vtanh.f32 %v22_v16 }
  0x11   :  { %v120_v23 = vpop.eup %119  ;;  %77 = vst [vmem:[%s392_s1 + $0x20] sm:$0xff] %v118_v21  ;;  %139 = vtanh.f32 %v23_v18 }
  0x12   :  { %v122_v25 = vpop.eup %121  ;;  %78 = vst.msk [vmem:[%s392_s1 + $0x28] sm:$0xff] %vm73_vm0, %v120_v23  ;;  %141 = vtanh.f32 %v24_v20 }
  0x13   :  { %v124_v27 = vpop.eup %123  ;;  %79 = vst [vmem:[%s392_s1 + $0x30] sm:$0xff] %v122_v25  ;;  %143 = vtanh.f32 %v25_v22 }
  0x14   :  { %v126_v29 = vpop.eup %125  ;;  %80 = vst.msk [vmem:[%s392_s1 + $0x38] sm:$0xff] %vm73_vm0, %v124_v27  ;;  %145 = vtanh.f32 %v26_v24 }
  0x15   :  { %v128_v31 = vpop.eup %127  ;;  %81 = vst [vmem:[%s392_s1 + $0x40] sm:$0xff] %v126_v29  ;;  %147 = vtanh.f32 %v27_v26 }
  0x16   :  { %v130_v33 = vpop.eup %129  ;;  %82 = vst.msk [vmem:[%s392_s1 + $0x48] sm:$0xff] %vm73_vm0, %v128_v31  ;;  %149 = vtanh.f32 %v28_v28 }
  0x17   :  { %v132_v35 = vpop.eup %131  ;;  %83 = vst [vmem:[%s392_s1 + $0x50] sm:$0xff] %v130_v33  ;;  %151 = vtanh.f32 %v29_v30 }
  0x18   :  { %v134_v37 = vpop.eup %133  ;;  %84 = vst.msk [vmem:[%s392_s1 + $0x58] sm:$0xff] %vm73_vm0, %v132_v35  ;;  %153 = vtanh.f32 %v30_v32 }
  0x19   :  { %v136_v39 = vpop.eup %135  ;;  %85 = vst [vmem:[%s392_s1 + $0x60] sm:$0xff] %v134_v37  ;;  %155 = vtanh.f32 %v31_v34 }
  0x1a   :  { %v138_v41 = vpop.eup %137  ;;  %86 = vst.msk [vmem:[%s392_s1 + $0x68] sm:$0xff] %vm73_vm0, %v136_v39  ;;  %157 = vtanh.f32 %v32_v36 }
  0x1b   :  { %v140_v43 = vpop.eup %139  ;;  %87 = vst [vmem:[%s392_s1 + $0x70] sm:$0xff] %v138_v41  ;;  %159 = vtanh.f32 %v33_v38 }
  0x1c   :  { %v142_v45 = vpop.eup %141  ;;  %88 = vst.msk [vmem:[%s392_s1 + $0x78] sm:$0xff] %vm73_vm0, %v140_v43  ;;  %161 = vtanh.f32 %v34_v40 }
  0x1d   :  { %v144_v47 = vpop.eup %143  ;;  %89 = vst [vmem:[%s392_s1 + $0x80] sm:$0xff] %v142_v45  ;;  %163 = vtanh.f32 %v35_v42 }
  0x1e   :  { %v146_v49 = vpop.eup %145  ;;  %90 = vst.msk [vmem:[%s392_s1 + $0x88] sm:$0xff] %vm73_vm0, %v144_v47  ;;  %165 = vtanh.f32 %v36_v44 }
  0x1f   :  { %v148_v51 = vpop.eup %147  ;;  %91 = vst [vmem:[%s392_s1 + $0x90] sm:$0xff] %v146_v49  ;;  %167 = vtanh.f32 %v37_v46 }
  0x20   :  { %v150_v52 = vpop.eup %149  ;;  %92 = vst.msk [vmem:[%s392_s1 + $0x98] sm:$0xff] %vm73_vm0, %v148_v51  ;;  %169 = vtanh.f32 %v38_v48 }
  0x21   :  { %v152_v53 = vpop.eup %151  ;;  %93 = vst [vmem:[%s392_s1 + $0xa0] sm:$0xff] %v150_v52  ;;  %171 = vtanh.f32 %v39_v50 }
  0x22   :  { %v154_v54 = vpop.eup %153  ;;  %94 = vst.msk [vmem:[%s392_s1 + $0xa8] sm:$0xff] %vm73_vm0, %v152_v53 }
  0x23   :  { %v156_v55 = vpop.eup %155  ;;  %95 = vst [vmem:[%s392_s1 + $0xb0] sm:$0xff] %v154_v54 }
  0x24   :  { %v158_v56 = vpop.eup %157  ;;  %96 = vst.msk [vmem:[%s392_s1 + $0xb8] sm:$0xff] %vm73_vm0, %v156_v55 }
  0x25   :  { %v160_v57 = vpop.eup %159  ;;  %97 = vst [vmem:[%s392_s1 + $0xc0] sm:$0xff] %v158_v56 }
  0x26   :  { %v162_v58 = vpop.eup %161  ;;  %98 = vst.msk [vmem:[%s392_s1 + $0xc8] sm:$0xff] %vm73_vm0, %v160_v57 }
  0x27   :  { %v164_v59 = vpop.eup %163  ;;  %99 = vst [vmem:[%s392_s1 + $0xd0] sm:$0xff] %v162_v58 }
  0x28   :  { %v166_v60 = vpop.eup %165  ;;  %100 = vst.msk [vmem:[%s392_s1 + $0xd8] sm:$0xff] %vm73_vm0, %v164_v59 }
  0x29   :  { %v168_v61 = vpop.eup %167  ;;  %101 = vst [vmem:[%s392_s1 + $0xe0] sm:$0xff] %v166_v60 }
  0x2a   :  { %v170_v62 = vpop.eup %169  ;;  %102 = vst.msk [vmem:[%s392_s1 + $0xe8] sm:$0xff] %vm73_vm0, %v168_v61 }
  0x2b   :  { %v172_v63 = vpop.eup %171  ;;  %103 = vst [vmem:[%s392_s1 + $0xf0] sm:$0xff] %v170_v62 }
  0x2c   :  { %104 = vst.msk [vmem:[%s392_s1 + $0xf8] sm:$0xff] %vm73_vm0, %v172_v63 }

</bundles_post_ra>
